<compile_context>
chip_gen: v7x
topology: tpu7x:2x2x1
jax: 0.10.0
libtpu: 0.0.40
codegen_flags: <defaults>
</compile_context>

<pallas_src>
import jax
import jax.numpy as jnp
from jax import lax
from jax.experimental import pallas as pl
from jax.experimental.pallas import tpu as pltpu

P = 128            # lane-padded feature width (per gate / per feature dim)
BP = 8             # sublane-padded batch
NUM_LAYERS = 3
RECUR_UNROLL = 8   # bounded unroll of the serial time loop


# ----------------------------------------------------------------------------
# Single fused kernel: 3 LSTM layers + tied-embedding projection.
# ----------------------------------------------------------------------------
def _fused_lstm_kernel(x_ref, wih_ref, whh_ref, b_ref, embt_ref, pbias_ref,
                       out_ref, act_sc, gx_sc):
    n = act_sc.shape[0]                     # n = T * BP (static)
    n_steps = n // BP
    n_layers = wih_ref.shape[0]

    for layer in range(n_layers):           # static unroll over the 3 layers
        # (1) Hoisted input projection: one MXU-friendly (T*B, P) x (P, 4P)
        #     matmul per layer.  Layer 0 reads the bf16 input ref directly
        #     (no full-slab copy, no cast).
        lhs = x_ref[...] if layer == 0 else act_sc[...].astype(jnp.bfloat16)
        gx_sc[...] = (
            jnp.dot(lhs, wih_ref[layer], preferred_element_type=jnp.float32)
            + b_ref[layer])

        # (2) Serial recurrence: only h @ W_hh remains inside the time loop.
        # TODO(synk): weight-stationary W_hh (pltpu.matmul_push_rhs /
        # matmul_acc_lhs / matmul_pop) would avoid re-streaming the 128x512
        # RHS every step; kept as jnp.dot for portable lowering across
        # v5e/v6e/v7x MXU tile geometries.
        def step(t, carry):
            h, c = carry
            row = pl.multiple_of(t * BP, BP)
            g = gx_sc[pl.ds(row, BP), :] + jnp.dot(
                h.astype(jnp.bfloat16), whh_ref[layer],
                preferred_element_type=jnp.float32)
            # Fused, lane-aligned gate slabs (PyTorch nn.LSTM order i, f, g, o):
            # one sigmoid over the contiguous [i|f] slab halves EUP issues.
            sif = jax.nn.sigmoid(g[:, 0:2 * P])
            i = sif[:, 0:P]
            f = sif[:, P:2 * P]
            gg = jnp.tanh(g[:, 2 * P:3 * P])
            o = jax.nn.sigmoid(g[:, 3 * P:4 * P])
            c = f * c + i * gg
            h = o * jnp.tanh(c)
            act_sc[pl.ds(row, BP), :] = h
            return h, c

        zeros = jnp.zeros((BP, P), jnp.float32)
        lax.fori_loop(0, n_steps, step, (zeros, zeros),
                      unroll=min(RECUR_UNROLL, n_steps))

    # (3) Tied-embedding projection with a pre-transposed, 128-lane-padded RHS
    #     (P, V_pad): plain dot, lane-dense (unmasked) output stores.
    out_ref[...] = (
        jnp.dot(act_sc[...].astype(jnp.bfloat16), embt_ref[...],
                preferred_element_type=jnp.float32)
        + pbias_ref[...])


# ----------------------------------------------------------------------------
# Forward pass (forward=0, stochastic=False path of LSTMModelV2.forward)
# ----------------------------------------------------------------------------
@jax.jit
def lstm_model_forward(tokens, params):
    emb = params["embedding"]                     # (V, E) f32 (lookup table)
    V, E = emb.shape
    B, T = tokens.shape
    V_pad = params["emb_t_pad"].shape[1]

    x = jnp.take(emb, tokens, axis=0)             # (B, T, E) embedding lookup
    x = jnp.transpose(x, (1, 0, 2))               # (T, B, E) time-major
    # Pad batch -> BP sublanes, features -> P lanes, fold T into M; bf16 input
    # halves the input DMA and feeds the MXU without an in-kernel cast.
    x_p = jnp.zeros((T, BP, P), jnp.bfloat16).at[:, :B, :E].set(
        x.astype(jnp.bfloat16))
    x_p = x_p.reshape(T * BP, P)
    n = T * BP

    logits = pl.pallas_call(
        _fused_lstm_kernel,
        out_shape=jax.ShapeDtypeStruct((n, V_pad), jnp.float32),
        in_specs=[
            pl.BlockSpec((n, P), lambda: (0, 0)),
            pl.BlockSpec((NUM_LAYERS, P, 4 * P), lambda: (0, 0, 0)),
            pl.BlockSpec((NUM_LAYERS, P, 4 * P), lambda: (0, 0, 0)),
            pl.BlockSpec((NUM_LAYERS, 1, 4 * P), lambda: (0, 0, 0)),
            pl.BlockSpec((P, V_pad), lambda: (0, 0)),
            pl.BlockSpec((1, V_pad), lambda: (0, 0)),
        ],
        out_specs=pl.BlockSpec((n, V_pad), lambda: (0, 0)),
        scratch_shapes=[
            pltpu.VMEM((n, P), jnp.float32),       # activations (all layers)
            pltpu.VMEM((n, 4 * P), jnp.float32),   # hoisted input gates
        ],
        compiler_params=pltpu.CompilerParams(
            vmem_limit_bytes=32 * 1024 * 1024),
    )(x_p, params["wih_all"], params["whh_all"], params["b_all"],
      params["emb_t_pad"], params["pbias_pad"])

    # Drop batch padding and padded vocab columns.
    logits = logits.reshape(T, BP, V_pad)[:, :B, :V]
    return jnp.transpose(logits, (1, 0, 2))        # (B, T, word_count)
    # TODO(synk): forward>0 autoregressive generation and the stochastic
    # gumbel-noise branch of LSTMModelV2.forward are not implemented
    # (the default call uses forward=0, stochastic=False).


# ----------------------------------------------------------------------------
# Parameter initialization (mirrors nn.Module shapes; also builds the padded,
# lane-aligned, stacked layout the fused kernel consumes).
# ----------------------------------------------------------------------------
def init_params(key, word_count, embedding_dim, hidden_dim):
    keys = jax.random.split(key, 4)
    # embedding.weight (V, E) ~ U(-0.1, 0.1); projection.weight tied to it,
    # projection.bias = 0.
    emb = jax.random.uniform(
        keys[0], (word_count, embedding_dim), jnp.float32, -0.1, 0.1)
    proj_bias = jnp.zeros((word_count,), jnp.float32)

    layer_dims = [
        (embedding_dim, hidden_dim),
        (hidden_dim, hidden_dim),
        (hidden_dim, embedding_dim),
    ]
    lstms_raw, wih_all, whh_all, b_all = [], [], [], []
    for li, (din, h) in enumerate(layer_dims):
        k = float(h) ** -0.5
        kw = jax.random.split(keys[1 + li], 4)
        # PyTorch stores (4H, Din)/(4H, H); we store transposed for x @ W.
        w_ih = jax.random.uniform(kw[0], (din, 4 * h), jnp.float32, -k, k)
        w_hh = jax.random.uniform(kw[1], (h, 4 * h), jnp.float32, -k, k)
        b_ih = jax.random.uniform(kw[2], (4 * h,), jnp.float32, -k, k)
        b_hh = jax.random.uniform(kw[3], (4 * h,), jnp.float32, -k, k)
        b = b_ih + b_hh
        lstms_raw.append((w_ih, w_hh, b))

        # Lane-aligned padded layout: gate g occupies columns [g*P, g*P + h),
        # input rows beyond din (and hidden rows beyond h) are zero.
        wih_p = jnp.zeros((P, 4 * P), jnp.float32)
        whh_p = jnp.zeros((P, 4 * P), jnp.float32)
        b_p = jnp.zeros((4 * P,), jnp.float32)
        for g in range(4):
            wih_p = wih_p.at[:din, g * P:g * P + h].set(w_ih[:, g * h:(g + 1) * h])
            whh_p = whh_p.at[:h, g * P:g * P + h].set(w_hh[:, g * h:(g + 1) * h])
            b_p = b_p.at[g * P:g * P + h].set(b[g * h:(g + 1) * h])
        wih_all.append(wih_p)
        whh_all.append(whh_p)
        b_all.append(b_p)

    # Pre-transposed, vocab-padded tied embedding: (P, V_pad), V_pad % 128 == 0.
    v_pad = max(P, ((word_count + P - 1) // P) * P)
    emb_t_pad = jnp.zeros((P, v_pad), jnp.float32)
    emb_t_pad = emb_t_pad.at[:embedding_dim, :word_count].set(emb.T)
    pbias_pad = jnp.zeros((1, v_pad), jnp.float32)
    pbias_pad = pbias_pad.at[0, :word_count].set(proj_bias)

    return {
        "embedding": emb,
        "proj_bias": proj_bias,
        "lstms": lstms_raw,                                   # for reference
        "wih_all": jnp.stack(wih_all).astype(jnp.bfloat16),   # (3, P, 4P)
        "whh_all": jnp.stack(whh_all).astype(jnp.bfloat16),   # (3, P, 4P)
        "b_all": jnp.stack(b_all).reshape(NUM_LAYERS, 1, 4 * P),
        "emb_t_pad": emb_t_pad.astype(jnp.bfloat16),          # (P, V_pad)
        "pbias_pad": pbias_pad,                               # (1, V_pad)
    }


# ----------------------------------------------------------------------------
# Pure-JAX reference (unpadded, f32) for a correctness sanity check.
# ----------------------------------------------------------------------------
def _reference_forward(tokens, params):
    emb = params["embedding"]
    x = jnp.take(emb, tokens, axis=0)                         # (B, T, E)
    for (w_ih, w_hh, b) in params["lstms"]:
        B = x.shape[0]
        H = w_hh.shape[0]

        def cell(carry, x_t):
            h, c = carry
            g = x_t @ w_ih + h @ w_hh + b
            i = jax.nn.sigmoid(g[:, 0 * H:1 * H])
            f = jax.nn.sigmoid(g[:, 1 * H:2 * H])
            gg = jnp.tanh(g[:, 2 * H:3 * H])
            o = jax.nn.sigmoid(g[:, 3 * H:4 * H])
            c = f * c + i * gg
            h = o * jnp.tanh(c)
            return (h, c), h

        init = (jnp.zeros((B, H), jnp.float32), jnp.zeros((B, H), jnp.float32))
        _, hs = lax.scan(cell, init, jnp.transpose(x, (1, 0, 2)))
        x = jnp.transpose(hs, (1, 0, 2))
    return jnp.einsum("bte,ve->btv", x, emb) + params["proj_bias"]


if __name__ == "__main__":
    WORD_COUNT = 64
    EMBEDDING_DIM = 32
    HIDDEN_DIM = 48
    BATCH = 2
    SEQ = 8

    key = jax.random.PRNGKey(0)
    k_params, k_tokens = jax.random.split(key)
    params = init_params(k_params, WORD_COUNT, EMBEDDING_DIM, HIDDEN_DIM)
    tokens = jax.random.randint(k_tokens, (BATCH, SEQ), 0, WORD_COUNT,
                                dtype=jnp.int32)

    logits = lstm_model_forward(tokens, params)
    jax.block_until_ready(logits)
    assert logits.shape == (BATCH, SEQ, WORD_COUNT)

    ref = _reference_forward(tokens, params)
    max_err = float(jnp.max(jnp.abs(logits - ref)))
    assert max_err < 3e-2, f"kernel vs reference max abs error: {max_err}"

    print("KERNEL_OK")
</pallas_src>

<mosaic_0001>
module attributes {stable_mosaic.version = 11 : i64} {
  func.func @_fused_lstm_kernel(%arg0: memref<64x128xbf16, #tpu.memory_space<vmem>>, %arg1: memref<3x128x512xbf16, #tpu.memory_space<vmem>>, %arg2: memref<3x128x512xbf16, #tpu.memory_space<vmem>>, %arg3: memref<3x1x512xf32, #tpu.memory_space<vmem>>, %arg4: memref<128x128xbf16, #tpu.memory_space<vmem>>, %arg5: memref<1x128xf32, #tpu.memory_space<vmem>>, %arg6: memref<64x128xf32, #tpu.memory_space<vmem>>, %arg7: memref<64x128xf32, #tpu.memory_space<vmem>>, %arg8: memref<64x512xf32, #tpu.memory_space<vmem>>) attributes {dimension_semantics = [], scalar_prefetch = 0 : i64, scratch_operands = 2 : i64, tpu.core_type = #tpu.core_type<tc>} {
    %c0 = arith.constant 0 : index
    %c0_0 = arith.constant 0 : index
    %0 = vector.load %arg0[%c0, %c0_0] : memref<64x128xbf16, #tpu.memory_space<vmem>>, vector<64x128xbf16>
    %c0_1 = arith.constant 0 : index
    %c0_2 = arith.constant 0 : index
    %c0_3 = arith.constant 0 : index
    %1 = vector.load %arg1[%c0_1, %c0_2, %c0_3] : memref<3x128x512xbf16, #tpu.memory_space<vmem>>, vector<1x128x512xbf16>
    %2 = vector.shape_cast %1 : vector<1x128x512xbf16> to vector<128x512xbf16>
    %cst = arith.constant dense<0.000000e+00> : vector<64x512xf32>
    %3 = tpu.matmul %0, %2, %cst {dimension_numbers = #tpu.dot_dimension_numbers<[1], [0], [0], [1], [0, 0, 1, 1], [], []>} : vector<64x128xbf16>, vector<128x512xbf16>, vector<64x512xf32> -> vector<64x512xf32>
    %c0_4 = arith.constant 0 : index
    %c0_5 = arith.constant 0 : index
    %c0_6 = arith.constant 0 : index
    %4 = vector.load %arg3[%c0_4, %c0_5, %c0_6] : memref<3x1x512xf32, #tpu.memory_space<vmem>>, vector<1x1x512xf32>
    %5 = vector.shape_cast %4 : vector<1x1x512xf32> to vector<1x512xf32>
    %6 = vector.broadcast %5 : vector<1x512xf32> to vector<64x512xf32>
    %7 = arith.addf %3, %6 : vector<64x512xf32>
    %c0_7 = arith.constant 0 : index
    %c0_8 = arith.constant 0 : index
    %8 = vector.load %arg8[%c0_7, %c0_8] : memref<64x512xf32, #tpu.memory_space<vmem>>, vector<64x512xf32>
    tpu.vector_store %arg8[%c0_7, %c0_8], %7 {strides = array<i32>} : memref<64x512xf32, #tpu.memory_space<vmem>>, vector<64x512xf32>,
    %cst_9 = arith.constant 0.000000e+00 : f32
    %9 = vector.broadcast %cst_9 : f32 to vector<8x128xf32>
    %c0_i32 = arith.constant 0 : i32
    %c8_i32 = arith.constant 8 : i32
    %10 = arith.muli %c0_i32, %c8_i32 : i32
    %11 = tpu.assume_multiple %10, 8 : i32
    %12 = arith.index_cast %11 : i32 to index
    %c0_10 = arith.constant 0 : index
    %13 = vector.load %arg8[%12, %c0_10] : memref<64x512xf32, #tpu.memory_space<vmem>>, vector<8x512xf32>
    %14 = arith.truncf %9 : vector<8x128xf32> to vector<8x128xbf16>
    %c0_11 = arith.constant 0 : index
    %c0_12 = arith.constant 0 : index
    %c0_13 = arith.constant 0 : index
    %15 = vector.load %arg2[%c0_11, %c0_12, %c0_13] : memref<3x128x512xbf16, #tpu.memory_space<vmem>>, vector<1x128x512xbf16>
    %16 = vector.shape_cast %15 : vector<1x128x512xbf16> to vector<128x512xbf16>
    %cst_14 = arith.constant dense<0.000000e+00> : vector<8x512xf32>
    %17 = tpu.matmul %14, %16, %cst_14 {dimension_numbers = #tpu.dot_dimension_numbers<[1], [0], [0], [1], [0, 0, 1, 1], [], []>} : vector<8x128xbf16>, vector<128x512xbf16>, vector<8x512xf32> -> vector<8x512xf32>
    %18 = arith.addf %13, %17 : vector<8x512xf32>
    %19 = vector.extract_strided_slice %18 {offsets = [0, 0], sizes = [8, 256], strides = [1, 1]} : vector<8x512xf32> to vector<8x256xf32>
    %20 = arith.negf %19 : vector<8x256xf32>
    %21 = math.exp %20 : vector<8x256xf32>
    %cst_15 = arith.constant 1.000000e+00 : f32
    %22 = vector.broadcast %cst_15 : f32 to vector<8x256xf32>
    %23 = arith.addf %22, %21 : vector<8x256xf32>
    %24 = arith.divf %22, %23 : vector<8x256xf32>
    %25 = vector.extract_strided_slice %24 {offsets = [0, 0], sizes = [8, 128], strides = [1, 1]} : vector<8x256xf32> to vector<8x128xf32>
    %26 = vector.extract_strided_slice %24 {offsets = [0, 128], sizes = [8, 128], strides = [1, 1]} : vector<8x256xf32> to vector<8x128xf32>
    %27 = vector.extract_strided_slice %18 {offsets = [0, 256], sizes = [8, 128], strides = [1, 1]} : vector<8x512xf32> to vector<8x128xf32>
    %28 = math.tanh %27 : vector<8x128xf32>
    %29 = vector.extract_strided_slice %18 {offsets = [0, 384], sizes = [8, 128], strides = [1, 1]} : vector<8x512xf32> to vector<8x128xf32>
    %30 = arith.negf %29 : vector<8x128xf32>
    %31 = math.exp %30 : vector<8x128xf32>
    %cst_16 = arith.constant 1.000000e+00 : f32
    %32 = vector.broadcast %cst_16 : f32 to vector<8x128xf32>
    %33 = arith.addf %32, %31 : vector<8x128xf32>
    %34 = arith.divf %32, %33 : vector<8x128xf32>
    %35 = arith.mulf %26, %9 : vector<8x128xf32>
    %36 = arith.mulf %25, %28 : vector<8x128xf32>
    %37 = arith.addf %35, %36 : vector<8x128xf32>
    %38 = math.tanh %37 : vector<8x128xf32>
    %39 = arith.mulf %34, %38 : vector<8x128xf32>
    %40 = arith.index_cast %11 : i32 to index
    %c0_17 = arith.constant 0 : index
    %41 = vector.load %arg7[%40, %c0_17] : memref<64x128xf32, #tpu.memory_space<vmem>>, vector<8x128xf32>
    tpu.vector_store %arg7[%40, %c0_17], %39 {strides = array<i32>} : memref<64x128xf32, #tpu.memory_space<vmem>>, vector<8x128xf32>,
    %c1_i32 = arith.constant 1 : i32
    %c8_i32_18 = arith.constant 8 : i32
    %42 = arith.muli %c1_i32, %c8_i32_18 : i32
    %43 = tpu.assume_multiple %42, 8 : i32
    %44 = arith.index_cast %43 : i32 to index
    %c0_19 = arith.constant 0 : index
    %45 = vector.load %arg8[%44, %c0_19] : memref<64x512xf32, #tpu.memory_space<vmem>>, vector<8x512xf32>
    %46 = arith.truncf %39 : vector<8x128xf32> to vector<8x128xbf16>
    %c0_20 = arith.constant 0 : index
    %c0_21 = arith.constant 0 : index
    %c0_22 = arith.constant 0 : index
    %47 = vector.load %arg2[%c0_20, %c0_21, %c0_22] : memref<3x128x512xbf16, #tpu.memory_space<vmem>>, vector<1x128x512xbf16>
    %48 = vector.shape_cast %47 : vector<1x128x512xbf16> to vector<128x512xbf16>
    %cst_23 = arith.constant dense<0.000000e+00> : vector<8x512xf32>
    %49 = tpu.matmul %46, %48, %cst_23 {dimension_numbers = #tpu.dot_dimension_numbers<[1], [0], [0], [1], [0, 0, 1, 1], [], []>} : vector<8x128xbf16>, vector<128x512xbf16>, vector<8x512xf32> -> vector<8x512xf32>
    %50 = arith.addf %45, %49 : vector<8x512xf32>
    %51 = vector.extract_strided_slice %50 {offsets = [0, 0], sizes = [8, 256], strides = [1, 1]} : vector<8x512xf32> to vector<8x256xf32>
    %52 = arith.negf %51 : vector<8x256xf32>
    %53 = math.exp %52 : vector<8x256xf32>
    %cst_24 = arith.constant 1.000000e+00 : f32
    %54 = vector.broadcast %cst_24 : f32 to vector<8x256xf32>
    %55 = arith.addf %54, %53 : vector<8x256xf32>
    %56 = arith.divf %54, %55 : vector<8x256xf32>
    %57 = vector.extract_strided_slice %56 {offsets = [0, 0], sizes = [8, 128], strides = [1, 1]} : vector<8x256xf32> to vector<8x128xf32>
    %58 = vector.extract_strided_slice %56 {offsets = [0, 128], sizes = [8, 128], strides = [1, 1]} : vector<8x256xf32> to vector<8x128xf32>
    %59 = vector.extract_strided_slice %50 {offsets = [0, 256], sizes = [8, 128], strides = [1, 1]} : vector<8x512xf32> to vector<8x128xf32>
    %60 = math.tanh %59 : vector<8x128xf32>
    %61 = vector.extract_strided_slice %50 {offsets = [0, 384], sizes = [8, 128], strides = [1, 1]} : vector<8x512xf32> to vector<8x128xf32>
    %62 = arith.negf %61 : vector<8x128xf32>
    %63 = math.exp %62 : vector<8x128xf32>
    %cst_25 = arith.constant 1.000000e+00 : f32
    %64 = vector.broadcast %cst_25 : f32 to vector<8x128xf32>
    %65 = arith.addf %64, %63 : vector<8x128xf32>
    %66 = arith.divf %64, %65 : vector<8x128xf32>
    %67 = arith.mulf %58, %37 : vector<8x128xf32>
    %68 = arith.mulf %57, %60 : vector<8x128xf32>
    %69 = arith.addf %67, %68 : vector<8x128xf32>
    %70 = math.tanh %69 : vector<8x128xf32>
    %71 = arith.mulf %66, %70 : vector<8x128xf32>
    %72 = arith.index_cast %43 : i32 to index
    %c0_26 = arith.constant 0 : index
    %73 = vector.load %arg7[%72, %c0_26] : memref<64x128xf32, #tpu.memory_space<vmem>>, vector<8x128xf32>
    tpu.vector_store %arg7[%72, %c0_26], %71 {strides = array<i32>} : memref<64x128xf32, #tpu.memory_space<vmem>>, vector<8x128xf32>,
    %c2_i32 = arith.constant 2 : i32
    %c8_i32_27 = arith.constant 8 : i32
    %74 = arith.muli %c2_i32, %c8_i32_27 : i32
    %75 = tpu.assume_multiple %74, 8 : i32
    %76 = arith.index_cast %75 : i32 to index
    %c0_28 = arith.constant 0 : index
    %77 = vector.load %arg8[%76, %c0_28] : memref<64x512xf32, #tpu.memory_space<vmem>>, vector<8x512xf32>
    %78 = arith.truncf %71 : vector<8x128xf32> to vector<8x128xbf16>
    %c0_29 = arith.constant 0 : index
    %c0_30 = arith.constant 0 : index
    %c0_31 = arith.constant 0 : index
    %79 = vector.load %arg2[%c0_29, %c0_30, %c0_31] : memref<3x128x512xbf16, #tpu.memory_space<vmem>>, vector<1x128x512xbf16>
    %80 = vector.shape_cast %79 : vector<1x128x512xbf16> to vector<128x512xbf16>
    %cst_32 = arith.constant dense<0.000000e+00> : vector<8x512xf32>
    %81 = tpu.matmul %78, %80, %cst_32 {dimension_numbers = #tpu.dot_dimension_numbers<[1], [0], [0], [1], [0, 0, 1, 1], [], []>} : vector<8x128xbf16>, vector<128x512xbf16>, vector<8x512xf32> -> vector<8x512xf32>
    %82 = arith.addf %77, %81 : vector<8x512xf32>
    %83 = vector.extract_strided_slice %82 {offsets = [0, 0], sizes = [8, 256], strides = [1, 1]} : vector<8x512xf32> to vector<8x256xf32>
    %84 = arith.negf %83 : vector<8x256xf32>
    %85 = math.exp %84 : vector<8x256xf32>
    %cst_33 = arith.constant 1.000000e+00 : f32
    %86 = vector.broadcast %cst_33 : f32 to vector<8x256xf32>
    %87 = arith.addf %86, %85 : vector<8x256xf32>
    %88 = arith.divf %86, %87 : vector<8x256xf32>
    %89 = vector.extract_strided_slice %88 {offsets = [0, 0], sizes = [8, 128], strides = [1, 1]} : vector<8x256xf32> to vector<8x128xf32>
    %90 = vector.extract_strided_slice %88 {offsets = [0, 128], sizes = [8, 128], strides = [1, 1]} : vector<8x256xf32> to vector<8x128xf32>
    %91 = vector.extract_strided_slice %82 {offsets = [0, 256], sizes = [8, 128], strides = [1, 1]} : vector<8x512xf32> to vector<8x128xf32>
    %92 = math.tanh %91 : vector<8x128xf32>
    %93 = vector.extract_strided_slice %82 {offsets = [0, 384], sizes = [8, 128], strides = [1, 1]} : vector<8x512xf32> to vector<8x128xf32>
    %94 = arith.negf %93 : vector<8x128xf32>
    %95 = math.exp %94 : vector<8x128xf32>
    %cst_34 = arith.constant 1.000000e+00 : f32
    %96 = vector.broadcast %cst_34 : f32 to vector<8x128xf32>
    %97 = arith.addf %96, %95 : vector<8x128xf32>
    %98 = arith.divf %96, %97 : vector<8x128xf32>
    %99 = arith.mulf %90, %69 : vector<8x128xf32>
    %100 = arith.mulf %89, %92 : vector<8x128xf32>
    %101 = arith.addf %99, %100 : vector<8x128xf32>
    %102 = math.tanh %101 : vector<8x128xf32>
    %103 = arith.mulf %98, %102 : vector<8x128xf32>
    %104 = arith.index_cast %75 : i32 to index
    %c0_35 = arith.constant 0 : index
    %105 = vector.load %arg7[%104, %c0_35] : memref<64x128xf32, #tpu.memory_space<vmem>>, vector<8x128xf32>
    tpu.vector_store %arg7[%104, %c0_35], %103 {strides = array<i32>} : memref<64x128xf32, #tpu.memory_space<vmem>>, vector<8x128xf32>,
    %c3_i32 = arith.constant 3 : i32
    %c8_i32_36 = arith.constant 8 : i32
    %106 = arith.muli %c3_i32, %c8_i32_36 : i32
    %107 = tpu.assume_multiple %106, 8 : i32
    %108 = arith.index_cast %107 : i32 to index
    %c0_37 = arith.constant 0 : index
    %109 = vector.load %arg8[%108, %c0_37] : memref<64x512xf32, #tpu.memory_space<vmem>>, vector<8x512xf32>
    %110 = arith.truncf %103 : vector<8x128xf32> to vector<8x128xbf16>
    %c0_38 = arith.constant 0 : index
    %c0_39 = arith.constant 0 : index
    %c0_40 = arith.constant 0 : index
    %111 = vector.load %arg2[%c0_38, %c0_39, %c0_40] : memref<3x128x512xbf16, #tpu.memory_space<vmem>>, vector<1x128x512xbf16>
    %112 = vector.shape_cast %111 : vector<1x128x512xbf16> to vector<128x512xbf16>
    %cst_41 = arith.constant dense<0.000000e+00> : vector<8x512xf32>
    %113 = tpu.matmul %110, %112, %cst_41 {dimension_numbers = #tpu.dot_dimension_numbers<[1], [0], [0], [1], [0, 0, 1, 1], [], []>} : vector<8x128xbf16>, vector<128x512xbf16>, vector<8x512xf32> -> vector<8x512xf32>
    %114 = arith.addf %109, %113 : vector<8x512xf32>
    %115 = vector.extract_strided_slice %114 {offsets = [0, 0], sizes = [8, 256], strides = [1, 1]} : vector<8x512xf32> to vector<8x256xf32>
    %116 = arith.negf %115 : vector<8x256xf32>
    %117 = math.exp %116 : vector<8x256xf32>
    %cst_42 = arith.constant 1.000000e+00 : f32
    %118 = vector.broadcast %cst_42 : f32 to vector<8x256xf32>
    %119 = arith.addf %118, %117 : vector<8x256xf32>
    %120 = arith.divf %118, %119 : vector<8x256xf32>
    %121 = vector.extract_strided_slice %120 {offsets = [0, 0], sizes = [8, 128], strides = [1, 1]} : vector<8x256xf32> to vector<8x128xf32>
    %122 = vector.extract_strided_slice %120 {offsets = [0, 128], sizes = [8, 128], strides = [1, 1]} : vector<8x256xf32> to vector<8x128xf32>
    %123 = vector.extract_strided_slice %114 {offsets = [0, 256], sizes = [8, 128], strides = [1, 1]} : vector<8x512xf32> to vector<8x128xf32>
    %124 = math.tanh %123 : vector<8x128xf32>
    %125 = vector.extract_strided_slice %114 {offsets = [0, 384], sizes = [8, 128], strides = [1, 1]} : vector<8x512xf32> to vector<8x128xf32>
    %126 = arith.negf %125 : vector<8x128xf32>
    %127 = math.exp %126 : vector<8x128xf32>
    %cst_43 = arith.constant 1.000000e+00 : f32
    %128 = vector.broadcast %cst_43 : f32 to vector<8x128xf32>
    %129 = arith.addf %128, %127 : vector<8x128xf32>
    %130 = arith.divf %128, %129 : vector<8x128xf32>
    %131 = arith.mulf %122, %101 : vector<8x128xf32>
    %132 = arith.mulf %121, %124 : vector<8x128xf32>
    %133 = arith.addf %131, %132 : vector<8x128xf32>
    %134 = math.tanh %133 : vector<8x128xf32>
    %135 = arith.mulf %130, %134 : vector<8x128xf32>
    %136 = arith.index_cast %107 : i32 to index
    %c0_44 = arith.constant 0 : index
    %137 = vector.load %arg7[%136, %c0_44] : memref<64x128xf32, #tpu.memory_space<vmem>>, vector<8x128xf32>
    tpu.vector_store %arg7[%136, %c0_44], %135 {strides = array<i32>} : memref<64x128xf32, #tpu.memory_space<vmem>>, vector<8x128xf32>,
    %c4_i32 = arith.constant 4 : i32
    %c8_i32_45 = arith.constant 8 : i32
    %138 = arith.muli %c4_i32, %c8_i32_45 : i32
    %139 = tpu.assume_multiple %138, 8 : i32
    %140 = arith.index_cast %139 : i32 to index
    %c0_46 = arith.constant 0 : index
    %141 = vector.load %arg8[%140, %c0_46] : memref<64x512xf32, #tpu.memory_space<vmem>>, vector<8x512xf32>
    %142 = arith.truncf %135 : vector<8x128xf32> to vector<8x128xbf16>
    %c0_47 = arith.constant 0 : index
    %c0_48 = arith.constant 0 : index
    %c0_49 = arith.constant 0 : index
    %143 = vector.load %arg2[%c0_47, %c0_48, %c0_49] : memref<3x128x512xbf16, #tpu.memory_space<vmem>>, vector<1x128x512xbf16>
    %144 = vector.shape_cast %143 : vector<1x128x512xbf16> to vector<128x512xbf16>
    %cst_50 = arith.constant dense<0.000000e+00> : vector<8x512xf32>
    %145 = tpu.matmul %142, %144, %cst_50 {dimension_numbers = #tpu.dot_dimension_numbers<[1], [0], [0], [1], [0, 0, 1, 1], [], []>} : vector<8x128xbf16>, vector<128x512xbf16>, vector<8x512xf32> -> vector<8x512xf32>
    %146 = arith.addf %141, %145 : vector<8x512xf32>
    %147 = vector.extract_strided_slice %146 {offsets = [0, 0], sizes = [8, 256], strides = [1, 1]} : vector<8x512xf32> to vector<8x256xf32>
    %148 = arith.negf %147 : vector<8x256xf32>
    %149 = math.exp %148 : vector<8x256xf32>
    %cst_51 = arith.constant 1.000000e+00 : f32
    %150 = vector.broadcast %cst_51 : f32 to vector<8x256xf32>
    %151 = arith.addf %150, %149 : vector<8x256xf32>
    %152 = arith.divf %150, %151 : vector<8x256xf32>
    %153 = vector.extract_strided_slice %152 {offsets = [0, 0], sizes = [8, 128], strides = [1, 1]} : vector<8x256xf32> to vector<8x128xf32>
    %154 = vector.extract_strided_slice %152 {offsets = [0, 128], sizes = [8, 128], strides = [1, 1]} : vector<8x256xf32> to vector<8x128xf32>
    %155 = vector.extract_strided_slice %146 {offsets = [0, 256], sizes = [8, 128], strides = [1, 1]} : vector<8x512xf32> to vector<8x128xf32>
    %156 = math.tanh %155 : vector<8x128xf32>
    %157 = vector.extract_strided_slice %146 {offsets = [0, 384], sizes = [8, 128], strides = [1, 1]} : vector<8x512xf32> to vector<8x128xf32>
    %158 = arith.negf %157 : vector<8x128xf32>
    %159 = math.exp %158 : vector<8x128xf32>
    %cst_52 = arith.constant 1.000000e+00 : f32
    %160 = vector.broadcast %cst_52 : f32 to vector<8x128xf32>
    %161 = arith.addf %160, %159 : vector<8x128xf32>
    %162 = arith.divf %160, %161 : vector<8x128xf32>
    %163 = arith.mulf %154, %133 : vector<8x128xf32>
    %164 = arith.mulf %153, %156 : vector<8x128xf32>
    %165 = arith.addf %163, %164 : vector<8x128xf32>
    %166 = math.tanh %165 : vector<8x128xf32>
    %167 = arith.mulf %162, %166 : vector<8x128xf32>
    %168 = arith.index_cast %139 : i32 to index
    %c0_53 = arith.constant 0 : index
    %169 = vector.load %arg7[%168, %c0_53] : memref<64x128xf32, #tpu.memory_space<vmem>>, vector<8x128xf32>
    tpu.vector_store %arg7[%168, %c0_53], %167 {strides = array<i32>} : memref<64x128xf32, #tpu.memory_space<vmem>>, vector<8x128xf32>,
    %c5_i32 = arith.constant 5 : i32
    %c8_i32_54 = arith.constant 8 : i32
    %170 = arith.muli %c5_i32, %c8_i32_54 : i32
    %171 = tpu.assume_multiple %170, 8 : i32
    %172 = arith.index_cast %171 : i32 to index
    %c0_55 = arith.constant 0 : index
    %173 = vector.load %arg8[%172, %c0_55] : memref<64x512xf32, #tpu.memory_space<vmem>>, vector<8x512xf32>
    %174 = arith.truncf %167 : vector<8x128xf32> to vector<8x128xbf16>
    %c0_56 = arith.constant 0 : index
    %c0_57 = arith.constant 0 : index
    %c0_58 = arith.constant 0 : index
    %175 = vector.load %arg2[%c0_56, %c0_57, %c0_58] : memref<3x128x512xbf16, #tpu.memory_space<vmem>>, vector<1x128x512xbf16>
    %176 = vector.shape_cast %175 : vector<1x128x512xbf16> to vector<128x512xbf16>
    %cst_59 = arith.constant dense<0.000000e+00> : vector<8x512xf32>
    %177 = tpu.matmul %174, %176, %cst_59 {dimension_numbers = #tpu.dot_dimension_numbers<[1], [0], [0], [1], [0, 0, 1, 1], [], []>} : vector<8x128xbf16>, vector<128x512xbf16>, vector<8x512xf32> -> vector<8x512xf32>
    %178 = arith.addf %173, %177 : vector<8x512xf32>
    %179 = vector.extract_strided_slice %178 {offsets = [0, 0], sizes = [8, 256], strides = [1, 1]} : vector<8x512xf32> to vector<8x256xf32>
    %180 = arith.negf %179 : vector<8x256xf32>
    %181 = math.exp %180 : vector<8x256xf32>
    %cst_60 = arith.constant 1.000000e+00 : f32
    %182 = vector.broadcast %cst_60 : f32 to vector<8x256xf32>
    %183 = arith.addf %182, %181 : vector<8x256xf32>
    %184 = arith.divf %182, %183 : vector<8x256xf32>
    %185 = vector.extract_strided_slice %184 {offsets = [0, 0], sizes = [8, 128], strides = [1, 1]} : vector<8x256xf32> to vector<8x128xf32>
    %186 = vector.extract_strided_slice %184 {offsets = [0, 128], sizes = [8, 128], strides = [1, 1]} : vector<8x256xf32> to vector<8x128xf32>
    %187 = vector.extract_strided_slice %178 {offsets = [0, 256], sizes = [8, 128], strides = [1, 1]} : vector<8x512xf32> to vector<8x128xf32>
    %188 = math.tanh %187 : vector<8x128xf32>
    %189 = vector.extract_strided_slice %178 {offsets = [0, 384], sizes = [8, 128], strides = [1, 1]} : vector<8x512xf32> to vector<8x128xf32>
    %190 = arith.negf %189 : vector<8x128xf32>
    %191 = math.exp %190 : vector<8x128xf32>
    %cst_61 = arith.constant 1.000000e+00 : f32
    %192 = vector.broadcast %cst_61 : f32 to vector<8x128xf32>
    %193 = arith.addf %192, %191 : vector<8x128xf32>
    %194 = arith.divf %192, %193 : vector<8x128xf32>
    %195 = arith.mulf %186, %165 : vector<8x128xf32>
    %196 = arith.mulf %185, %188 : vector<8x128xf32>
    %197 = arith.addf %195, %196 : vector<8x128xf32>
    %198 = math.tanh %197 : vector<8x128xf32>
    %199 = arith.mulf %194, %198 : vector<8x128xf32>
    %200 = arith.index_cast %171 : i32 to index
    %c0_62 = arith.constant 0 : index
    %201 = vector.load %arg7[%200, %c0_62] : memref<64x128xf32, #tpu.memory_space<vmem>>, vector<8x128xf32>
    tpu.vector_store %arg7[%200, %c0_62], %199 {strides = array<i32>} : memref<64x128xf32, #tpu.memory_space<vmem>>, vector<8x128xf32>,
    %c6_i32 = arith.constant 6 : i32
    %c8_i32_63 = arith.constant 8 : i32
    %202 = arith.muli %c6_i32, %c8_i32_63 : i32
    %203 = tpu.assume_multiple %202, 8 : i32
    %204 = arith.index_cast %203 : i32 to index
    %c0_64 = arith.constant 0 : index
    %205 = vector.load %arg8[%204, %c0_64] : memref<64x512xf32, #tpu.memory_space<vmem>>, vector<8x512xf32>
    %206 = arith.truncf %199 : vector<8x128xf32> to vector<8x128xbf16>
    %c0_65 = arith.constant 0 : index
    %c0_66 = arith.constant 0 : index
    %c0_67 = arith.constant 0 : index
    %207 = vector.load %arg2[%c0_65, %c0_66, %c0_67] : memref<3x128x512xbf16, #tpu.memory_space<vmem>>, vector<1x128x512xbf16>
    %208 = vector.shape_cast %207 : vector<1x128x512xbf16> to vector<128x512xbf16>
    %cst_68 = arith.constant dense<0.000000e+00> : vector<8x512xf32>
    %209 = tpu.matmul %206, %208, %cst_68 {dimension_numbers = #tpu.dot_dimension_numbers<[1], [0], [0], [1], [0, 0, 1, 1], [], []>} : vector<8x128xbf16>, vector<128x512xbf16>, vector<8x512xf32> -> vector<8x512xf32>
    %210 = arith.addf %205, %209 : vector<8x512xf32>
    %211 = vector.extract_strided_slice %210 {offsets = [0, 0], sizes = [8, 256], strides = [1, 1]} : vector<8x512xf32> to vector<8x256xf32>
    %212 = arith.negf %211 : vector<8x256xf32>
    %213 = math.exp %212 : vector<8x256xf32>
    %cst_69 = arith.constant 1.000000e+00 : f32
    %214 = vector.broadcast %cst_69 : f32 to vector<8x256xf32>
    %215 = arith.addf %214, %213 : vector<8x256xf32>
    %216 = arith.divf %214, %215 : vector<8x256xf32>
    %217 = vector.extract_strided_slice %216 {offsets = [0, 0], sizes = [8, 128], strides = [1, 1]} : vector<8x256xf32> to vector<8x128xf32>
    %218 = vector.extract_strided_slice %216 {offsets = [0, 128], sizes = [8, 128], strides = [1, 1]} : vector<8x256xf32> to vector<8x128xf32>
    %219 = vector.extract_strided_slice %210 {offsets = [0, 256], sizes = [8, 128], strides = [1, 1]} : vector<8x512xf32> to vector<8x128xf32>
    %220 = math.tanh %219 : vector<8x128xf32>
    %221 = vector.extract_strided_slice %210 {offsets = [0, 384], sizes = [8, 128], strides = [1, 1]} : vector<8x512xf32> to vector<8x128xf32>
    %222 = arith.negf %221 : vector<8x128xf32>
    %223 = math.exp %222 : vector<8x128xf32>
    %cst_70 = arith.constant 1.000000e+00 : f32
    %224 = vector.broadcast %cst_70 : f32 to vector<8x128xf32>
    %225 = arith.addf %224, %223 : vector<8x128xf32>
    %226 = arith.divf %224, %225 : vector<8x128xf32>
    %227 = arith.mulf %218, %197 : vector<8x128xf32>
    %228 = arith.mulf %217, %220 : vector<8x128xf32>
    %229 = arith.addf %227, %228 : vector<8x128xf32>
    %230 = math.tanh %229 : vector<8x128xf32>
    %231 = arith.mulf %226, %230 : vector<8x128xf32>
    %232 = arith.index_cast %203 : i32 to index
    %c0_71 = arith.constant 0 : index
    %233 = vector.load %arg7[%232, %c0_71] : memref<64x128xf32, #tpu.memory_space<vmem>>, vector<8x128xf32>
    tpu.vector_store %arg7[%232, %c0_71], %231 {strides = array<i32>} : memref<64x128xf32, #tpu.memory_space<vmem>>, vector<8x128xf32>,
    %c7_i32 = arith.constant 7 : i32
    %c8_i32_72 = arith.constant 8 : i32
    %234 = arith.muli %c7_i32, %c8_i32_72 : i32
    %235 = tpu.assume_multiple %234, 8 : i32
    %236 = arith.index_cast %235 : i32 to index
    %c0_73 = arith.constant 0 : index
    %237 = vector.load %arg8[%236, %c0_73] : memref<64x512xf32, #tpu.memory_space<vmem>>, vector<8x512xf32>
    %238 = arith.truncf %231 : vector<8x128xf32> to vector<8x128xbf16>
    %c0_74 = arith.constant 0 : index
    %c0_75 = arith.constant 0 : index
    %c0_76 = arith.constant 0 : index
    %239 = vector.load %arg2[%c0_74, %c0_75, %c0_76] : memref<3x128x512xbf16, #tpu.memory_space<vmem>>, vector<1x128x512xbf16>
    %240 = vector.shape_cast %239 : vector<1x128x512xbf16> to vector<128x512xbf16>
    %cst_77 = arith.constant dense<0.000000e+00> : vector<8x512xf32>
    %241 = tpu.matmul %238, %240, %cst_77 {dimension_numbers = #tpu.dot_dimension_numbers<[1], [0], [0], [1], [0, 0, 1, 1], [], []>} : vector<8x128xbf16>, vector<128x512xbf16>, vector<8x512xf32> -> vector<8x512xf32>
    %242 = arith.addf %237, %241 : vector<8x512xf32>
    %243 = vector.extract_strided_slice %242 {offsets = [0, 0], sizes = [8, 256], strides = [1, 1]} : vector<8x512xf32> to vector<8x256xf32>
    %244 = arith.negf %243 : vector<8x256xf32>
    %245 = math.exp %244 : vector<8x256xf32>
    %cst_78 = arith.constant 1.000000e+00 : f32
    %246 = vector.broadcast %cst_78 : f32 to vector<8x256xf32>
    %247 = arith.addf %246, %245 : vector<8x256xf32>
    %248 = arith.divf %246, %247 : vector<8x256xf32>
    %249 = vector.extract_strided_slice %248 {offsets = [0, 0], sizes = [8, 128], strides = [1, 1]} : vector<8x256xf32> to vector<8x128xf32>
    %250 = vector.extract_strided_slice %248 {offsets = [0, 128], sizes = [8, 128], strides = [1, 1]} : vector<8x256xf32> to vector<8x128xf32>
    %251 = vector.extract_strided_slice %242 {offsets = [0, 256], sizes = [8, 128], strides = [1, 1]} : vector<8x512xf32> to vector<8x128xf32>
    %252 = math.tanh %251 : vector<8x128xf32>
    %253 = vector.extract_strided_slice %242 {offsets = [0, 384], sizes = [8, 128], strides = [1, 1]} : vector<8x512xf32> to vector<8x128xf32>
    %254 = arith.negf %253 : vector<8x128xf32>
    %255 = math.exp %254 : vector<8x128xf32>
    %cst_79 = arith.constant 1.000000e+00 : f32
    %256 = vector.broadcast %cst_79 : f32 to vector<8x128xf32>
    %257 = arith.addf %256, %255 : vector<8x128xf32>
    %258 = arith.divf %256, %257 : vector<8x128xf32>
    %259 = arith.mulf %250, %229 : vector<8x128xf32>
    %260 = arith.mulf %249, %252 : vector<8x128xf32>
    %261 = arith.addf %259, %260 : vector<8x128xf32>
    %262 = math.tanh %261 : vector<8x128xf32>
    %263 = arith.mulf %258, %262 : vector<8x128xf32>
    %264 = arith.index_cast %235 : i32 to index
    %c0_80 = arith.constant 0 : index
    %265 = vector.load %arg7[%264, %c0_80] : memref<64x128xf32, #tpu.memory_space<vmem>>, vector<8x128xf32>
    tpu.vector_store %arg7[%264, %c0_80], %263 {strides = array<i32>} : memref<64x128xf32, #tpu.memory_space<vmem>>, vector<8x128xf32>,
    %c8_i32_81 = arith.constant 8 : i32
    %c0_82 = arith.constant 0 : index
    %c0_83 = arith.constant 0 : index
    %266 = vector.load %arg7[%c0_82, %c0_83] : memref<64x128xf32, #tpu.memory_space<vmem>>, vector<64x128xf32>
    %267 = arith.truncf %266 : vector<64x128xf32> to vector<64x128xbf16>
    %c1 = arith.constant 1 : index
    %c0_84 = arith.constant 0 : index
    %c0_85 = arith.constant 0 : index
    %268 = vector.load %arg1[%c1, %c0_84, %c0_85] : memref<3x128x512xbf16, #tpu.memory_space<vmem>>, vector<1x128x512xbf16>
    %269 = vector.shape_cast %268 : vector<1x128x512xbf16> to vector<128x512xbf16>
    %cst_86 = arith.constant dense<0.000000e+00> : vector<64x512xf32>
    %270 = tpu.matmul %267, %269, %cst_86 {dimension_numbers = #tpu.dot_dimension_numbers<[1], [0], [0], [1], [0, 0, 1, 1], [], []>} : vector<64x128xbf16>, vector<128x512xbf16>, vector<64x512xf32> -> vector<64x512xf32>
    %c1_87 = arith.constant 1 : index
    %c0_88 = arith.constant 0 : index
    %c0_89 = arith.constant 0 : index
    %271 = vector.load %arg3[%c1_87, %c0_88, %c0_89] : memref<3x1x512xf32, #tpu.memory_space<vmem>>, vector<1x1x512xf32>
    %272 = vector.shape_cast %271 : vector<1x1x512xf32> to vector<1x512xf32>
    %273 = vector.broadcast %272 : vector<1x512xf32> to vector<64x512xf32>
    %274 = arith.addf %270, %273 : vector<64x512xf32>
    %c0_90 = arith.constant 0 : index
    %c0_91 = arith.constant 0 : index
    %275 = vector.load %arg8[%c0_90, %c0_91] : memref<64x512xf32, #tpu.memory_space<vmem>>, vector<64x512xf32>
    tpu.vector_store %arg8[%c0_90, %c0_91], %274 {strides = array<i32>} : memref<64x512xf32, #tpu.memory_space<vmem>>, vector<64x512xf32>,
    %cst_92 = arith.constant 0.000000e+00 : f32
    %276 = vector.broadcast %cst_92 : f32 to vector<8x128xf32>
    %c0_i32_93 = arith.constant 0 : i32
    %c8_i32_94 = arith.constant 8 : i32
    %277 = arith.muli %c0_i32_93, %c8_i32_94 : i32
    %278 = tpu.assume_multiple %277, 8 : i32
    %279 = arith.index_cast %278 : i32 to index
    %c0_95 = arith.constant 0 : index
    %280 = vector.load %arg8[%279, %c0_95] : memref<64x512xf32, #tpu.memory_space<vmem>>, vector<8x512xf32>
    %281 = arith.truncf %276 : vector<8x128xf32> to vector<8x128xbf16>
    %c1_96 = arith.constant 1 : index
    %c0_97 = arith.constant 0 : index
    %c0_98 = arith.constant 0 : index
    %282 = vector.load %arg2[%c1_96, %c0_97, %c0_98] : memref<3x128x512xbf16, #tpu.memory_space<vmem>>, vector<1x128x512xbf16>
    %283 = vector.shape_cast %282 : vector<1x128x512xbf16> to vector<128x512xbf16>
    %cst_99 = arith.constant dense<0.000000e+00> : vector<8x512xf32>
    %284 = tpu.matmul %281, %283, %cst_99 {dimension_numbers = #tpu.dot_dimension_numbers<[1], [0], [0], [1], [0, 0, 1, 1], [], []>} : vector<8x128xbf16>, vector<128x512xbf16>, vector<8x512xf32> -> vector<8x512xf32>
    %285 = arith.addf %280, %284 : vector<8x512xf32>
    %286 = vector.extract_strided_slice %285 {offsets = [0, 0], sizes = [8, 256], strides = [1, 1]} : vector<8x512xf32> to vector<8x256xf32>
    %287 = arith.negf %286 : vector<8x256xf32>
    %288 = math.exp %287 : vector<8x256xf32>
    %cst_100 = arith.constant 1.000000e+00 : f32
    %289 = vector.broadcast %cst_100 : f32 to vector<8x256xf32>
    %290 = arith.addf %289, %288 : vector<8x256xf32>
    %291 = arith.divf %289, %290 : vector<8x256xf32>
    %292 = vector.extract_strided_slice %291 {offsets = [0, 0], sizes = [8, 128], strides = [1, 1]} : vector<8x256xf32> to vector<8x128xf32>
    %293 = vector.extract_strided_slice %291 {offsets = [0, 128], sizes = [8, 128], strides = [1, 1]} : vector<8x256xf32> to vector<8x128xf32>
    %294 = vector.extract_strided_slice %285 {offsets = [0, 256], sizes = [8, 128], strides = [1, 1]} : vector<8x512xf32> to vector<8x128xf32>
    %295 = math.tanh %294 : vector<8x128xf32>
    %296 = vector.extract_strided_slice %285 {offsets = [0, 384], sizes = [8, 128], strides = [1, 1]} : vector<8x512xf32> to vector<8x128xf32>
    %297 = arith.negf %296 : vector<8x128xf32>
    %298 = math.exp %297 : vector<8x128xf32>
    %cst_101 = arith.constant 1.000000e+00 : f32
    %299 = vector.broadcast %cst_101 : f32 to vector<8x128xf32>
    %300 = arith.addf %299, %298 : vector<8x128xf32>
    %301 = arith.divf %299, %300 : vector<8x128xf32>
    %302 = arith.mulf %293, %276 : vector<8x128xf32>
    %303 = arith.mulf %292, %295 : vector<8x128xf32>
    %304 = arith.addf %302, %303 : vector<8x128xf32>
    %305 = math.tanh %304 : vector<8x128xf32>
    %306 = arith.mulf %301, %305 : vector<8x128xf32>
    %307 = arith.index_cast %278 : i32 to index
    %c0_102 = arith.constant 0 : index
    %308 = vector.load %arg7[%307, %c0_102] : memref<64x128xf32, #tpu.memory_space<vmem>>, vector<8x128xf32>
    tpu.vector_store %arg7[%307, %c0_102], %306 {strides = array<i32>} : memref<64x128xf32, #tpu.memory_space<vmem>>, vector<8x128xf32>,
    %c1_i32_103 = arith.constant 1 : i32
    %c8_i32_104 = arith.constant 8 : i32
    %309 = arith.muli %c1_i32_103, %c8_i32_104 : i32
    %310 = tpu.assume_multiple %309, 8 : i32
    %311 = arith.index_cast %310 : i32 to index
    %c0_105 = arith.constant 0 : index
    %312 = vector.load %arg8[%311, %c0_105] : memref<64x512xf32, #tpu.memory_space<vmem>>, vector<8x512xf32>
    %313 = arith.truncf %306 : vector<8x128xf32> to vector<8x128xbf16>
    %c1_106 = arith.constant 1 : index
    %c0_107 = arith.constant 0 : index
    %c0_108 = arith.constant 0 : index
    %314 = vector.load %arg2[%c1_106, %c0_107, %c0_108] : memref<3x128x512xbf16, #tpu.memory_space<vmem>>, vector<1x128x512xbf16>
    %315 = vector.shape_cast %314 : vector<1x128x512xbf16> to vector<128x512xbf16>
    %cst_109 = arith.constant dense<0.000000e+00> : vector<8x512xf32>
    %316 = tpu.matmul %313, %315, %cst_109 {dimension_numbers = #tpu.dot_dimension_numbers<[1], [0], [0], [1], [0, 0, 1, 1], [], []>} : vector<8x128xbf16>, vector<128x512xbf16>, vector<8x512xf32> -> vector<8x512xf32>
    %317 = arith.addf %312, %316 : vector<8x512xf32>
    %318 = vector.extract_strided_slice %317 {offsets = [0, 0], sizes = [8, 256], strides = [1, 1]} : vector<8x512xf32> to vector<8x256xf32>
    %319 = arith.negf %318 : vector<8x256xf32>
    %320 = math.exp %319 : vector<8x256xf32>
    %cst_110 = arith.constant 1.000000e+00 : f32
    %321 = vector.broadcast %cst_110 : f32 to vector<8x256xf32>
    %322 = arith.addf %321, %320 : vector<8x256xf32>
    %323 = arith.divf %321, %322 : vector<8x256xf32>
    %324 = vector.extract_strided_slice %323 {offsets = [0, 0], sizes = [8, 128], strides = [1, 1]} : vector<8x256xf32> to vector<8x128xf32>
    %325 = vector.extract_strided_slice %323 {offsets = [0, 128], sizes = [8, 128], strides = [1, 1]} : vector<8x256xf32> to vector<8x128xf32>
    %326 = vector.extract_strided_slice %317 {offsets = [0, 256], sizes = [8, 128], strides = [1, 1]} : vector<8x512xf32> to vector<8x128xf32>
    %327 = math.tanh %326 : vector<8x128xf32>
    %328 = vector.extract_strided_slice %317 {offsets = [0, 384], sizes = [8, 128], strides = [1, 1]} : vector<8x512xf32> to vector<8x128xf32>
    %329 = arith.negf %328 : vector<8x128xf32>
    %330 = math.exp %329 : vector<8x128xf32>
    %cst_111 = arith.constant 1.000000e+00 : f32
    %331 = vector.broadcast %cst_111 : f32 to vector<8x128xf32>
    %332 = arith.addf %331, %330 : vector<8x128xf32>
    %333 = arith.divf %331, %332 : vector<8x128xf32>
    %334 = arith.mulf %325, %304 : vector<8x128xf32>
    %335 = arith.mulf %324, %327 : vector<8x128xf32>
    %336 = arith.addf %334, %335 : vector<8x128xf32>
    %337 = math.tanh %336 : vector<8x128xf32>
    %338 = arith.mulf %333, %337 : vector<8x128xf32>
    %339 = arith.index_cast %310 : i32 to index
    %c0_112 = arith.constant 0 : index
    %340 = vector.load %arg7[%339, %c0_112] : memref<64x128xf32, #tpu.memory_space<vmem>>, vector<8x128xf32>
    tpu.vector_store %arg7[%339, %c0_112], %338 {strides = array<i32>} : memref<64x128xf32, #tpu.memory_space<vmem>>, vector<8x128xf32>,
    %c2_i32_113 = arith.constant 2 : i32
    %c8_i32_114 = arith.constant 8 : i32
    %341 = arith.muli %c2_i32_113, %c8_i32_114 : i32
    %342 = tpu.assume_multiple %341, 8 : i32
    %343 = arith.index_cast %342 : i32 to index
    %c0_115 = arith.constant 0 : index
    %344 = vector.load %arg8[%343, %c0_115] : memref<64x512xf32, #tpu.memory_space<vmem>>, vector<8x512xf32>
    %345 = arith.truncf %338 : vector<8x128xf32> to vector<8x128xbf16>
    %c1_116 = arith.constant 1 : index
    %c0_117 = arith.constant 0 : index
    %c0_118 = arith.constant 0 : index
    %346 = vector.load %arg2[%c1_116, %c0_117, %c0_118] : memref<3x128x512xbf16, #tpu.memory_space<vmem>>, vector<1x128x512xbf16>
    %347 = vector.shape_cast %346 : vector<1x128x512xbf16> to vector<128x512xbf16>
    %cst_119 = arith.constant dense<0.000000e+00> : vector<8x512xf32>
    %348 = tpu.matmul %345, %347, %cst_119 {dimension_numbers = #tpu.dot_dimension_numbers<[1], [0], [0], [1], [0, 0, 1, 1], [], []>} : vector<8x128xbf16>, vector<128x512xbf16>, vector<8x512xf32> -> vector<8x512xf32>
    %349 = arith.addf %344, %348 : vector<8x512xf32>
    %350 = vector.extract_strided_slice %349 {offsets = [0, 0], sizes = [8, 256], strides = [1, 1]} : vector<8x512xf32> to vector<8x256xf32>
    %351 = arith.negf %350 : vector<8x256xf32>
    %352 = math.exp %351 : vector<8x256xf32>
    %cst_120 = arith.constant 1.000000e+00 : f32
    %353 = vector.broadcast %cst_120 : f32 to vector<8x256xf32>
    %354 = arith.addf %353, %352 : vector<8x256xf32>
    %355 = arith.divf %353, %354 : vector<8x256xf32>
    %356 = vector.extract_strided_slice %355 {offsets = [0, 0], sizes = [8, 128], strides = [1, 1]} : vector<8x256xf32> to vector<8x128xf32>
    %357 = vector.extract_strided_slice %355 {offsets = [0, 128], sizes = [8, 128], strides = [1, 1]} : vector<8x256xf32> to vector<8x128xf32>
    %358 = vector.extract_strided_slice %349 {offsets = [0, 256], sizes = [8, 128], strides = [1, 1]} : vector<8x512xf32> to vector<8x128xf32>
    %359 = math.tanh %358 : vector<8x128xf32>
    %360 = vector.extract_strided_slice %349 {offsets = [0, 384], sizes = [8, 128], strides = [1, 1]} : vector<8x512xf32> to vector<8x128xf32>
    %361 = arith.negf %360 : vector<8x128xf32>
    %362 = math.exp %361 : vector<8x128xf32>
    %cst_121 = arith.constant 1.000000e+00 : f32
    %363 = vector.broadcast %cst_121 : f32 to vector<8x128xf32>
    %364 = arith.addf %363, %362 : vector<8x128xf32>
    %365 = arith.divf %363, %364 : vector<8x128xf32>
    %366 = arith.mulf %357, %336 : vector<8x128xf32>
    %367 = arith.mulf %356, %359 : vector<8x128xf32>
    %368 = arith.addf %366, %367 : vector<8x128xf32>
    %369 = math.tanh %368 : vector<8x128xf32>
    %370 = arith.mulf %365, %369 : vector<8x128xf32>
    %371 = arith.index_cast %342 : i32 to index
    %c0_122 = arith.constant 0 : index
    %372 = vector.load %arg7[%371, %c0_122] : memref<64x128xf32, #tpu.memory_space<vmem>>, vector<8x128xf32>
    tpu.vector_store %arg7[%371, %c0_122], %370 {strides = array<i32>} : memref<64x128xf32, #tpu.memory_space<vmem>>, vector<8x128xf32>,
    %c3_i32_123 = arith.constant 3 : i32
    %c8_i32_124 = arith.constant 8 : i32
    %373 = arith.muli %c3_i32_123, %c8_i32_124 : i32
    %374 = tpu.assume_multiple %373, 8 : i32
    %375 = arith.index_cast %374 : i32 to index
    %c0_125 = arith.constant 0 : index
    %376 = vector.load %arg8[%375, %c0_125] : memref<64x512xf32, #tpu.memory_space<vmem>>, vector<8x512xf32>
    %377 = arith.truncf %370 : vector<8x128xf32> to vector<8x128xbf16>
    %c1_126 = arith.constant 1 : index
    %c0_127 = arith.constant 0 : index
    %c0_128 = arith.constant 0 : index
    %378 = vector.load %arg2[%c1_126, %c0_127, %c0_128] : memref<3x128x512xbf16, #tpu.memory_space<vmem>>, vector<1x128x512xbf16>
    %379 = vector.shape_cast %378 : vector<1x128x512xbf16> to vector<128x512xbf16>
    %cst_129 = arith.constant dense<0.000000e+00> : vector<8x512xf32>
    %380 = tpu.matmul %377, %379, %cst_129 {dimension_numbers = #tpu.dot_dimension_numbers<[1], [0], [0], [1], [0, 0, 1, 1], [], []>} : vector<8x128xbf16>, vector<128x512xbf16>, vector<8x512xf32> -> vector<8x512xf32>
    %381 = arith.addf %376, %380 : vector<8x512xf32>
    %382 = vector.extract_strided_slice %381 {offsets = [0, 0], sizes = [8, 256], strides = [1, 1]} : vector<8x512xf32> to vector<8x256xf32>
    %383 = arith.negf %382 : vector<8x256xf32>
    %384 = math.exp %383 : vector<8x256xf32>
    %cst_130 = arith.constant 1.000000e+00 : f32
    %385 = vector.broadcast %cst_130 : f32 to vector<8x256xf32>
    %386 = arith.addf %385, %384 : vector<8x256xf32>
    %387 = arith.divf %385, %386 : vector<8x256xf32>
    %388 = vector.extract_strided_slice %387 {offsets = [0, 0], sizes = [8, 128], strides = [1, 1]} : vector<8x256xf32> to vector<8x128xf32>
    %389 = vector.extract_strided_slice %387 {offsets = [0, 128], sizes = [8, 128], strides = [1, 1]} : vector<8x256xf32> to vector<8x128xf32>
    %390 = vector.extract_strided_slice %381 {offsets = [0, 256], sizes = [8, 128], strides = [1, 1]} : vector<8x512xf32> to vector<8x128xf32>
    %391 = math.tanh %390 : vector<8x128xf32>
    %392 = vector.extract_strided_slice %381 {offsets = [0, 384], sizes = [8, 128], strides = [1, 1]} : vector<8x512xf32> to vector<8x128xf32>
    %393 = arith.negf %392 : vector<8x128xf32>
    %394 = math.exp %393 : vector<8x128xf32>
    %cst_131 = arith.constant 1.000000e+00 : f32
    %395 = vector.broadcast %cst_131 : f32 to vector<8x128xf32>
    %396 = arith.addf %395, %394 : vector<8x128xf32>
    %397 = arith.divf %395, %396 : vector<8x128xf32>
    %398 = arith.mulf %389, %368 : vector<8x128xf32>
    %399 = arith.mulf %388, %391 : vector<8x128xf32>
    %400 = arith.addf %398, %399 : vector<8x128xf32>
    %401 = math.tanh %400 : vector<8x128xf32>
    %402 = arith.mulf %397, %401 : vector<8x128xf32>
    %403 = arith.index_cast %374 : i32 to index
    %c0_132 = arith.constant 0 : index
    %404 = vector.load %arg7[%403, %c0_132] : memref<64x128xf32, #tpu.memory_space<vmem>>, vector<8x128xf32>
    tpu.vector_store %arg7[%403, %c0_132], %402 {strides = array<i32>} : memref<64x128xf32, #tpu.memory_space<vmem>>, vector<8x128xf32>,
    %c4_i32_133 = arith.constant 4 : i32
    %c8_i32_134 = arith.constant 8 : i32
    %405 = arith.muli %c4_i32_133, %c8_i32_134 : i32
    %406 = tpu.assume_multiple %405, 8 : i32
    %407 = arith.index_cast %406 : i32 to index
    %c0_135 = arith.constant 0 : index
    %408 = vector.load %arg8[%407, %c0_135] : memref<64x512xf32, #tpu.memory_space<vmem>>, vector<8x512xf32>
    %409 = arith.truncf %402 : vector<8x128xf32> to vector<8x128xbf16>
    %c1_136 = arith.constant 1 : index
    %c0_137 = arith.constant 0 : index
    %c0_138 = arith.constant 0 : index
    %410 = vector.load %arg2[%c1_136, %c0_137, %c0_138] : memref<3x128x512xbf16, #tpu.memory_space<vmem>>, vector<1x128x512xbf16>
    %411 = vector.shape_cast %410 : vector<1x128x512xbf16> to vector<128x512xbf16>
    %cst_139 = arith.constant dense<0.000000e+00> : vector<8x512xf32>
    %412 = tpu.matmul %409, %411, %cst_139 {dimension_numbers = #tpu.dot_dimension_numbers<[1], [0], [0], [1], [0, 0, 1, 1], [], []>} : vector<8x128xbf16>, vector<128x512xbf16>, vector<8x512xf32> -> vector<8x512xf32>
    %413 = arith.addf %408, %412 : vector<8x512xf32>
    %414 = vector.extract_strided_slice %413 {offsets = [0, 0], sizes = [8, 256], strides = [1, 1]} : vector<8x512xf32> to vector<8x256xf32>
    %415 = arith.negf %414 : vector<8x256xf32>
    %416 = math.exp %415 : vector<8x256xf32>
    %cst_140 = arith.constant 1.000000e+00 : f32
    %417 = vector.broadcast %cst_140 : f32 to vector<8x256xf32>
    %418 = arith.addf %417, %416 : vector<8x256xf32>
    %419 = arith.divf %417, %418 : vector<8x256xf32>
    %420 = vector.extract_strided_slice %419 {offsets = [0, 0], sizes = [8, 128], strides = [1, 1]} : vector<8x256xf32> to vector<8x128xf32>
    %421 = vector.extract_strided_slice %419 {offsets = [0, 128], sizes = [8, 128], strides = [1, 1]} : vector<8x256xf32> to vector<8x128xf32>
    %422 = vector.extract_strided_slice %413 {offsets = [0, 256], sizes = [8, 128], strides = [1, 1]} : vector<8x512xf32> to vector<8x128xf32>
    %423 = math.tanh %422 : vector<8x128xf32>
    %424 = vector.extract_strided_slice %413 {offsets = [0, 384], sizes = [8, 128], strides = [1, 1]} : vector<8x512xf32> to vector<8x128xf32>
    %425 = arith.negf %424 : vector<8x128xf32>
    %426 = math.exp %425 : vector<8x128xf32>
    %cst_141 = arith.constant 1.000000e+00 : f32
    %427 = vector.broadcast %cst_141 : f32 to vector<8x128xf32>
    %428 = arith.addf %427, %426 : vector<8x128xf32>
    %429 = arith.divf %427, %428 : vector<8x128xf32>
    %430 = arith.mulf %421, %400 : vector<8x128xf32>
    %431 = arith.mulf %420, %423 : vector<8x128xf32>
    %432 = arith.addf %430, %431 : vector<8x128xf32>
    %433 = math.tanh %432 : vector<8x128xf32>
    %434 = arith.mulf %429, %433 : vector<8x128xf32>
    %435 = arith.index_cast %406 : i32 to index
    %c0_142 = arith.constant 0 : index
    %436 = vector.load %arg7[%435, %c0_142] : memref<64x128xf32, #tpu.memory_space<vmem>>, vector<8x128xf32>
    tpu.vector_store %arg7[%435, %c0_142], %434 {strides = array<i32>} : memref<64x128xf32, #tpu.memory_space<vmem>>, vector<8x128xf32>,
    %c5_i32_143 = arith.constant 5 : i32
    %c8_i32_144 = arith.constant 8 : i32
    %437 = arith.muli %c5_i32_143, %c8_i32_144 : i32
    %438 = tpu.assume_multiple %437, 8 : i32
    %439 = arith.index_cast %438 : i32 to index
    %c0_145 = arith.constant 0 : index
    %440 = vector.load %arg8[%439, %c0_145] : memref<64x512xf32, #tpu.memory_space<vmem>>, vector<8x512xf32>
    %441 = arith.truncf %434 : vector<8x128xf32> to vector<8x128xbf16>
    %c1_146 = arith.constant 1 : index
    %c0_147 = arith.constant 0 : index
    %c0_148 = arith.constant 0 : index
    %442 = vector.load %arg2[%c1_146, %c0_147, %c0_148] : memref<3x128x512xbf16, #tpu.memory_space<vmem>>, vector<1x128x512xbf16>
    %443 = vector.shape_cast %442 : vector<1x128x512xbf16> to vector<128x512xbf16>
    %cst_149 = arith.constant dense<0.000000e+00> : vector<8x512xf32>
    %444 = tpu.matmul %441, %443, %cst_149 {dimension_numbers = #tpu.dot_dimension_numbers<[1], [0], [0], [1], [0, 0, 1, 1], [], []>} : vector<8x128xbf16>, vector<128x512xbf16>, vector<8x512xf32> -> vector<8x512xf32>
    %445 = arith.addf %440, %444 : vector<8x512xf32>
    %446 = vector.extract_strided_slice %445 {offsets = [0, 0], sizes = [8, 256], strides = [1, 1]} : vector<8x512xf32> to vector<8x256xf32>
    %447 = arith.negf %446 : vector<8x256xf32>
    %448 = math.exp %447 : vector<8x256xf32>
    %cst_150 = arith.constant 1.000000e+00 : f32
    %449 = vector.broadcast %cst_150 : f32 to vector<8x256xf32>
    %450 = arith.addf %449, %448 : vector<8x256xf32>
    %451 = arith.divf %449, %450 : vector<8x256xf32>
    %452 = vector.extract_strided_slice %451 {offsets = [0, 0], sizes = [8, 128], strides = [1, 1]} : vector<8x256xf32> to vector<8x128xf32>
    %453 = vector.extract_strided_slice %451 {offsets = [0, 128], sizes = [8, 128], strides = [1, 1]} : vector<8x256xf32> to vector<8x128xf32>
    %454 = vector.extract_strided_slice %445 {offsets = [0, 256], sizes = [8, 128], strides = [1, 1]} : vector<8x512xf32> to vector<8x128xf32>
    %455 = math.tanh %454 : vector<8x128xf32>
    %456 = vector.extract_strided_slice %445 {offsets = [0, 384], sizes = [8, 128], strides = [1, 1]} : vector<8x512xf32> to vector<8x128xf32>
    %457 = arith.negf %456 : vector<8x128xf32>
    %458 = math.exp %457 : vector<8x128xf32>
    %cst_151 = arith.constant 1.000000e+00 : f32
    %459 = vector.broadcast %cst_151 : f32 to vector<8x128xf32>
    %460 = arith.addf %459, %458 : vector<8x128xf32>
    %461 = arith.divf %459, %460 : vector<8x128xf32>
    %462 = arith.mulf %453, %432 : vector<8x128xf32>
    %463 = arith.mulf %452, %455 : vector<8x128xf32>
    %464 = arith.addf %462, %463 : vector<8x128xf32>
    %465 = math.tanh %464 : vector<8x128xf32>
    %466 = arith.mulf %461, %465 : vector<8x128xf32>
    %467 = arith.index_cast %438 : i32 to index
    %c0_152 = arith.constant 0 : index
    %468 = vector.load %arg7[%467, %c0_152] : memref<64x128xf32, #tpu.memory_space<vmem>>, vector<8x128xf32>
    tpu.vector_store %arg7[%467, %c0_152], %466 {strides = array<i32>} : memref<64x128xf32, #tpu.memory_space<vmem>>, vector<8x128xf32>,
    %c6_i32_153 = arith.constant 6 : i32
    %c8_i32_154 = arith.constant 8 : i32
    %469 = arith.muli %c6_i32_153, %c8_i32_154 : i32
    %470 = tpu.assume_multiple %469, 8 : i32
    %471 = arith.index_cast %470 : i32 to index
    %c0_155 = arith.constant 0 : index
    %472 = vector.load %arg8[%471, %c0_155] : memref<64x512xf32, #tpu.memory_space<vmem>>, vector<8x512xf32>
    %473 = arith.truncf %466 : vector<8x128xf32> to vector<8x128xbf16>
    %c1_156 = arith.constant 1 : index
    %c0_157 = arith.constant 0 : index
    %c0_158 = arith.constant 0 : index
    %474 = vector.load %arg2[%c1_156, %c0_157, %c0_158] : memref<3x128x512xbf16, #tpu.memory_space<vmem>>, vector<1x128x512xbf16>
    %475 = vector.shape_cast %474 : vector<1x128x512xbf16> to vector<128x512xbf16>
    %cst_159 = arith.constant dense<0.000000e+00> : vector<8x512xf32>
    %476 = tpu.matmul %473, %475, %cst_159 {dimension_numbers = #tpu.dot_dimension_numbers<[1], [0], [0], [1], [0, 0, 1, 1], [], []>} : vector<8x128xbf16>, vector<128x512xbf16>, vector<8x512xf32> -> vector<8x512xf32>
    %477 = arith.addf %472, %476 : vector<8x512xf32>
    %478 = vector.extract_strided_slice %477 {offsets = [0, 0], sizes = [8, 256], strides = [1, 1]} : vector<8x512xf32> to vector<8x256xf32>
    %479 = arith.negf %478 : vector<8x256xf32>
    %480 = math.exp %479 : vector<8x256xf32>
    %cst_160 = arith.constant 1.000000e+00 : f32
    %481 = vector.broadcast %cst_160 : f32 to vector<8x256xf32>
    %482 = arith.addf %481, %480 : vector<8x256xf32>
    %483 = arith.divf %481, %482 : vector<8x256xf32>
    %484 = vector.extract_strided_slice %483 {offsets = [0, 0], sizes = [8, 128], strides = [1, 1]} : vector<8x256xf32> to vector<8x128xf32>
    %485 = vector.extract_strided_slice %483 {offsets = [0, 128], sizes = [8, 128], strides = [1, 1]} : vector<8x256xf32> to vector<8x128xf32>
    %486 = vector.extract_strided_slice %477 {offsets = [0, 256], sizes = [8, 128], strides = [1, 1]} : vector<8x512xf32> to vector<8x128xf32>
    %487 = math.tanh %486 : vector<8x128xf32>
    %488 = vector.extract_strided_slice %477 {offsets = [0, 384], sizes = [8, 128], strides = [1, 1]} : vector<8x512xf32> to vector<8x128xf32>
    %489 = arith.negf %488 : vector<8x128xf32>
    %490 = math.exp %489 : vector<8x128xf32>
    %cst_161 = arith.constant 1.000000e+00 : f32
    %491 = vector.broadcast %cst_161 : f32 to vector<8x128xf32>
    %492 = arith.addf %491, %490 : vector<8x128xf32>
    %493 = arith.divf %491, %492 : vector<8x128xf32>
    %494 = arith.mulf %485, %464 : vector<8x128xf32>
    %495 = arith.mulf %484, %487 : vector<8x128xf32>
    %496 = arith.addf %494, %495 : vector<8x128xf32>
    %497 = math.tanh %496 : vector<8x128xf32>
    %498 = arith.mulf %493, %497 : vector<8x128xf32>
    %499 = arith.index_cast %470 : i32 to index
    %c0_162 = arith.constant 0 : index
    %500 = vector.load %arg7[%499, %c0_162] : memref<64x128xf32, #tpu.memory_space<vmem>>, vector<8x128xf32>
    tpu.vector_store %arg7[%499, %c0_162], %498 {strides = array<i32>} : memref<64x128xf32, #tpu.memory_space<vmem>>, vector<8x128xf32>,
    %c7_i32_163 = arith.constant 7 : i32
    %c8_i32_164 = arith.constant 8 : i32
    %501 = arith.muli %c7_i32_163, %c8_i32_164 : i32
    %502 = tpu.assume_multiple %501, 8 : i32
    %503 = arith.index_cast %502 : i32 to index
    %c0_165 = arith.constant 0 : index
    %504 = vector.load %arg8[%503, %c0_165] : memref<64x512xf32, #tpu.memory_space<vmem>>, vector<8x512xf32>
    %505 = arith.truncf %498 : vector<8x128xf32> to vector<8x128xbf16>
    %c1_166 = arith.constant 1 : index
    %c0_167 = arith.constant 0 : index
    %c0_168 = arith.constant 0 : index
    %506 = vector.load %arg2[%c1_166, %c0_167, %c0_168] : memref<3x128x512xbf16, #tpu.memory_space<vmem>>, vector<1x128x512xbf16>
    %507 = vector.shape_cast %506 : vector<1x128x512xbf16> to vector<128x512xbf16>
    %cst_169 = arith.constant dense<0.000000e+00> : vector<8x512xf32>
    %508 = tpu.matmul %505, %507, %cst_169 {dimension_numbers = #tpu.dot_dimension_numbers<[1], [0], [0], [1], [0, 0, 1, 1], [], []>} : vector<8x128xbf16>, vector<128x512xbf16>, vector<8x512xf32> -> vector<8x512xf32>
    %509 = arith.addf %504, %508 : vector<8x512xf32>
    %510 = vector.extract_strided_slice %509 {offsets = [0, 0], sizes = [8, 256], strides = [1, 1]} : vector<8x512xf32> to vector<8x256xf32>
    %511 = arith.negf %510 : vector<8x256xf32>
    %512 = math.exp %511 : vector<8x256xf32>
    %cst_170 = arith.constant 1.000000e+00 : f32
    %513 = vector.broadcast %cst_170 : f32 to vector<8x256xf32>
    %514 = arith.addf %513, %512 : vector<8x256xf32>
    %515 = arith.divf %513, %514 : vector<8x256xf32>
    %516 = vector.extract_strided_slice %515 {offsets = [0, 0], sizes = [8, 128], strides = [1, 1]} : vector<8x256xf32> to vector<8x128xf32>
    %517 = vector.extract_strided_slice %515 {offsets = [0, 128], sizes = [8, 128], strides = [1, 1]} : vector<8x256xf32> to vector<8x128xf32>
    %518 = vector.extract_strided_slice %509 {offsets = [0, 256], sizes = [8, 128], strides = [1, 1]} : vector<8x512xf32> to vector<8x128xf32>
    %519 = math.tanh %518 : vector<8x128xf32>
    %520 = vector.extract_strided_slice %509 {offsets = [0, 384], sizes = [8, 128], strides = [1, 1]} : vector<8x512xf32> to vector<8x128xf32>
    %521 = arith.negf %520 : vector<8x128xf32>
    %522 = math.exp %521 : vector<8x128xf32>
    %cst_171 = arith.constant 1.000000e+00 : f32
    %523 = vector.broadcast %cst_171 : f32 to vector<8x128xf32>
    %524 = arith.addf %523, %522 : vector<8x128xf32>
    %525 = arith.divf %523, %524 : vector<8x128xf32>
    %526 = arith.mulf %517, %496 : vector<8x128xf32>
    %527 = arith.mulf %516, %519 : vector<8x128xf32>
    %528 = arith.addf %526, %527 : vector<8x128xf32>
    %529 = math.tanh %528 : vector<8x128xf32>
    %530 = arith.mulf %525, %529 : vector<8x128xf32>
    %531 = arith.index_cast %502 : i32 to index
    %c0_172 = arith.constant 0 : index
    %532 = vector.load %arg7[%531, %c0_172] : memref<64x128xf32, #tpu.memory_space<vmem>>, vector<8x128xf32>
    tpu.vector_store %arg7[%531, %c0_172], %530 {strides = array<i32>} : memref<64x128xf32, #tpu.memory_space<vmem>>, vector<8x128xf32>,
    %c8_i32_173 = arith.constant 8 : i32
    %c0_174 = arith.constant 0 : index
    %c0_175 = arith.constant 0 : index
    %533 = vector.load %arg7[%c0_174, %c0_175] : memref<64x128xf32, #tpu.memory_space<vmem>>, vector<64x128xf32>
    %534 = arith.truncf %533 : vector<64x128xf32> to vector<64x128xbf16>
    %c2 = arith.constant 2 : index
    %c0_176 = arith.constant 0 : index
    %c0_177 = arith.constant 0 : index
    %535 = vector.load %arg1[%c2, %c0_176, %c0_177] : memref<3x128x512xbf16, #tpu.memory_space<vmem>>, vector<1x128x512xbf16>
    %536 = vector.shape_cast %535 : vector<1x128x512xbf16> to vector<128x512xbf16>
    %cst_178 = arith.constant dense<0.000000e+00> : vector<64x512xf32>
    %537 = tpu.matmul %534, %536, %cst_178 {dimension_numbers = #tpu.dot_dimension_numbers<[1], [0], [0], [1], [0, 0, 1, 1], [], []>} : vector<64x128xbf16>, vector<128x512xbf16>, vector<64x512xf32> -> vector<64x512xf32>
    %c2_179 = arith.constant 2 : index
    %c0_180 = arith.constant 0 : index
    %c0_181 = arith.constant 0 : index
    %538 = vector.load %arg3[%c2_179, %c0_180, %c0_181] : memref<3x1x512xf32, #tpu.memory_space<vmem>>, vector<1x1x512xf32>
    %539 = vector.shape_cast %538 : vector<1x1x512xf32> to vector<1x512xf32>
    %540 = vector.broadcast %539 : vector<1x512xf32> to vector<64x512xf32>
    %541 = arith.addf %537, %540 : vector<64x512xf32>
    %c0_182 = arith.constant 0 : index
    %c0_183 = arith.constant 0 : index
    %542 = vector.load %arg8[%c0_182, %c0_183] : memref<64x512xf32, #tpu.memory_space<vmem>>, vector<64x512xf32>
    tpu.vector_store %arg8[%c0_182, %c0_183], %541 {strides = array<i32>} : memref<64x512xf32, #tpu.memory_space<vmem>>, vector<64x512xf32>,
    %cst_184 = arith.constant 0.000000e+00 : f32
    %543 = vector.broadcast %cst_184 : f32 to vector<8x128xf32>
    %c0_i32_185 = arith.constant 0 : i32
    %c8_i32_186 = arith.constant 8 : i32
    %544 = arith.muli %c0_i32_185, %c8_i32_186 : i32
    %545 = tpu.assume_multiple %544, 8 : i32
    %546 = arith.index_cast %545 : i32 to index
    %c0_187 = arith.constant 0 : index
    %547 = vector.load %arg8[%546, %c0_187] : memref<64x512xf32, #tpu.memory_space<vmem>>, vector<8x512xf32>
    %548 = arith.truncf %543 : vector<8x128xf32> to vector<8x128xbf16>
    %c2_188 = arith.constant 2 : index
    %c0_189 = arith.constant 0 : index
    %c0_190 = arith.constant 0 : index
    %549 = vector.load %arg2[%c2_188, %c0_189, %c0_190] : memref<3x128x512xbf16, #tpu.memory_space<vmem>>, vector<1x128x512xbf16>
    %550 = vector.shape_cast %549 : vector<1x128x512xbf16> to vector<128x512xbf16>
    %cst_191 = arith.constant dense<0.000000e+00> : vector<8x512xf32>
    %551 = tpu.matmul %548, %550, %cst_191 {dimension_numbers = #tpu.dot_dimension_numbers<[1], [0], [0], [1], [0, 0, 1, 1], [], []>} : vector<8x128xbf16>, vector<128x512xbf16>, vector<8x512xf32> -> vector<8x512xf32>
    %552 = arith.addf %547, %551 : vector<8x512xf32>
    %553 = vector.extract_strided_slice %552 {offsets = [0, 0], sizes = [8, 256], strides = [1, 1]} : vector<8x512xf32> to vector<8x256xf32>
    %554 = arith.negf %553 : vector<8x256xf32>
    %555 = math.exp %554 : vector<8x256xf32>
    %cst_192 = arith.constant 1.000000e+00 : f32
    %556 = vector.broadcast %cst_192 : f32 to vector<8x256xf32>
    %557 = arith.addf %556, %555 : vector<8x256xf32>
    %558 = arith.divf %556, %557 : vector<8x256xf32>
    %559 = vector.extract_strided_slice %558 {offsets = [0, 0], sizes = [8, 128], strides = [1, 1]} : vector<8x256xf32> to vector<8x128xf32>
    %560 = vector.extract_strided_slice %558 {offsets = [0, 128], sizes = [8, 128], strides = [1, 1]} : vector<8x256xf32> to vector<8x128xf32>
    %561 = vector.extract_strided_slice %552 {offsets = [0, 256], sizes = [8, 128], strides = [1, 1]} : vector<8x512xf32> to vector<8x128xf32>
    %562 = math.tanh %561 : vector<8x128xf32>
    %563 = vector.extract_strided_slice %552 {offsets = [0, 384], sizes = [8, 128], strides = [1, 1]} : vector<8x512xf32> to vector<8x128xf32>
    %564 = arith.negf %563 : vector<8x128xf32>
    %565 = math.exp %564 : vector<8x128xf32>
    %cst_193 = arith.constant 1.000000e+00 : f32
    %566 = vector.broadcast %cst_193 : f32 to vector<8x128xf32>
    %567 = arith.addf %566, %565 : vector<8x128xf32>
    %568 = arith.divf %566, %567 : vector<8x128xf32>
    %569 = arith.mulf %560, %543 : vector<8x128xf32>
    %570 = arith.mulf %559, %562 : vector<8x128xf32>
    %571 = arith.addf %569, %570 : vector<8x128xf32>
    %572 = math.tanh %571 : vector<8x128xf32>
    %573 = arith.mulf %568, %572 : vector<8x128xf32>
    %574 = arith.index_cast %545 : i32 to index
    %c0_194 = arith.constant 0 : index
    %575 = vector.load %arg7[%574, %c0_194] : memref<64x128xf32, #tpu.memory_space<vmem>>, vector<8x128xf32>
    tpu.vector_store %arg7[%574, %c0_194], %573 {strides = array<i32>} : memref<64x128xf32, #tpu.memory_space<vmem>>, vector<8x128xf32>,
    %c1_i32_195 = arith.constant 1 : i32
    %c8_i32_196 = arith.constant 8 : i32
    %576 = arith.muli %c1_i32_195, %c8_i32_196 : i32
    %577 = tpu.assume_multiple %576, 8 : i32
    %578 = arith.index_cast %577 : i32 to index
    %c0_197 = arith.constant 0 : index
    %579 = vector.load %arg8[%578, %c0_197] : memref<64x512xf32, #tpu.memory_space<vmem>>, vector<8x512xf32>
    %580 = arith.truncf %573 : vector<8x128xf32> to vector<8x128xbf16>
    %c2_198 = arith.constant 2 : index
    %c0_199 = arith.constant 0 : index
    %c0_200 = arith.constant 0 : index
    %581 = vector.load %arg2[%c2_198, %c0_199, %c0_200] : memref<3x128x512xbf16, #tpu.memory_space<vmem>>, vector<1x128x512xbf16>
    %582 = vector.shape_cast %581 : vector<1x128x512xbf16> to vector<128x512xbf16>
    %cst_201 = arith.constant dense<0.000000e+00> : vector<8x512xf32>
    %583 = tpu.matmul %580, %582, %cst_201 {dimension_numbers = #tpu.dot_dimension_numbers<[1], [0], [0], [1], [0, 0, 1, 1], [], []>} : vector<8x128xbf16>, vector<128x512xbf16>, vector<8x512xf32> -> vector<8x512xf32>
    %584 = arith.addf %579, %583 : vector<8x512xf32>
    %585 = vector.extract_strided_slice %584 {offsets = [0, 0], sizes = [8, 256], strides = [1, 1]} : vector<8x512xf32> to vector<8x256xf32>
    %586 = arith.negf %585 : vector<8x256xf32>
    %587 = math.exp %586 : vector<8x256xf32>
    %cst_202 = arith.constant 1.000000e+00 : f32
    %588 = vector.broadcast %cst_202 : f32 to vector<8x256xf32>
    %589 = arith.addf %588, %587 : vector<8x256xf32>
    %590 = arith.divf %588, %589 : vector<8x256xf32>
    %591 = vector.extract_strided_slice %590 {offsets = [0, 0], sizes = [8, 128], strides = [1, 1]} : vector<8x256xf32> to vector<8x128xf32>
    %592 = vector.extract_strided_slice %590 {offsets = [0, 128], sizes = [8, 128], strides = [1, 1]} : vector<8x256xf32> to vector<8x128xf32>
    %593 = vector.extract_strided_slice %584 {offsets = [0, 256], sizes = [8, 128], strides = [1, 1]} : vector<8x512xf32> to vector<8x128xf32>
    %594 = math.tanh %593 : vector<8x128xf32>
    %595 = vector.extract_strided_slice %584 {offsets = [0, 384], sizes = [8, 128], strides = [1, 1]} : vector<8x512xf32> to vector<8x128xf32>
    %596 = arith.negf %595 : vector<8x128xf32>
    %597 = math.exp %596 : vector<8x128xf32>
    %cst_203 = arith.constant 1.000000e+00 : f32
    %598 = vector.broadcast %cst_203 : f32 to vector<8x128xf32>
    %599 = arith.addf %598, %597 : vector<8x128xf32>
    %600 = arith.divf %598, %599 : vector<8x128xf32>
    %601 = arith.mulf %592, %571 : vector<8x128xf32>
    %602 = arith.mulf %591, %594 : vector<8x128xf32>
    %603 = arith.addf %601, %602 : vector<8x128xf32>
    %604 = math.tanh %603 : vector<8x128xf32>
    %605 = arith.mulf %600, %604 : vector<8x128xf32>
    %606 = arith.index_cast %577 : i32 to index
    %c0_204 = arith.constant 0 : index
    %607 = vector.load %arg7[%606, %c0_204] : memref<64x128xf32, #tpu.memory_space<vmem>>, vector<8x128xf32>
    tpu.vector_store %arg7[%606, %c0_204], %605 {strides = array<i32>} : memref<64x128xf32, #tpu.memory_space<vmem>>, vector<8x128xf32>,
    %c2_i32_205 = arith.constant 2 : i32
    %c8_i32_206 = arith.constant 8 : i32
    %608 = arith.muli %c2_i32_205, %c8_i32_206 : i32
    %609 = tpu.assume_multiple %608, 8 : i32
    %610 = arith.index_cast %609 : i32 to index
    %c0_207 = arith.constant 0 : index
    %611 = vector.load %arg8[%610, %c0_207] : memref<64x512xf32, #tpu.memory_space<vmem>>, vector<8x512xf32>
    %612 = arith.truncf %605 : vector<8x128xf32> to vector<8x128xbf16>
    %c2_208 = arith.constant 2 : index
    %c0_209 = arith.constant 0 : index
    %c0_210 = arith.constant 0 : index
    %613 = vector.load %arg2[%c2_208, %c0_209, %c0_210] : memref<3x128x512xbf16, #tpu.memory_space<vmem>>, vector<1x128x512xbf16>
    %614 = vector.shape_cast %613 : vector<1x128x512xbf16> to vector<128x512xbf16>
    %cst_211 = arith.constant dense<0.000000e+00> : vector<8x512xf32>
    %615 = tpu.matmul %612, %614, %cst_211 {dimension_numbers = #tpu.dot_dimension_numbers<[1], [0], [0], [1], [0, 0, 1, 1], [], []>} : vector<8x128xbf16>, vector<128x512xbf16>, vector<8x512xf32> -> vector<8x512xf32>
    %616 = arith.addf %611, %615 : vector<8x512xf32>
    %617 = vector.extract_strided_slice %616 {offsets = [0, 0], sizes = [8, 256], strides = [1, 1]} : vector<8x512xf32> to vector<8x256xf32>
    %618 = arith.negf %617 : vector<8x256xf32>
    %619 = math.exp %618 : vector<8x256xf32>
    %cst_212 = arith.constant 1.000000e+00 : f32
    %620 = vector.broadcast %cst_212 : f32 to vector<8x256xf32>
    %621 = arith.addf %620, %619 : vector<8x256xf32>
    %622 = arith.divf %620, %621 : vector<8x256xf32>
    %623 = vector.extract_strided_slice %622 {offsets = [0, 0], sizes = [8, 128], strides = [1, 1]} : vector<8x256xf32> to vector<8x128xf32>
    %624 = vector.extract_strided_slice %622 {offsets = [0, 128], sizes = [8, 128], strides = [1, 1]} : vector<8x256xf32> to vector<8x128xf32>
    %625 = vector.extract_strided_slice %616 {offsets = [0, 256], sizes = [8, 128], strides = [1, 1]} : vector<8x512xf32> to vector<8x128xf32>
    %626 = math.tanh %625 : vector<8x128xf32>
    %627 = vector.extract_strided_slice %616 {offsets = [0, 384], sizes = [8, 128], strides = [1, 1]} : vector<8x512xf32> to vector<8x128xf32>
    %628 = arith.negf %627 : vector<8x128xf32>
    %629 = math.exp %628 : vector<8x128xf32>
    %cst_213 = arith.constant 1.000000e+00 : f32
    %630 = vector.broadcast %cst_213 : f32 to vector<8x128xf32>
    %631 = arith.addf %630, %629 : vector<8x128xf32>
    %632 = arith.divf %630, %631 : vector<8x128xf32>
    %633 = arith.mulf %624, %603 : vector<8x128xf32>
    %634 = arith.mulf %623, %626 : vector<8x128xf32>
    %635 = arith.addf %633, %634 : vector<8x128xf32>
    %636 = math.tanh %635 : vector<8x128xf32>
    %637 = arith.mulf %632, %636 : vector<8x128xf32>
    %638 = arith.index_cast %609 : i32 to index
    %c0_214 = arith.constant 0 : index
    %639 = vector.load %arg7[%638, %c0_214] : memref<64x128xf32, #tpu.memory_space<vmem>>, vector<8x128xf32>
    tpu.vector_store %arg7[%638, %c0_214], %637 {strides = array<i32>} : memref<64x128xf32, #tpu.memory_space<vmem>>, vector<8x128xf32>,
    %c3_i32_215 = arith.constant 3 : i32
    %c8_i32_216 = arith.constant 8 : i32
    %640 = arith.muli %c3_i32_215, %c8_i32_216 : i32
    %641 = tpu.assume_multiple %640, 8 : i32
    %642 = arith.index_cast %641 : i32 to index
    %c0_217 = arith.constant 0 : index
    %643 = vector.load %arg8[%642, %c0_217] : memref<64x512xf32, #tpu.memory_space<vmem>>, vector<8x512xf32>
    %644 = arith.truncf %637 : vector<8x128xf32> to vector<8x128xbf16>
    %c2_218 = arith.constant 2 : index
    %c0_219 = arith.constant 0 : index
    %c0_220 = arith.constant 0 : index
    %645 = vector.load %arg2[%c2_218, %c0_219, %c0_220] : memref<3x128x512xbf16, #tpu.memory_space<vmem>>, vector<1x128x512xbf16>
    %646 = vector.shape_cast %645 : vector<1x128x512xbf16> to vector<128x512xbf16>
    %cst_221 = arith.constant dense<0.000000e+00> : vector<8x512xf32>
    %647 = tpu.matmul %644, %646, %cst_221 {dimension_numbers = #tpu.dot_dimension_numbers<[1], [0], [0], [1], [0, 0, 1, 1], [], []>} : vector<8x128xbf16>, vector<128x512xbf16>, vector<8x512xf32> -> vector<8x512xf32>
    %648 = arith.addf %643, %647 : vector<8x512xf32>
    %649 = vector.extract_strided_slice %648 {offsets = [0, 0], sizes = [8, 256], strides = [1, 1]} : vector<8x512xf32> to vector<8x256xf32>
    %650 = arith.negf %649 : vector<8x256xf32>
    %651 = math.exp %650 : vector<8x256xf32>
    %cst_222 = arith.constant 1.000000e+00 : f32
    %652 = vector.broadcast %cst_222 : f32 to vector<8x256xf32>
    %653 = arith.addf %652, %651 : vector<8x256xf32>
    %654 = arith.divf %652, %653 : vector<8x256xf32>
    %655 = vector.extract_strided_slice %654 {offsets = [0, 0], sizes = [8, 128], strides = [1, 1]} : vector<8x256xf32> to vector<8x128xf32>
    %656 = vector.extract_strided_slice %654 {offsets = [0, 128], sizes = [8, 128], strides = [1, 1]} : vector<8x256xf32> to vector<8x128xf32>
    %657 = vector.extract_strided_slice %648 {offsets = [0, 256], sizes = [8, 128], strides = [1, 1]} : vector<8x512xf32> to vector<8x128xf32>
    %658 = math.tanh %657 : vector<8x128xf32>
    %659 = vector.extract_strided_slice %648 {offsets = [0, 384], sizes = [8, 128], strides = [1, 1]} : vector<8x512xf32> to vector<8x128xf32>
    %660 = arith.negf %659 : vector<8x128xf32>
    %661 = math.exp %660 : vector<8x128xf32>
    %cst_223 = arith.constant 1.000000e+00 : f32
    %662 = vector.broadcast %cst_223 : f32 to vector<8x128xf32>
    %663 = arith.addf %662, %661 : vector<8x128xf32>
    %664 = arith.divf %662, %663 : vector<8x128xf32>
    %665 = arith.mulf %656, %635 : vector<8x128xf32>
    %666 = arith.mulf %655, %658 : vector<8x128xf32>
    %667 = arith.addf %665, %666 : vector<8x128xf32>
    %668 = math.tanh %667 : vector<8x128xf32>
    %669 = arith.mulf %664, %668 : vector<8x128xf32>
    %670 = arith.index_cast %641 : i32 to index
    %c0_224 = arith.constant 0 : index
    %671 = vector.load %arg7[%670, %c0_224] : memref<64x128xf32, #tpu.memory_space<vmem>>, vector<8x128xf32>
    tpu.vector_store %arg7[%670, %c0_224], %669 {strides = array<i32>} : memref<64x128xf32, #tpu.memory_space<vmem>>, vector<8x128xf32>,
    %c4_i32_225 = arith.constant 4 : i32
    %c8_i32_226 = arith.constant 8 : i32
    %672 = arith.muli %c4_i32_225, %c8_i32_226 : i32
    %673 = tpu.assume_multiple %672, 8 : i32
    %674 = arith.index_cast %673 : i32 to index
    %c0_227 = arith.constant 0 : index
    %675 = vector.load %arg8[%674, %c0_227] : memref<64x512xf32, #tpu.memory_space<vmem>>, vector<8x512xf32>
    %676 = arith.truncf %669 : vector<8x128xf32> to vector<8x128xbf16>
    %c2_228 = arith.constant 2 : index
    %c0_229 = arith.constant 0 : index
    %c0_230 = arith.constant 0 : index
    %677 = vector.load %arg2[%c2_228, %c0_229, %c0_230] : memref<3x128x512xbf16, #tpu.memory_space<vmem>>, vector<1x128x512xbf16>
    %678 = vector.shape_cast %677 : vector<1x128x512xbf16> to vector<128x512xbf16>
    %cst_231 = arith.constant dense<0.000000e+00> : vector<8x512xf32>
    %679 = tpu.matmul %676, %678, %cst_231 {dimension_numbers = #tpu.dot_dimension_numbers<[1], [0], [0], [1], [0, 0, 1, 1], [], []>} : vector<8x128xbf16>, vector<128x512xbf16>, vector<8x512xf32> -> vector<8x512xf32>
    %680 = arith.addf %675, %679 : vector<8x512xf32>
    %681 = vector.extract_strided_slice %680 {offsets = [0, 0], sizes = [8, 256], strides = [1, 1]} : vector<8x512xf32> to vector<8x256xf32>
    %682 = arith.negf %681 : vector<8x256xf32>
    %683 = math.exp %682 : vector<8x256xf32>
    %cst_232 = arith.constant 1.000000e+00 : f32
    %684 = vector.broadcast %cst_232 : f32 to vector<8x256xf32>
    %685 = arith.addf %684, %683 : vector<8x256xf32>
    %686 = arith.divf %684, %685 : vector<8x256xf32>
    %687 = vector.extract_strided_slice %686 {offsets = [0, 0], sizes = [8, 128], strides = [1, 1]} : vector<8x256xf32> to vector<8x128xf32>
    %688 = vector.extract_strided_slice %686 {offsets = [0, 128], sizes = [8, 128], strides = [1, 1]} : vector<8x256xf32> to vector<8x128xf32>
    %689 = vector.extract_strided_slice %680 {offsets = [0, 256], sizes = [8, 128], strides = [1, 1]} : vector<8x512xf32> to vector<8x128xf32>
    %690 = math.tanh %689 : vector<8x128xf32>
    %691 = vector.extract_strided_slice %680 {offsets = [0, 384], sizes = [8, 128], strides = [1, 1]} : vector<8x512xf32> to vector<8x128xf32>
    %692 = arith.negf %691 : vector<8x128xf32>
    %693 = math.exp %692 : vector<8x128xf32>
    %cst_233 = arith.constant 1.000000e+00 : f32
    %694 = vector.broadcast %cst_233 : f32 to vector<8x128xf32>
    %695 = arith.addf %694, %693 : vector<8x128xf32>
    %696 = arith.divf %694, %695 : vector<8x128xf32>
    %697 = arith.mulf %688, %667 : vector<8x128xf32>
    %698 = arith.mulf %687, %690 : vector<8x128xf32>
    %699 = arith.addf %697, %698 : vector<8x128xf32>
    %700 = math.tanh %699 : vector<8x128xf32>
    %701 = arith.mulf %696, %700 : vector<8x128xf32>
    %702 = arith.index_cast %673 : i32 to index
    %c0_234 = arith.constant 0 : index
    %703 = vector.load %arg7[%702, %c0_234] : memref<64x128xf32, #tpu.memory_space<vmem>>, vector<8x128xf32>
    tpu.vector_store %arg7[%702, %c0_234], %701 {strides = array<i32>} : memref<64x128xf32, #tpu.memory_space<vmem>>, vector<8x128xf32>,
    %c5_i32_235 = arith.constant 5 : i32
    %c8_i32_236 = arith.constant 8 : i32
    %704 = arith.muli %c5_i32_235, %c8_i32_236 : i32
    %705 = tpu.assume_multiple %704, 8 : i32
    %706 = arith.index_cast %705 : i32 to index
    %c0_237 = arith.constant 0 : index
    %707 = vector.load %arg8[%706, %c0_237] : memref<64x512xf32, #tpu.memory_space<vmem>>, vector<8x512xf32>
    %708 = arith.truncf %701 : vector<8x128xf32> to vector<8x128xbf16>
    %c2_238 = arith.constant 2 : index
    %c0_239 = arith.constant 0 : index
    %c0_240 = arith.constant 0 : index
    %709 = vector.load %arg2[%c2_238, %c0_239, %c0_240] : memref<3x128x512xbf16, #tpu.memory_space<vmem>>, vector<1x128x512xbf16>
    %710 = vector.shape_cast %709 : vector<1x128x512xbf16> to vector<128x512xbf16>
    %cst_241 = arith.constant dense<0.000000e+00> : vector<8x512xf32>
    %711 = tpu.matmul %708, %710, %cst_241 {dimension_numbers = #tpu.dot_dimension_numbers<[1], [0], [0], [1], [0, 0, 1, 1], [], []>} : vector<8x128xbf16>, vector<128x512xbf16>, vector<8x512xf32> -> vector<8x512xf32>
    %712 = arith.addf %707, %711 : vector<8x512xf32>
    %713 = vector.extract_strided_slice %712 {offsets = [0, 0], sizes = [8, 256], strides = [1, 1]} : vector<8x512xf32> to vector<8x256xf32>
    %714 = arith.negf %713 : vector<8x256xf32>
    %715 = math.exp %714 : vector<8x256xf32>
    %cst_242 = arith.constant 1.000000e+00 : f32
    %716 = vector.broadcast %cst_242 : f32 to vector<8x256xf32>
    %717 = arith.addf %716, %715 : vector<8x256xf32>
    %718 = arith.divf %716, %717 : vector<8x256xf32>
    %719 = vector.extract_strided_slice %718 {offsets = [0, 0], sizes = [8, 128], strides = [1, 1]} : vector<8x256xf32> to vector<8x128xf32>
    %720 = vector.extract_strided_slice %718 {offsets = [0, 128], sizes = [8, 128], strides = [1, 1]} : vector<8x256xf32> to vector<8x128xf32>
    %721 = vector.extract_strided_slice %712 {offsets = [0, 256], sizes = [8, 128], strides = [1, 1]} : vector<8x512xf32> to vector<8x128xf32>
    %722 = math.tanh %721 : vector<8x128xf32>
    %723 = vector.extract_strided_slice %712 {offsets = [0, 384], sizes = [8, 128], strides = [1, 1]} : vector<8x512xf32> to vector<8x128xf32>
    %724 = arith.negf %723 : vector<8x128xf32>
    %725 = math.exp %724 : vector<8x128xf32>
    %cst_243 = arith.constant 1.000000e+00 : f32
    %726 = vector.broadcast %cst_243 : f32 to vector<8x128xf32>
    %727 = arith.addf %726, %725 : vector<8x128xf32>
    %728 = arith.divf %726, %727 : vector<8x128xf32>
    %729 = arith.mulf %720, %699 : vector<8x128xf32>
    %730 = arith.mulf %719, %722 : vector<8x128xf32>
    %731 = arith.addf %729, %730 : vector<8x128xf32>
    %732 = math.tanh %731 : vector<8x128xf32>
    %733 = arith.mulf %728, %732 : vector<8x128xf32>
    %734 = arith.index_cast %705 : i32 to index
    %c0_244 = arith.constant 0 : index
    %735 = vector.load %arg7[%734, %c0_244] : memref<64x128xf32, #tpu.memory_space<vmem>>, vector<8x128xf32>
    tpu.vector_store %arg7[%734, %c0_244], %733 {strides = array<i32>} : memref<64x128xf32, #tpu.memory_space<vmem>>, vector<8x128xf32>,
    %c6_i32_245 = arith.constant 6 : i32
    %c8_i32_246 = arith.constant 8 : i32
    %736 = arith.muli %c6_i32_245, %c8_i32_246 : i32
    %737 = tpu.assume_multiple %736, 8 : i32
    %738 = arith.index_cast %737 : i32 to index
    %c0_247 = arith.constant 0 : index
    %739 = vector.load %arg8[%738, %c0_247] : memref<64x512xf32, #tpu.memory_space<vmem>>, vector<8x512xf32>
    %740 = arith.truncf %733 : vector<8x128xf32> to vector<8x128xbf16>
    %c2_248 = arith.constant 2 : index
    %c0_249 = arith.constant 0 : index
    %c0_250 = arith.constant 0 : index
    %741 = vector.load %arg2[%c2_248, %c0_249, %c0_250] : memref<3x128x512xbf16, #tpu.memory_space<vmem>>, vector<1x128x512xbf16>
    %742 = vector.shape_cast %741 : vector<1x128x512xbf16> to vector<128x512xbf16>
    %cst_251 = arith.constant dense<0.000000e+00> : vector<8x512xf32>
    %743 = tpu.matmul %740, %742, %cst_251 {dimension_numbers = #tpu.dot_dimension_numbers<[1], [0], [0], [1], [0, 0, 1, 1], [], []>} : vector<8x128xbf16>, vector<128x512xbf16>, vector<8x512xf32> -> vector<8x512xf32>
    %744 = arith.addf %739, %743 : vector<8x512xf32>
    %745 = vector.extract_strided_slice %744 {offsets = [0, 0], sizes = [8, 256], strides = [1, 1]} : vector<8x512xf32> to vector<8x256xf32>
    %746 = arith.negf %745 : vector<8x256xf32>
    %747 = math.exp %746 : vector<8x256xf32>
    %cst_252 = arith.constant 1.000000e+00 : f32
    %748 = vector.broadcast %cst_252 : f32 to vector<8x256xf32>
    %749 = arith.addf %748, %747 : vector<8x256xf32>
    %750 = arith.divf %748, %749 : vector<8x256xf32>
    %751 = vector.extract_strided_slice %750 {offsets = [0, 0], sizes = [8, 128], strides = [1, 1]} : vector<8x256xf32> to vector<8x128xf32>
    %752 = vector.extract_strided_slice %750 {offsets = [0, 128], sizes = [8, 128], strides = [1, 1]} : vector<8x256xf32> to vector<8x128xf32>
    %753 = vector.extract_strided_slice %744 {offsets = [0, 256], sizes = [8, 128], strides = [1, 1]} : vector<8x512xf32> to vector<8x128xf32>
    %754 = math.tanh %753 : vector<8x128xf32>
    %755 = vector.extract_strided_slice %744 {offsets = [0, 384], sizes = [8, 128], strides = [1, 1]} : vector<8x512xf32> to vector<8x128xf32>
    %756 = arith.negf %755 : vector<8x128xf32>
    %757 = math.exp %756 : vector<8x128xf32>
    %cst_253 = arith.constant 1.000000e+00 : f32
    %758 = vector.broadcast %cst_253 : f32 to vector<8x128xf32>
    %759 = arith.addf %758, %757 : vector<8x128xf32>
    %760 = arith.divf %758, %759 : vector<8x128xf32>
    %761 = arith.mulf %752, %731 : vector<8x128xf32>
    %762 = arith.mulf %751, %754 : vector<8x128xf32>
    %763 = arith.addf %761, %762 : vector<8x128xf32>
    %764 = math.tanh %763 : vector<8x128xf32>
    %765 = arith.mulf %760, %764 : vector<8x128xf32>
    %766 = arith.index_cast %737 : i32 to index
    %c0_254 = arith.constant 0 : index
    %767 = vector.load %arg7[%766, %c0_254] : memref<64x128xf32, #tpu.memory_space<vmem>>, vector<8x128xf32>
    tpu.vector_store %arg7[%766, %c0_254], %765 {strides = array<i32>} : memref<64x128xf32, #tpu.memory_space<vmem>>, vector<8x128xf32>,
    %c7_i32_255 = arith.constant 7 : i32
    %c8_i32_256 = arith.constant 8 : i32
    %768 = arith.muli %c7_i32_255, %c8_i32_256 : i32
    %769 = tpu.assume_multiple %768, 8 : i32
    %770 = arith.index_cast %769 : i32 to index
    %c0_257 = arith.constant 0 : index
    %771 = vector.load %arg8[%770, %c0_257] : memref<64x512xf32, #tpu.memory_space<vmem>>, vector<8x512xf32>
    %772 = arith.truncf %765 : vector<8x128xf32> to vector<8x128xbf16>
    %c2_258 = arith.constant 2 : index
    %c0_259 = arith.constant 0 : index
    %c0_260 = arith.constant 0 : index
    %773 = vector.load %arg2[%c2_258, %c0_259, %c0_260] : memref<3x128x512xbf16, #tpu.memory_space<vmem>>, vector<1x128x512xbf16>
    %774 = vector.shape_cast %773 : vector<1x128x512xbf16> to vector<128x512xbf16>
    %cst_261 = arith.constant dense<0.000000e+00> : vector<8x512xf32>
    %775 = tpu.matmul %772, %774, %cst_261 {dimension_numbers = #tpu.dot_dimension_numbers<[1], [0], [0], [1], [0, 0, 1, 1], [], []>} : vector<8x128xbf16>, vector<128x512xbf16>, vector<8x512xf32> -> vector<8x512xf32>
    %776 = arith.addf %771, %775 : vector<8x512xf32>
    %777 = vector.extract_strided_slice %776 {offsets = [0, 0], sizes = [8, 256], strides = [1, 1]} : vector<8x512xf32> to vector<8x256xf32>
    %778 = arith.negf %777 : vector<8x256xf32>
    %779 = math.exp %778 : vector<8x256xf32>
    %cst_262 = arith.constant 1.000000e+00 : f32
    %780 = vector.broadcast %cst_262 : f32 to vector<8x256xf32>
    %781 = arith.addf %780, %779 : vector<8x256xf32>
    %782 = arith.divf %780, %781 : vector<8x256xf32>
    %783 = vector.extract_strided_slice %782 {offsets = [0, 0], sizes = [8, 128], strides = [1, 1]} : vector<8x256xf32> to vector<8x128xf32>
    %784 = vector.extract_strided_slice %782 {offsets = [0, 128], sizes = [8, 128], strides = [1, 1]} : vector<8x256xf32> to vector<8x128xf32>
    %785 = vector.extract_strided_slice %776 {offsets = [0, 256], sizes = [8, 128], strides = [1, 1]} : vector<8x512xf32> to vector<8x128xf32>
    %786 = math.tanh %785 : vector<8x128xf32>
    %787 = vector.extract_strided_slice %776 {offsets = [0, 384], sizes = [8, 128], strides = [1, 1]} : vector<8x512xf32> to vector<8x128xf32>
    %788 = arith.negf %787 : vector<8x128xf32>
    %789 = math.exp %788 : vector<8x128xf32>
    %cst_263 = arith.constant 1.000000e+00 : f32
    %790 = vector.broadcast %cst_263 : f32 to vector<8x128xf32>
    %791 = arith.addf %790, %789 : vector<8x128xf32>
    %792 = arith.divf %790, %791 : vector<8x128xf32>
    %793 = arith.mulf %784, %763 : vector<8x128xf32>
    %794 = arith.mulf %783, %786 : vector<8x128xf32>
    %795 = arith.addf %793, %794 : vector<8x128xf32>
    %796 = math.tanh %795 : vector<8x128xf32>
    %797 = arith.mulf %792, %796 : vector<8x128xf32>
    %798 = arith.index_cast %769 : i32 to index
    %c0_264 = arith.constant 0 : index
    %799 = vector.load %arg7[%798, %c0_264] : memref<64x128xf32, #tpu.memory_space<vmem>>, vector<8x128xf32>
    tpu.vector_store %arg7[%798, %c0_264], %797 {strides = array<i32>} : memref<64x128xf32, #tpu.memory_space<vmem>>, vector<8x128xf32>,
    %c8_i32_265 = arith.constant 8 : i32
    %c0_266 = arith.constant 0 : index
    %c0_267 = arith.constant 0 : index
    %800 = vector.load %arg7[%c0_266, %c0_267] : memref<64x128xf32, #tpu.memory_space<vmem>>, vector<64x128xf32>
    %801 = arith.truncf %800 : vector<64x128xf32> to vector<64x128xbf16>
    %c0_268 = arith.constant 0 : index
    %c0_269 = arith.constant 0 : index
    %802 = vector.load %arg4[%c0_268, %c0_269] : memref<128x128xbf16, #tpu.memory_space<vmem>>, vector<128x128xbf16>
    %cst_270 = arith.constant dense<0.000000e+00> : vector<64x128xf32>
    %803 = tpu.matmul %801, %802, %cst_270 {dimension_numbers = #tpu.dot_dimension_numbers<[1], [0], [0], [1], [0, 0, 1, 1], [], []>} : vector<64x128xbf16>, vector<128x128xbf16>, vector<64x128xf32> -> vector<64x128xf32>
    %c0_271 = arith.constant 0 : index
    %c0_272 = arith.constant 0 : index
    %804 = vector.load %arg5[%c0_271, %c0_272] : memref<1x128xf32, #tpu.memory_space<vmem>>, vector<1x128xf32>
    %805 = vector.broadcast %804 : vector<1x128xf32> to vector<64x128xf32>
    %806 = arith.addf %803, %805 : vector<64x128xf32>
    %c0_273 = arith.constant 0 : index
    %c0_274 = arith.constant 0 : index
    %807 = vector.load %arg6[%c0_273, %c0_274] : memref<64x128xf32, #tpu.memory_space<vmem>>, vector<64x128xf32>
    tpu.vector_store %arg6[%c0_273, %c0_274], %806 {strides = array<i32>} : memref<64x128xf32, #tpu.memory_space<vmem>>, vector<64x128xf32>,
    return
  }
}

</mosaic_0001>

<bundles_post_ra>
// kernel: lstm_model_forward.1
= control target key start
LH: loop header
LB: loop body
LE: loop exit
PB: predicated region body
PF: predicated region fallthrough
CT: control target
= control target key end

     0   :  { %11 = vsyncpa [#allocation5], 0  ;;  %s12690_s0 = inlined_call_operand.vmem [shape: bf16[64,128], index: 0, kind: input, shape index: {}]   ;;  %s12691_s1 = inlined_call_operand.hbm [shape: bf16[3,128,512], index: 1, kind: input, shape index: {}]   ;;  %s12692_s2 = inlined_call_operand.hbm [shape: bf16[3,128,512], index: 2, kind: input, shape index: {}]   ;;  %s12693_s3 = inlined_call_operand.vmem [shape: f32[3,1,512], index: 3, kind: input, shape index: {}]   ;;  %s12694_s4 = inlined_call_operand.vmem [shape: bf16[128,128], index: 4, kind: input, shape index: {}]   ;;  %s12695_s5 = inlined_call_operand.vmem [shape: f32[1,128], index: 5, kind: input, shape index: {}]   ;;  %s12696_s6 = inlined_call_operand.vmem [shape: f32[64,128], index: 6, kind: output, shape index: {}]  }
   0x1   :  { %12 = vsyncpa [#allocation7], 0  ;;  %s10786_s21 = smov [#allocation4]   ;;  %s10738_s25 = scalar_lea.hbm %s12691_s1, 12288 }
   0x2   :  { %s20_s22 = sshll.u32 %s10786_s21, 4  ;;  %p10739_p0 = scmp.ne.s32.totalorder %s12691_s1, %s10738_s25  ;;  %s21_s22 = int_to_ptr.vmem [resolvable:$true] %s20_s22 }
   0x3   :  { %p10742_p1 = scmp.lt.u32.totalorder %s10738_s25, %s12691_s1 }
   0x5   :  { %p10744_p2 = pnand %p10742_p1, %p10739_p0 }
   0x7   :  { %10747 = shalt.err (!%p10744_p2)
}
   0x8   :  { %s10748_s30 = scalar_lea.vmem %s21_s22, 12288  ;;  %p10753_p4 = scmp.lt.s32.totalorder %s21_s22, %s21_s22 }
   0x9   :  { %p10749_p3 = scmp.ne.s32.totalorder %s21_s22, %s10748_s30  ;;  %p10754_p5 = scmp.lt.s32.totalorder %s10748_s30, %s10748_s30 }
   0xb   :  { %p10755_p6 = por %p10754_p5, %p10753_p4 }
   0xd   :  { %p10756_p7 = pnand %p10755_p6, %p10749_p3 }
   0xf   :  { %10759 = shalt.err (!%p10756_p7)
}
  0x10   :  { %s10787_s7 = smov 256   ;;  %s10788_s8 = smov 16  }
  0x11   :  { %26 = dma.hbm_to_vmem [thread:$0]  %s12691_s1, 12288, %s21_s22, [#allocation5], %s10787_s7, %s10787_s7, %s10788_s8  }
  0x12   :  { %s10789_s11 = smov [#allocation6]   ;;  %s10760_s15 = scalar_lea.hbm %s12692_s2, 12288 }
  0x13   :  { %s32_s12 = sshll.u32 %s10789_s11, 4  ;;  %p10761_p8 = scmp.ne.s32.totalorder %s12692_s2, %s10760_s15  ;;  %s33_s12 = int_to_ptr.vmem [resolvable:$true] %s32_s12 }
  0x14   :  { %p10764_p9 = scmp.lt.u32.totalorder %s10760_s15, %s12692_s2 }
  0x16   :  { %p10766_p10 = pnand %p10764_p9, %p10761_p8 }
  0x18   :  { %10769 = shalt.err (!%p10766_p10)
}
  0x19   :  { %s10770_s20 = scalar_lea.vmem %s33_s12, 12288  ;;  %p10775_p12 = scmp.lt.s32.totalorder %s33_s12, %s33_s12 }
  0x1a   :  { %p10771_p11 = scmp.ne.s32.totalorder %s33_s12, %s10770_s20  ;;  %p10776_p13 = scmp.lt.s32.totalorder %s10770_s20, %s10770_s20 }
  0x1c   :  { %p10777_p0 = por %p10776_p13, %p10775_p12 }
  0x1e   :  { %p10778_p1 = pnand %p10777_p0, %p10771_p11 }
  0x20   :  { %10781 = shalt.err (!%p10778_p1)
}
  0x21   :  { %38 = dma.hbm_to_vmem [thread:$0]  %s12692_s2, 12288, %s33_s12, [#allocation7], %s10787_s7, %s10787_s7, %s10788_s8  }
  0x22   :  { %10782 = dma.done.wait [#allocation5], 12288  }
  0x23   :  { %10783 = vsyncadd [#allocation5], 4294955008 }
  0x24   :  { %10784 = dma.done.wait [#allocation7], 12288  }
  0x25   :  { %10785 = vsyncadd [#allocation7], 4294955008  ;;  %v12697_v0 = vmov 0   ;;  %v9871_v1 = vld [vmem:[#allocation4 + $0x4] ss:$16 sps:$4 sm:$0xff]   ;;  %v9926_v39 = vld [vmem:[%s12690_s0 + $0x8] sm:$0xff]  }
  0x26   :  { %330 = vmatprep.mubr.bf16.mxu1 %v12697_v0  ;;  %707 = vmatprep.mubr.bf16.mxu0 %v12697_v0  ;;  %v9873_v2 = vld [vmem:[#allocation4] ss:$16 sps:$4 sm:$0xff]   ;;  %v10852_v3 = vld [vmem:[#allocation6 + $0x4] ss:$16 sps:$4 sm:$0xff]   ;;  %v9922_v32 = vld [vmem:[#allocation4 + $0xc] ss:$16 sps:$4 sm:$0xff]  }
  0x27   :  { %298 = vmatprep.subr.bf16.mxu1 %v9871_v1  ;;  %v10854_v4 = vld [vmem:[#allocation6] ss:$16 sps:$4 sm:$0xff]   ;;  %v9877_v5 = vld [vmem:[#allocation4 + $0x24] ss:$16 sps:$4 sm:$0xff]   ;;  %675 = vmatprep.subr.bf16.mxu0 %v10852_v3  ;;  %v9920_v35 = vld [vmem:[#allocation4 + $0x8] ss:$16 sps:$4 sm:$0xff]  }
  0x28   :  { %299 = vmatpush1.bf16.msra.mxu1 %v9873_v2  ;;  %v9879_v6 = vld [vmem:[#allocation4 + $0x20] ss:$16 sps:$4 sm:$0xff]   ;;  %v10857_v7 = vld [vmem:[#allocation6 + $0x24] ss:$16 sps:$4 sm:$0xff]   ;;  %676 = vmatpush1.bf16.msra.mxu0 %v10854_v4  ;;  %v9925_v36 = vld [vmem:[#allocation4 + $0x2c] ss:$16 sps:$4 sm:$0xff]  }
  0x29   :  { %300 = vmatprep.subr.bf16.mxu1 %v9877_v5  ;;  %v10860_v8 = vld [vmem:[#allocation6 + $0x20] ss:$16 sps:$4 sm:$0xff]   ;;  %677 = vmatprep.subr.bf16.mxu0 %v10857_v7  ;;  %v9883_v9 = vld [vmem:[#allocation4 + $0x44] ss:$16 sps:$4 sm:$0xff]   ;;  %v9923_v37 = vld [vmem:[#allocation4 + $0x28] ss:$16 sps:$4 sm:$0xff]  }
  0x2a   :  { %v9885_v10 = vld [vmem:[#allocation4 + $0x40] ss:$16 sps:$4 sm:$0xff]   ;;  %v10863_v11 = vld [vmem:[#allocation6 + $0x44] ss:$16 sps:$4 sm:$0xff]   ;;  %v9929_v38 = vld [vmem:[#allocation4 + $0x4c] ss:$16 sps:$4 sm:$0xff]  }
  0x2b   :  { %v9889_v12 = vld [vmem:[#allocation4 + $0x64] ss:$16 sps:$4 sm:$0xff]   ;;  %v10866_v13 = vld [vmem:[#allocation6 + $0x40] ss:$16 sps:$4 sm:$0xff]   ;;  %v9927_v40 = vld [vmem:[#allocation4 + $0x48] ss:$16 sps:$4 sm:$0xff]  }
  0x2c   :  { %301 = vmatpush1.bf16.msra.mxu1 %v9879_v6  ;;  %678 = vmatpush1.bf16.msra.mxu0 %v10860_v8  ;;  %v10869_v14 = vld [vmem:[#allocation6 + $0x64] ss:$16 sps:$4 sm:$0xff]   ;;  %v9891_v15 = vld [vmem:[#allocation4 + $0x60] ss:$16 sps:$4 sm:$0xff]   ;;  %v9932_v41 = vld [vmem:[#allocation4 + $0x6c] ss:$16 sps:$4 sm:$0xff]   ;;  %v94_v6 = vlaneseq }
  0x2d   :  { %302 = vmatprep.subr.bf16.mxu1 %v9883_v9  ;;  %679 = vmatprep.subr.bf16.mxu0 %v10863_v11  ;;  %v9895_v16 = vld [vmem:[#allocation4 + $0x84] ss:$16 sps:$4 sm:$0xff]   ;;  %v10872_v17 = vld [vmem:[#allocation6 + $0x60] ss:$16 sps:$4 sm:$0xff]   ;;  %v9930_v42 = vld [vmem:[#allocation4 + $0x68] ss:$16 sps:$4 sm:$0xff]  }
  0x2e   :  { %v10875_v18 = vld [vmem:[#allocation6 + $0x84] ss:$16 sps:$4 sm:$0xff]   ;;  %v9897_v19 = vld [vmem:[#allocation4 + $0x80] ss:$16 sps:$4 sm:$0xff]   ;;  %v9936_v43 = vld [vmem:[#allocation4 + $0x8c] ss:$16 sps:$4 sm:$0xff]  }
  0x2f   :  { %v9901_v20 = vld [vmem:[#allocation4 + $0xa4] ss:$16 sps:$4 sm:$0xff]   ;;  %v10878_v21 = vld [vmem:[#allocation6 + $0x80] ss:$16 sps:$4 sm:$0xff]   ;;  %v9934_v45 = vld [vmem:[#allocation4 + $0x88] ss:$16 sps:$4 sm:$0xff]  }
  0x30   :  { %303 = vmatpush1.bf16.msra.mxu1 %v9885_v10  ;;  %680 = vmatpush1.bf16.msra.mxu0 %v10866_v13  ;;  %v10881_v22 = vld [vmem:[#allocation6 + $0xa4] ss:$16 sps:$4 sm:$0xff]   ;;  %v9903_v23 = vld [vmem:[#allocation4 + $0xa0] ss:$16 sps:$4 sm:$0xff]   ;;  %v9939_v46 = vld [vmem:[#allocation4 + $0xac] ss:$16 sps:$4 sm:$0xff]  }
  0x31   :  { %304 = vmatprep.subr.bf16.mxu1 %v9889_v12  ;;  %681 = vmatprep.subr.bf16.mxu0 %v10869_v14  ;;  %v9907_v24 = vld [vmem:[#allocation4 + $0xc4] ss:$16 sps:$4 sm:$0xff]   ;;  %v10884_v25 = vld [vmem:[#allocation6 + $0xa0] ss:$16 sps:$4 sm:$0xff]   ;;  %v9937_v47 = vld [vmem:[#allocation4 + $0xa8] ss:$16 sps:$4 sm:$0xff]  }
  0x32   :  { %v10887_v26 = vld [vmem:[#allocation6 + $0xc4] ss:$16 sps:$4 sm:$0xff]   ;;  %v9909_v27 = vld [vmem:[#allocation4 + $0xc0] ss:$16 sps:$4 sm:$0xff]   ;;  %v9943_v48 = vld [vmem:[#allocation4 + $0xcc] ss:$16 sps:$4 sm:$0xff]  }
  0x33   :  { %v9913_v28 = vld [vmem:[#allocation4 + $0xe4] ss:$16 sps:$4 sm:$0xff]   ;;  %v10890_v29 = vld [vmem:[#allocation6 + $0xc0] ss:$16 sps:$4 sm:$0xff]   ;;  %v9940_v49 = vld [vmem:[%s12690_s0 + $0x18] sm:$0xff]  }
  0x34   :  { %305 = vmatpush1.bf16.msra.mxu1 %v9891_v15  ;;  %682 = vmatpush1.bf16.msra.mxu0 %v10872_v17  ;;  %v10893_v30 = vld [vmem:[#allocation6 + $0xe4] ss:$16 sps:$4 sm:$0xff]   ;;  %v9915_v31 = vld [vmem:[#allocation4 + $0xe0] ss:$16 sps:$4 sm:$0xff]   ;;  %v9941_v50 = vld [vmem:[#allocation4 + $0xc8] ss:$16 sps:$4 sm:$0xff]  }
  0x35   :  { %306 = vmatprep.subr.bf16.mxu1 %v9895_v16  ;;  %683 = vmatprep.subr.bf16.mxu0 %v10875_v18  ;;  %v10896_v33 = vld [vmem:[#allocation6 + $0xe0] ss:$16 sps:$4 sm:$0xff]   ;;  %v9946_v51 = vld [vmem:[#allocation4 + $0xec] ss:$16 sps:$4 sm:$0xff]   ;;  %v9944_v52 = vld [vmem:[#allocation4 + $0xe8] ss:$16 sps:$4 sm:$0xff]  }
  0x36   :  { %v10902_v34 = vld [vmem:[%s12690_s0] sm:$0xff]   ;;  %v9933_v44 = vld [vmem:[%s12690_s0 + $0x10] sm:$0xff]   ;;  %v10932_v53 = vld [vmem:[#allocation6 + $0xc] ss:$16 sps:$4 sm:$0xff]  }
  0x37   :  { %v10936_v54 = vld [vmem:[#allocation6 + $0x8] ss:$16 sps:$4 sm:$0xff]   ;;  %v10939_v55 = vld [vmem:[#allocation6 + $0x2c] ss:$16 sps:$4 sm:$0xff]   ;;  %v92_v9 = vld [vmem:[%s12693_s3] sm:$0xf] }
  0x38   :  { %307 = vmatpush1.bf16.msra.mxu1 %v9897_v19  ;;  %684 = vmatpush1.bf16.msra.mxu0 %v10878_v21  ;;  %v10943_v56 = vld [vmem:[#allocation6 + $0x28] ss:$16 sps:$4 sm:$0xff]   ;;  %v10947_v57 = vld [vmem:[#allocation6 + $0x4c] ss:$16 sps:$4 sm:$0xff]  }
  0x39   :  { %308 = vmatprep.subr.bf16.mxu1 %v9901_v20  ;;  %685 = vmatprep.subr.bf16.mxu0 %v10881_v22  ;;  %v10953_v58 = vld [vmem:[#allocation6 + $0x48] ss:$16 sps:$4 sm:$0xff]   ;;  %v10955_v59 = vld [vmem:[#allocation6 + $0x6c] ss:$16 sps:$4 sm:$0xff]  }
  0x3a   :  { %v10959_v60 = vld [vmem:[#allocation6 + $0x68] ss:$16 sps:$4 sm:$0xff]   ;;  %v10961_v61 = vld [vmem:[#allocation6 + $0x8c] ss:$16 sps:$4 sm:$0xff]  }
  0x3b   :  { %v10966_v62 = vld [vmem:[#allocation6 + $0x88] ss:$16 sps:$4 sm:$0xff]   ;;  %v10968_v63 = vld [vmem:[#allocation6 + $0xac] ss:$16 sps:$4 sm:$0xff]  }
  0x3c   :  { %309 = vmatpush1.bf16.msra.mxu1 %v9903_v23  ;;  %686 = vmatpush1.bf16.msra.mxu0 %v10884_v25  ;;  %v10972_v1 = vld [vmem:[#allocation6 + $0xa8] ss:$16 sps:$4 sm:$0xff]   ;;  %v10974_v2 = vld [vmem:[#allocation6 + $0xcc] ss:$16 sps:$4 sm:$0xff]  }
  0x3d   :  { %310 = vmatprep.subr.bf16.mxu1 %v9907_v24  ;;  %687 = vmatprep.subr.bf16.mxu0 %v10887_v26  ;;  %v10985_v5 = vld [vmem:[#allocation6 + $0xe8] ss:$16 sps:$4 sm:$0xff]  }
  0x40   :  { %311 = vmatpush1.bf16.msra.mxu1 %v9909_v27  ;;  %688 = vmatpush1.bf16.msra.mxu0 %v10890_v29 }
  0x41   :  { %312 = vmatprep.subr.bf16.mxu1 %v9913_v28  ;;  %689 = vmatprep.subr.bf16.mxu0 %v10893_v30 }
  0x44   :  { %313 = vmatpush1.bf16.msra.mxu1 %v9915_v31  ;;  %690 = vmatpush1.bf16.msra.mxu0 %v10896_v33 }
  0x45   :  { %371 = vmatprep.subr.bf16.mxu1 %v9922_v32  ;;  %986 = vmatprep.subr.bf16.mxu0 %v10852_v3 }
  0x47   :  { %331 = vmatmul.mubr.bf16.vlgmr.msra.gmra.mrb[0].mxu1 %v10902_v34  ;;  %708 = vmatmul.mubr.bf16.vlgmr.msra.gmra.mrb[0].mxu0 %v12697_v0 }
  0x48   :  { %372 = vmatpush1.bf16.msra.mxu1 %v9920_v35  ;;  %340 = vmatprep.mubr.bf16.mxu1 %v12697_v0 }
  0x49   :  { %373 = vmatprep.subr.bf16.mxu1 %v9925_v36  ;;  %987 = vmatpush1.bf16.msra.mxu0 %v10854_v4  ;;  %v10981_v4 = vld [vmem:[#allocation6 + $0xec] ss:$16 sps:$4 sm:$0xff]  }
  0x4a   :  { %1018 = vmatprep.mubr.bf16.mxu0 %v12697_v0  ;;  %988 = vmatprep.subr.bf16.mxu0 %v10857_v7  ;;  %v95_v7 = vshrl.u32 %v94_v6, 7 }
  0x4c   :  { %374 = vmatpush1.bf16.msra.mxu1 %v9923_v37  ;;  %v11015_v10 = vsub.s32 1, %v95_v7 }
  0x4d   :  { %375 = vmatprep.subr.bf16.mxu1 %v9929_v38  ;;  %989 = vmatpush1.bf16.msra.mxu0 %v10860_v8  ;;  %v11010_v8 = vsub.s32 0, %v95_v7 }
  0x4e   :  { %990 = vmatprep.subr.bf16.mxu0 %v10863_v11  ;;  %12711 = vst [vmem:[#allocation11_spill] sm:$0xff] %v11015_v10  ;;  %v101_v12 = vrot.slane %v92_v9, %v11015_v10 }
  0x4f   :  { %341 = vmatmul.mubr.bf16.gmra.mrb[4].mxu1 %v9926_v39  ;;  %12710 = vst [vmem:[#allocation10_spill] sm:$0xff] %v11010_v8  ;;  %v97_v11 = vrot.slane %v92_v9, %v11010_v8 }
  0x50   :  { %376 = vmatpush1.bf16.msra.mxu1 %v9927_v40  ;;  %350 = vmatprep.mubr.bf16.mxu1 %v12697_v0 }
  0x51   :  { %377 = vmatprep.subr.bf16.mxu1 %v9932_v41  ;;  %991 = vmatpush1.bf16.msra.mxu0 %v10866_v13 }
  0x52   :  { %992 = vmatprep.subr.bf16.mxu0 %v10869_v14 }
  0x54   :  { %378 = vmatpush1.bf16.msra.mxu1 %v9930_v42 }
  0x55   :  { %379 = vmatprep.subr.bf16.mxu1 %v9936_v43  ;;  %993 = vmatpush1.bf16.msra.mxu0 %v10872_v17 }
  0x56   :  { %994 = vmatprep.subr.bf16.mxu0 %v10875_v18 }
  0x57   :  { %351 = vmatmul.mubr.bf16.gmra.mrb[8].mxu1 %v9933_v44 }
  0x58   :  { %380 = vmatpush1.bf16.msra.mxu1 %v9934_v45  ;;  %360 = vmatprep.mubr.bf16.mxu1 %v12697_v0 }
  0x59   :  { %381 = vmatprep.subr.bf16.mxu1 %v9939_v46  ;;  %995 = vmatpush1.bf16.msra.mxu0 %v10878_v21 }
  0x5a   :  { %996 = vmatprep.subr.bf16.mxu0 %v10881_v22 }
  0x5c   :  { %382 = vmatpush1.bf16.msra.mxu1 %v9937_v47 }
  0x5d   :  { %383 = vmatprep.subr.bf16.mxu1 %v9943_v48  ;;  %997 = vmatpush1.bf16.msra.mxu0 %v10884_v25 }
  0x5e   :  { %998 = vmatprep.subr.bf16.mxu0 %v10887_v26 }
  0x5f   :  { %361 = vmatmul.mubr.bf16.gmra.mrb[12].mxu1 %v9940_v49 }
  0x60   :  { %384 = vmatpush1.bf16.msra.mxu1 %v9941_v50  ;;  %403 = vmatprep.mubr.bf16.mxu1 %v12697_v0 }
  0x61   :  { %385 = vmatprep.subr.bf16.mxu1 %v9946_v51  ;;  %999 = vmatpush1.bf16.msra.mxu0 %v10890_v29  ;;  %v11047_v51 = vsub.s32 2, %v95_v7 }
  0x62   :  { %1000 = vmatprep.subr.bf16.mxu0 %v10893_v30 }
  0x63   :  { %12715 = vst [vmem:[#allocation15_spill] sm:$0xff] %v11047_v51 }
  0x64   :  { %386 = vmatpush1.bf16.msra.mxu1 %v9944_v52  ;;  %v11049_v52 = vsub.s32 3, %v95_v7 }
  0x65   :  { %716 = vmatprep.subr.bf16.mxu1 %v10932_v53  ;;  %1001 = vmatpush1.bf16.msra.mxu0 %v10896_v33 }
  0x66   :  { %1298 = vmatprep.subr.bf16.mxu0 %v10852_v3  ;;  %v10979_v3 = vld [vmem:[#allocation6 + $0xc8] ss:$16 sps:$4 sm:$0xff]   ;;  %12716 = vst [vmem:[#allocation16_spill] sm:$0xff] %v11049_v52 }
  0x67   :  { %404 = vmatmul.mubr.bf16.vlgmr.msra.gmra.mrb[16].mxu1 %v10902_v34 }
  0x68   :  { %717 = vmatpush1.bf16.msra.mxu1 %v10936_v54  ;;  %413 = vmatprep.mubr.bf16.mxu1 %v12697_v0 }
  0x69   :  { %718 = vmatprep.subr.bf16.mxu1 %v10939_v55 }
  0x6c   :  { %719 = vmatpush1.bf16.msra.mxu1 %v10943_v56 }
  0x6d   :  { %720 = vmatprep.subr.bf16.mxu1 %v10947_v57 }
  0x6f   :  { %414 = vmatmul.mubr.bf16.gmra.mrb[20].mxu1 %v9926_v39 }
  0x70   :  { %721 = vmatpush1.bf16.msra.mxu1 %v10953_v58  ;;  %423 = vmatprep.mubr.bf16.mxu1 %v12697_v0 }
  0x71   :  { %722 = vmatprep.subr.bf16.mxu1 %v10955_v59 }
  0x74   :  { %723 = vmatpush1.bf16.msra.mxu1 %v10959_v60 }
  0x75   :  { %724 = vmatprep.subr.bf16.mxu1 %v10961_v61 }
  0x77   :  { %424 = vmatmul.mubr.bf16.gmra.mrb[24].mxu1 %v9933_v44 }
  0x78   :  { %725 = vmatpush1.bf16.msra.mxu1 %v10966_v62  ;;  %433 = vmatprep.mubr.bf16.mxu1 %v12697_v0 }
  0x79   :  { %726 = vmatprep.subr.bf16.mxu1 %v10968_v63 }
  0x7c   :  { %727 = vmatpush1.bf16.msra.mxu1 %v10972_v1 }
  0x7d   :  { %728 = vmatprep.subr.bf16.mxu1 %v10974_v2 }
  0x7f   :  { %434 = vmatmul.mubr.bf16.gmra.mrb[28].mxu1 %v9940_v49 }
  0x80   :  { %729 = vmatpush1.bf16.msra.mxu1 %v10979_v3  ;;  %748 = vmatprep.mubr.bf16.mxu1 %v12697_v0 }
  0x81   :  { %730 = vmatprep.subr.bf16.mxu1 %v10981_v4 }
  0x84   :  { %731 = vmatpush1.bf16.msra.mxu1 %v10985_v5 }
  0x85   :  { %1027 = vmatprep.subr.bf16.mxu1 %v10932_v53 }
  0x87   :  { %749 = vmatmul.mubr.bf16.vlgmr.msra.gmra.mrb[32].mxu1 %v12697_v0 }
  0x88   :  { %1028 = vmatpush1.bf16.msra.mxu1 %v10936_v54  ;;  %1059 = vmatprep.mubr.bf16.mxu1 %v12697_v0 }
  0x89   :  { %1029 = vmatprep.subr.bf16.mxu1 %v10939_v55 }
  0x8c   :  { %1030 = vmatpush1.bf16.msra.mxu1 %v10943_v56 }
  0x8d   :  { %1031 = vmatprep.subr.bf16.mxu1 %v10947_v57 }
  0x90   :  { %1032 = vmatpush1.bf16.msra.mxu1 %v10953_v58 }
  0x91   :  { %1033 = vmatprep.subr.bf16.mxu1 %v10955_v59 }
  0x94   :  { %1034 = vmatpush1.bf16.msra.mxu1 %v10959_v60 }
  0x95   :  { %1035 = vmatprep.subr.bf16.mxu1 %v10961_v61 }
  0x98   :  { %1036 = vmatpush1.bf16.msra.mxu1 %v10966_v62 }
  0x99   :  { %1037 = vmatprep.subr.bf16.mxu1 %v10968_v63 }
  0x9c   :  { %1038 = vmatpush1.bf16.msra.mxu1 %v10972_v1 }
  0x9d   :  { %1039 = vmatprep.subr.bf16.mxu1 %v10974_v2 }
  0xa0   :  { %1040 = vmatpush1.bf16.msra.mxu1 %v10979_v3 }
  0xa1   :  { %1041 = vmatprep.subr.bf16.mxu1 %v10981_v4 }
  0xa4   :  { %1042 = vmatpush1.bf16.msra.mxu1 %v10985_v5 }
  0xa5   :  { %1339 = vmatprep.subr.bf16.mxu1 %v10932_v53 }
 0x11a   :  { %v332_v13 = vpop.f32.mrb[0].mxu1  ;;  %v709_v18 = vpop.f32.mrb[0].mxu0 }
 0x11b   :  { %v333_v14 = vadd.f32 %v332_v13, %v97_v11  ;;  %v334_v15 = vpop.f32.mrb[1].mxu1  ;;  %v711_v22 = vpop.f32.mrb[1].mxu0  ;;  %v105_v13 = vrot.slane %v92_v9, %v11047_v51 }
 0x11c   :  { %v335_v16 = vadd.f32 %v334_v15, %v101_v12  ;;  %v336_v17 = vpop.f32.mrb[2].mxu1  ;;  %v713_v25 = vpop.f32.mrb[2].mxu0  ;;  %v109_v15 = vrot.slane %v92_v9, %v11049_v52 }
 0x11d   :  { %v11019_v19 = vadd.f32 %v336_v17, %v97_v11  ;;  %v757_v20 = vadd.f32 %v709_v18, %v333_v14  ;;  %v338_v21 = vpop.f32.mrb[3].mxu1  ;;  %v714_v26 = vpop.f32.mrb[3].mxu0 }
 0x11e   :  { %v11021_v23 = vadd.f32 %v338_v21, %v101_v12  ;;  %v758_v24 = vadd.f32 %v711_v22, %v335_v16 }
 0x11f   :  { %v8947_v9 = vmul.f32 -1.442695, %v757_v20 }
 0x122   :  { %v342_v27 = vpop.f32.mrb[4].mxu1 }
 0x123   :  { %v11023_v28 = vadd.f32 %v342_v27, %v97_v11  ;;  %v344_v29 = vpop.f32.mrb[5].mxu1 }
 0x124   :  { %v11025_v30 = vadd.f32 %v344_v29, %v101_v12  ;;  %v346_v31 = vpop.f32.mrb[6].mxu1  ;;  %v8948_v29 = vmul.f32 -1.442695, %v758_v24 }
 0x125   :  { %v11027_v32 = vadd.f32 %v346_v31, %v97_v11  ;;  %v348_v33 = vpop.f32.mrb[7].mxu1 }
 0x126   :  { %v11029_v34 = vadd.f32 %v348_v33, %v101_v12  ;;  %10339 = vpow2.f32 %v8948_v29 }
 0x127   :  { %10341 = vpow2.f32 %v8947_v9 }
 0x12a   :  { %v352_v35 = vpop.f32.mrb[8].mxu1 }
 0x12b   :  { %v11031_v36 = vadd.f32 %v352_v35, %v97_v11  ;;  %v354_v37 = vpop.f32.mrb[9].mxu1 }
 0x12c   :  { %v11033_v38 = vadd.f32 %v354_v37, %v101_v12  ;;  %v356_v39 = vpop.f32.mrb[10].mxu1 }
 0x12d   :  { %v11035_v40 = vadd.f32 %v356_v39, %v97_v11  ;;  %v358_v41 = vpop.f32.mrb[11].mxu1 }
 0x12e   :  { %v11037_v42 = vadd.f32 %v358_v41, %v101_v12 }
 0x132   :  { %v362_v43 = vpop.f32.mrb[12].mxu1 }
 0x133   :  { %v11039_v44 = vadd.f32 %v362_v43, %v97_v11  ;;  %v364_v45 = vpop.f32.mrb[13].mxu1 }
 0x134   :  { %v11041_v46 = vadd.f32 %v364_v45, %v101_v12  ;;  %v366_v47 = vpop.f32.mrb[14].mxu1 }
 0x135   :  { %v11043_v48 = vadd.f32 %v366_v47, %v97_v11  ;;  %v368_v49 = vpop.f32.mrb[15].mxu1 }
 0x136   :  { %12712 = vst [vmem:[#allocation12_spill] sm:$0xff] %v11041_v46  ;;  %v11045_v50 = vadd.f32 %v368_v49, %v101_v12 }
 0x137   :  { %12713 = vst [vmem:[#allocation13_spill] sm:$0xff] %v11043_v48 }
 0x138   :  { %12714 = vst [vmem:[#allocation14_spill] sm:$0xff] %v11045_v50 }
 0x13a   :  { %v405_v6 = vpop.f32.mrb[16].mxu1 }
 0x13b   :  { %v407_v14 = vpop.f32.mrb[17].mxu1 }
 0x13c   :  { %v409_v16 = vpop.f32.mrb[18].mxu1 }
 0x13d   :  { %v11053_v17 = vadd.f32 %v409_v16, %v105_v13  ;;  %v411_v18 = vpop.f32.mrb[19].mxu1 }
 0x13e   :  { %v11055_v21 = vadd.f32 %v411_v18, %v109_v15  ;;  %v10340_v18 = vpop.eup %10339 }
 0x13f   :  { %v768_v9 = vadd.f32 1.0, %v10340_v18 }
 0x141   :  { %10343 = vrcp.f32 %v768_v9  ;;  %v10728_v9 = vld [vmem:[#allocation6 + $0x64] ss:$16 sps:$4 sm:$0xff]  }
 0x142   :  { %v415_v11 = vpop.f32.mrb[20].mxu1 }
 0x143   :  { %v11057_v22 = vadd.f32 %v415_v11, %v105_v13  ;;  %v417_v12 = vpop.f32.mrb[21].mxu1 }
 0x144   :  { %v11059_v25 = vadd.f32 %v417_v12, %v109_v15  ;;  %v419_v7 = vpop.f32.mrb[22].mxu1  ;;  %v10342_v12 = vpop.eup %10341 }
 0x145   :  { %v11061_v26 = vadd.f32 %v419_v7, %v105_v13  ;;  %v421_v27 = vpop.f32.mrb[23].mxu1 }
 0x146   :  { %v11063_v31 = vadd.f32 %v421_v27, %v109_v15 }
 0x14a   :  { %v425_v33 = vpop.f32.mrb[24].mxu1 }
 0x14b   :  { %v11065_v35 = vadd.f32 %v425_v33, %v105_v13  ;;  %v427_v37 = vpop.f32.mrb[25].mxu1  ;;  %v767_v33 = vadd.f32 1.0, %v10342_v12 }
 0x14c   :  { %v11067_v39 = vadd.f32 %v427_v37, %v109_v15  ;;  %v429_v41 = vpop.f32.mrb[26].mxu1  ;;  %v406_v37 = vadd.f32 %v405_v6, %v105_v13 }
 0x14d   :  { %v11069_v43 = vadd.f32 %v429_v41, %v105_v13  ;;  %v431_v45 = vpop.f32.mrb[27].mxu1  ;;  %v408_v41 = vadd.f32 %v407_v14, %v109_v15  ;;  %10345 = vrcp.f32 %v767_v33  ;;  %v10729_v33 = vld [vmem:[#allocation6 + $0x60] ss:$16 sps:$4 sm:$0xff]  }
 0x14e   :  { %v11071_v47 = vadd.f32 %v431_v45, %v109_v15 }
 0x152   :  { %v435_v49 = vpop.f32.mrb[28].mxu1 }
 0x153   :  { %v11073_v16 = vadd.f32 %v435_v49, %v105_v13  ;;  %v437_v24 = vpop.f32.mrb[29].mxu1 }
 0x154   :  { %v11075_v20 = vadd.f32 %v437_v24, %v109_v15  ;;  %v439_v11 = vpop.f32.mrb[30].mxu1 }
 0x155   :  { %12717 = vst [vmem:[#allocation17_spill] sm:$0xff] %v11073_v16  ;;  %v11077_v7 = vadd.f32 %v439_v11, %v105_v13  ;;  %v441_v27 = vpop.f32.mrb[31].mxu1  ;;  %v10344_v11 = vpop.eup %10343 }
 0x156   :  { %12718 = vst [vmem:[#allocation18_spill] sm:$0xff] %v11075_v20  ;;  %v11079_v29 = vadd.f32 %v441_v27, %v109_v15  ;;  %v780_v27 = vmul.f32 0.0, %v10344_v11  ;;  %v10735_v11 = vld [vmem:[#allocation6 + $0xc0] ss:$16 sps:$4 sm:$0xff]  }
 0x157   :  { %12719 = vst [vmem:[#allocation19_spill] sm:$0xff] %v11077_v7  ;;  %v10346_v8 = vpop.eup %10345 }
 0x158   :  { %12720 = vst [vmem:[#allocation20_spill] sm:$0xff] %v11079_v29 }
 0x15a   :  { %v750_v45 = vpop.f32.mrb[32].mxu1 }
 0x15b   :  { %v759_v0 = vadd.f32 %v750_v45, %v406_v37  ;;  %v752_v49 = vpop.f32.mrb[33].mxu1  ;;  %v10730_v37 = vld [vmem:[#allocation6 + $0x84] ss:$16 sps:$4 sm:$0xff]  }
 0x15c   :  { %v760_v52 = vadd.f32 %v752_v49, %v408_v41  ;;  %v754_v10 = vpop.f32.mrb[34].mxu1  ;;  %v10731_v41 = vld [vmem:[#allocation6 + $0x80] ss:$16 sps:$4 sm:$0xff]   ;;  %v10732_v45 = vld [vmem:[#allocation6 + $0xa4] ss:$16 sps:$4 sm:$0xff]  }
 0x15d   :  { %10347 = vtanh.f32 %v759_v0  ;;  %v755_v24 = vpop.f32.mrb[35].mxu1  ;;  %v10723_v10 = vld [vmem:[#allocation6] ss:$16 sps:$4 sm:$0xff]  }
 0x15e   :  { %v8949_v51 = vmul.f32 -1.442695, %v760_v52  ;;  %v10726_v52 = vld [vmem:[#allocation6 + $0x44] ss:$16 sps:$4 sm:$0xff]   ;;  %v10733_v49 = vld [vmem:[#allocation6 + $0xa0] ss:$16 sps:$4 sm:$0xff]  }
 0x15f   :  { %v10734_v24 = vld [vmem:[#allocation6 + $0xc4] ss:$16 sps:$4 sm:$0xff]  }
 0x160   :  { %10349 = vpow2.f32 %v8949_v51  ;;  %v10725_v51 = vld [vmem:[#allocation6 + $0x20] ss:$16 sps:$4 sm:$0xff]  }
 0x167   :  { %v10348_v50 = vpop.eup %10347 }
 0x168   :  { %v781_v29 = vmul.f32 %v10348_v50, %v10346_v8  ;;  %v10724_v8 = vld [vmem:[#allocation6 + $0x24] ss:$16 sps:$4 sm:$0xff]   ;;  %v12722_v50 = vmov 0  }
 0x16a   :  { %v10350_v18 = vpop.eup %10349  ;;  %v11081_v12 = vadd.f32 %v781_v29, %v780_v27  ;;  %v10727_v29 = vld [vmem:[#allocation6 + $0x40] ss:$16 sps:$4 sm:$0xff]   ;;  %v10736_v27 = vld [vmem:[#allocation6 + $0xe4] ss:$16 sps:$4 sm:$0xff]  }
 0x16b   :  { %v777_v6 = vadd.f32 1.0, %v10350_v18  ;;  %v10737_v18 = vld [vmem:[#allocation6 + $0xe0] ss:$16 sps:$4 sm:$0xff]  }
 0x16c   :  { %10351 = vtanh.f32 %v11081_v12 }
 0x16d   :  { %10353 = vrcp.f32 %v777_v6 }
 0x176   :  { %v10352_v13 = vpop.eup %10351 }
 0x177   :  { %v10354_v14 = vpop.eup %10353 }
 0x178   :  { %v11084_v15 = vmul.f32 %v10354_v14, %v10352_v13 }
 0x17a   :  { %12721 = vst [vmem:[#allocation21_spill] sm:$0xff] %v11084_v15  ;;  %v793_v0 = vpack.c.bf16 %v11084_v15, %v11084_v15 }
 0x17c   :  { %1019 = vmatmul.mubr.bf16.vlgmr.msra.gmra.mrb[4].mxu0 %v793_v0  ;;  %1060 = vmatmul.mubr.bf16.vlgmr.msra.gmra.mrb[36].mxu1 %v793_v0 }
 0x17d   :  { %1299 = vmatpush1.bf16.msra.mxu0 %v10723_v10  ;;  %1340 = vmatpush1.bf16.msra.mxu1 %v10936_v54 }
 0x17e   :  { %1300 = vmatprep.subr.bf16.mxu0 %v10724_v8  ;;  %1341 = vmatprep.subr.bf16.mxu1 %v10939_v55 }
 0x17f   :  { %1330 = vmatprep.mubr.bf16.mxu0 %v12722_v50  ;;  %1371 = vmatprep.mubr.bf16.mxu1 %v12722_v50 }
 0x181   :  { %1301 = vmatpush1.bf16.msra.mxu0 %v10725_v51  ;;  %1342 = vmatpush1.bf16.msra.mxu1 %v10943_v56 }
 0x182   :  { %1302 = vmatprep.subr.bf16.mxu0 %v10726_v52  ;;  %1343 = vmatprep.subr.bf16.mxu1 %v10947_v57 }
 0x185   :  { %1303 = vmatpush1.bf16.msra.mxu0 %v10727_v29  ;;  %1344 = vmatpush1.bf16.msra.mxu1 %v10953_v58 }
 0x186   :  { %1304 = vmatprep.subr.bf16.mxu0 %v10728_v9  ;;  %1345 = vmatprep.subr.bf16.mxu1 %v10955_v59 }
 0x189   :  { %1305 = vmatpush1.bf16.msra.mxu0 %v10729_v33  ;;  %1346 = vmatpush1.bf16.msra.mxu1 %v10959_v60 }
 0x18a   :  { %1306 = vmatprep.subr.bf16.mxu0 %v10730_v37  ;;  %1347 = vmatprep.subr.bf16.mxu1 %v10961_v61 }
 0x18d   :  { %1307 = vmatpush1.bf16.msra.mxu0 %v10731_v41  ;;  %1348 = vmatpush1.bf16.msra.mxu1 %v10966_v62 }
 0x18e   :  { %1308 = vmatprep.subr.bf16.mxu0 %v10732_v45  ;;  %1349 = vmatprep.subr.bf16.mxu1 %v10968_v63 }
 0x191   :  { %1309 = vmatpush1.bf16.msra.mxu0 %v10733_v49  ;;  %1350 = vmatpush1.bf16.msra.mxu1 %v10972_v1 }
 0x192   :  { %1310 = vmatprep.subr.bf16.mxu0 %v10734_v24  ;;  %1351 = vmatprep.subr.bf16.mxu1 %v10974_v2 }
 0x195   :  { %1311 = vmatpush1.bf16.msra.mxu0 %v10735_v11  ;;  %1352 = vmatpush1.bf16.msra.mxu1 %v10979_v3 }
 0x196   :  { %1312 = vmatprep.subr.bf16.mxu0 %v10736_v27  ;;  %1353 = vmatprep.subr.bf16.mxu1 %v10981_v4 }
 0x199   :  { %1313 = vmatpush1.bf16.msra.mxu0 %v10737_v18  ;;  %1354 = vmatpush1.bf16.msra.mxu1 %v10985_v5 }
 0x19a   :  { %1651 = vmatprep.subr.bf16.mxu1 %v10932_v53 }
 0x24f   :  { %v1020_v6 = vpop.f32.mrb[4].mxu0  ;;  %v1061_v13 = vpop.f32.mrb[36].mxu1 }
 0x250   :  { %v1068_v14 = vadd.f32 %v1020_v6, %v11019_v19  ;;  %v1070_v0 = vadd.f32 %v1061_v13, %v11053_v17  ;;  %v1022_v10 = vpop.f32.mrb[5].mxu0  ;;  %v1063_v8 = vpop.f32.mrb[37].mxu1 }
 0x251   :  { %v1069_v51 = vadd.f32 %v1022_v10, %v11021_v23  ;;  %v1071_v52 = vadd.f32 %v1063_v8, %v11055_v21  ;;  %v1024_v29 = vpop.f32.mrb[6].mxu0  ;;  %v1065_v9 = vpop.f32.mrb[38].mxu1 }
 0x252   :  { %v8982_v33 = vmul.f32 -1.442695, %v1068_v14  ;;  %v1025_v37 = vpop.f32.mrb[7].mxu0  ;;  %v1066_v41 = vpop.f32.mrb[39].mxu1 }
 0x253   :  { %v8983_v45 = vmul.f32 -1.442695, %v1069_v51  ;;  %v8984_v53 = vmul.f32 -1.442695, %v1071_v52 }
 0x254   :  { %10355 = vpow2.f32 %v8982_v33 }
 0x255   :  { %10357 = vpow2.f32 %v8983_v45 }
 0x256   :  { %10359 = vpow2.f32 %v8984_v53 }
 0x257   :  { %10361 = vtanh.f32 %v1070_v0 }
 0x25e   :  { %v10356_v49 = vpop.eup %10355 }
 0x25f   :  { %v10358_v24 = vpop.eup %10357  ;;  %v1078_v19 = vadd.f32 1.0, %v10356_v49 }
 0x260   :  { %v1079_v17 = vadd.f32 1.0, %v10358_v24  ;;  %v10360_v23 = vpop.eup %10359 }
 0x261   :  { %10363 = vrcp.f32 %v1078_v19  ;;  %v10362_v11 = vpop.eup %10361  ;;  %v1088_v6 = vadd.f32 1.0, %v10360_v23 }
 0x262   :  { %10365 = vrcp.f32 %v1079_v17 }
 0x263   :  { %10367 = vrcp.f32 %v1088_v6 }
 0x26b   :  { %v10364_v21 = vpop.eup %10363 }
 0x26c   :  { %v10366_v27 = vpop.eup %10365  ;;  %v1092_v18 = vmul.f32 %v10364_v21, %v10362_v11 }
 0x26d   :  { %v1091_v13 = vmul.f32 %v10366_v27, %v11081_v12  ;;  %v10368_v10 = vpop.eup %10367  ;;  %v11179_v12 = vld [vmem:[#allocation6 + $0xe0] ss:$16 sps:$4 sm:$0xff]  }
 0x26f   :  { %v11111_v14 = vadd.f32 %v1092_v18, %v1091_v13 }
 0x271   :  { %10369 = vtanh.f32 %v11111_v14 }
 0x27b   :  { %v10370_v8 = vpop.eup %10369 }
 0x27c   :  { %v11114_v51 = vmul.f32 %v10370_v8, %v10368_v10 }
 0x27e   :  { %12723 = vst [vmem:[#allocation22_spill] sm:$0xff] %v11114_v51  ;;  %v1105_v0 = vpack.c.bf16 %v11114_v51, %v11114_v51 }
 0x280   :  { %1331 = vmatmul.mubr.bf16.vlgmr.msra.gmra.mrb[8].mxu0 %v1105_v0  ;;  %1372 = vmatmul.mubr.bf16.vlgmr.msra.gmra.mrb[40].mxu1 %v1105_v0 }
 0x281   :  { %1652 = vmatpush1.bf16.msra.mxu1 %v10936_v54  ;;  %1642 = vmatprep.mubr.bf16.mxu0 %v12722_v50  ;;  %v11135_v54 = vld [vmem:[#allocation6 + $0x4] ss:$16 sps:$4 sm:$0xff]  }
 0x282   :  { %1653 = vmatprep.subr.bf16.mxu1 %v10939_v55  ;;  %1683 = vmatprep.mubr.bf16.mxu1 %v12722_v50  ;;  %v11137_v55 = vld [vmem:[#allocation6] ss:$16 sps:$4 sm:$0xff]  }
 0x283   :  { %1610 = vmatprep.subr.bf16.mxu0 %v11135_v54 }
 0x284   :  { %1611 = vmatpush1.bf16.msra.mxu0 %v11137_v55 }
 0x285   :  { %1654 = vmatpush1.bf16.msra.mxu1 %v10943_v56  ;;  %v11141_v56 = vld [vmem:[#allocation6 + $0x24] ss:$16 sps:$4 sm:$0xff]  }
 0x286   :  { %1655 = vmatprep.subr.bf16.mxu1 %v10947_v57  ;;  %v11143_v57 = vld [vmem:[#allocation6 + $0x20] ss:$16 sps:$4 sm:$0xff]   ;;  %1612 = vmatprep.subr.bf16.mxu0 %v11141_v56 }
 0x288   :  { %1613 = vmatpush1.bf16.msra.mxu0 %v11143_v57 }
 0x289   :  { %1656 = vmatpush1.bf16.msra.mxu1 %v10953_v58  ;;  %v11147_v58 = vld [vmem:[#allocation6 + $0x44] ss:$16 sps:$4 sm:$0xff]  }
 0x28a   :  { %1657 = vmatprep.subr.bf16.mxu1 %v10955_v59  ;;  %v11149_v59 = vld [vmem:[#allocation6 + $0x40] ss:$16 sps:$4 sm:$0xff]   ;;  %1614 = vmatprep.subr.bf16.mxu0 %v11147_v58 }
 0x28c   :  { %1615 = vmatpush1.bf16.msra.mxu0 %v11149_v59 }
 0x28d   :  { %1658 = vmatpush1.bf16.msra.mxu1 %v10959_v60  ;;  %v11153_v60 = vld [vmem:[#allocation6 + $0x64] ss:$16 sps:$4 sm:$0xff]  }
 0x28e   :  { %1659 = vmatprep.subr.bf16.mxu1 %v10961_v61  ;;  %v11155_v61 = vld [vmem:[#allocation6 + $0x60] ss:$16 sps:$4 sm:$0xff]   ;;  %1616 = vmatprep.subr.bf16.mxu0 %v11153_v60 }
 0x290   :  { %1617 = vmatpush1.bf16.msra.mxu0 %v11155_v61 }
 0x291   :  { %1660 = vmatpush1.bf16.msra.mxu1 %v10966_v62  ;;  %v11159_v62 = vld [vmem:[#allocation6 + $0x84] ss:$16 sps:$4 sm:$0xff]  }
 0x292   :  { %1661 = vmatprep.subr.bf16.mxu1 %v10968_v63  ;;  %v11161_v63 = vld [vmem:[#allocation6 + $0x80] ss:$16 sps:$4 sm:$0xff]   ;;  %1618 = vmatprep.subr.bf16.mxu0 %v11159_v62 }
 0x294   :  { %1619 = vmatpush1.bf16.msra.mxu0 %v11161_v63 }
 0x295   :  { %1662 = vmatpush1.bf16.msra.mxu1 %v10972_v1  ;;  %v11164_v1 = vld [vmem:[#allocation6 + $0xa4] ss:$16 sps:$4 sm:$0xff]  }
 0x296   :  { %1663 = vmatprep.subr.bf16.mxu1 %v10974_v2  ;;  %v11167_v2 = vld [vmem:[#allocation6 + $0xa0] ss:$16 sps:$4 sm:$0xff]   ;;  %1620 = vmatprep.subr.bf16.mxu0 %v11164_v1 }
 0x298   :  { %1621 = vmatpush1.bf16.msra.mxu0 %v11167_v2 }
 0x299   :  { %1664 = vmatpush1.bf16.msra.mxu1 %v10979_v3  ;;  %v11170_v3 = vld [vmem:[#allocation6 + $0xc4] ss:$16 sps:$4 sm:$0xff]  }
 0x29a   :  { %1665 = vmatprep.subr.bf16.mxu1 %v10981_v4  ;;  %v11173_v4 = vld [vmem:[#allocation6 + $0xc0] ss:$16 sps:$4 sm:$0xff]   ;;  %1622 = vmatprep.subr.bf16.mxu0 %v11170_v3 }
 0x29c   :  { %1623 = vmatpush1.bf16.msra.mxu0 %v11173_v4 }
 0x29d   :  { %1666 = vmatpush1.bf16.msra.mxu1 %v10985_v5  ;;  %v11176_v5 = vld [vmem:[#allocation6 + $0xe4] ss:$16 sps:$4 sm:$0xff]  }
 0x29e   :  { %1624 = vmatprep.subr.bf16.mxu0 %v11176_v5 }
 0x2a0   :  { %1625 = vmatpush1.bf16.msra.mxu0 %v11179_v12 }
 0x2a1   :  { %1922 = vmatprep.subr.bf16.mxu0 %v11135_v54 }
 0x353   :  { %v1332_v52 = vpop.f32.mrb[8].mxu0  ;;  %v1373_v29 = vpop.f32.mrb[40].mxu1 }
 0x354   :  { %v1380_v9 = vadd.f32 %v1332_v52, %v11023_v28  ;;  %v1382_v33 = vadd.f32 %v1373_v29, %v11057_v22  ;;  %v1334_v37 = vpop.f32.mrb[9].mxu0  ;;  %v1375_v41 = vpop.f32.mrb[41].mxu1 }
 0x355   :  { %v1381_v45 = vadd.f32 %v1334_v37, %v11025_v30  ;;  %v1383_v53 = vadd.f32 %v1375_v41, %v11059_v25  ;;  %v1336_v49 = vpop.f32.mrb[10].mxu0  ;;  %v1377_v24 = vpop.f32.mrb[42].mxu1  ;;  %v11216_v41 = vld [vmem:[#allocation6 + $0x8] ss:$16 sps:$4 sm:$0xff]  }
 0x356   :  { %v9017_v19 = vmul.f32 -1.442695, %v1380_v9  ;;  %v1337_v17 = vpop.f32.mrb[11].mxu0  ;;  %v1378_v23 = vpop.f32.mrb[43].mxu1  ;;  %v11226_v49 = vld [vmem:[#allocation6 + $0x4c] ss:$16 sps:$4 sm:$0xff]  }
 0x357   :  { %v9018_v11 = vmul.f32 -1.442695, %v1381_v45  ;;  %v9019_v21 = vmul.f32 -1.442695, %v1383_v53  ;;  %v11220_v45 = vld [vmem:[#allocation6 + $0x2c] ss:$16 sps:$4 sm:$0xff]  }
 0x358   :  { %10371 = vpow2.f32 %v9017_v19  ;;  %v11222_v53 = vld [vmem:[#allocation6 + $0x28] ss:$16 sps:$4 sm:$0xff]   ;;  %v11232_v19 = vld [vmem:[#allocation6 + $0x6c] ss:$16 sps:$4 sm:$0xff]  }
 0x359   :  { %10373 = vpow2.f32 %v9018_v11  ;;  %v11228_v24 = vld [vmem:[#allocation6 + $0x48] ss:$16 sps:$4 sm:$0xff]   ;;  %v11238_v23 = vld [vmem:[#allocation6 + $0x8c] ss:$16 sps:$4 sm:$0xff]  }
 0x35a   :  { %10375 = vpow2.f32 %v9019_v21  ;;  %v11234_v17 = vld [vmem:[#allocation6 + $0x68] ss:$16 sps:$4 sm:$0xff]   ;;  %v11243_v21 = vld [vmem:[#allocation6 + $0xac] ss:$16 sps:$4 sm:$0xff]  }
 0x35b   :  { %10377 = vtanh.f32 %v1382_v33  ;;  %v11240_v11 = vld [vmem:[#allocation6 + $0x88] ss:$16 sps:$4 sm:$0xff]  }
 0x362   :  { %v10372_v27 = vpop.eup %10371 }
 0x363   :  { %v10374_v18 = vpop.eup %10373  ;;  %v1390_v28 = vadd.f32 1.0, %v10372_v27  ;;  %v11246_v27 = vld [vmem:[#allocation6 + $0xa8] ss:$16 sps:$4 sm:$0xff]  }
 0x364   :  { %v1391_v22 = vadd.f32 1.0, %v10374_v18  ;;  %v10376_v30 = vpop.eup %10375  ;;  %v11249_v18 = vld [vmem:[#allocation6 + $0xcc] ss:$16 sps:$4 sm:$0xff]  }
 0x365   :  { %10379 = vrcp.f32 %v1390_v28  ;;  %v10378_v6 = vpop.eup %10377  ;;  %v1400_v8 = vadd.f32 1.0, %v10376_v30  ;;  %v11252_v28 = vld [vmem:[#allocation6 + $0xc8] ss:$16 sps:$4 sm:$0xff]  }
 0x366   :  { %10381 = vrcp.f32 %v1391_v22  ;;  %v11255_v22 = vld [vmem:[#allocation6 + $0xec] ss:$16 sps:$4 sm:$0xff]   ;;  %v11258_v30 = vld [vmem:[#allocation6 + $0xe8] ss:$16 sps:$4 sm:$0xff]  }
 0x367   :  { %10383 = vrcp.f32 %v1400_v8 }
 0x36f   :  { %v10380_v25 = vpop.eup %10379 }
 0x370   :  { %v10382_v13 = vpop.eup %10381  ;;  %v1404_v10 = vmul.f32 %v10380_v25, %v10378_v6 }
 0x371   :  { %v1403_v0 = vmul.f32 %v10382_v13, %v11111_v14  ;;  %v10384_v29 = vpop.eup %10383  ;;  %v11214_v14 = vld [vmem:[#allocation6 + $0xc] ss:$16 sps:$4 sm:$0xff]  }
 0x372   :  { %1963 = vmatprep.subr.bf16.mxu1 %v11214_v14 }
 0x373   :  { %v11189_v52 = vadd.f32 %v1404_v10, %v1403_v0 }
 0x375   :  { %10385 = vtanh.f32 %v11189_v52 }
 0x37f   :  { %v10386_v9 = vpop.eup %10385 }
 0x380   :  { %v11192_v37 = vmul.f32 %v10386_v9, %v10384_v29 }
 0x382   :  { %12724 = vst [vmem:[#allocation23_spill] sm:$0xff] %v11192_v37  ;;  %v1417_v33 = vpack.c.bf16 %v11192_v37, %v11192_v37 }
 0x384   :  { %1643 = vmatmul.mubr.bf16.vlgmr.msra.gmra.mrb[12].mxu0 %v1417_v33  ;;  %1684 = vmatmul.mubr.bf16.vlgmr.msra.gmra.mrb[44].mxu1 %v1417_v33 }
 0x385   :  { %1923 = vmatpush1.bf16.msra.mxu0 %v11137_v55  ;;  %1954 = vmatprep.mubr.bf16.mxu0 %v12722_v50 }
 0x386   :  { %1924 = vmatprep.subr.bf16.mxu0 %v11141_v56  ;;  %1995 = vmatprep.mubr.bf16.mxu1 %v12722_v50 }
 0x387   :  { %1964 = vmatpush1.bf16.msra.mxu1 %v11216_v41 }
 0x388   :  { %1965 = vmatprep.subr.bf16.mxu1 %v11220_v45 }
 0x389   :  { %1925 = vmatpush1.bf16.msra.mxu0 %v11143_v57 }
 0x38a   :  { %1926 = vmatprep.subr.bf16.mxu0 %v11147_v58 }
 0x38b   :  { %1966 = vmatpush1.bf16.msra.mxu1 %v11222_v53 }
 0x38c   :  { %1967 = vmatprep.subr.bf16.mxu1 %v11226_v49 }
 0x38d   :  { %1927 = vmatpush1.bf16.msra.mxu0 %v11149_v59 }
 0x38e   :  { %1928 = vmatprep.subr.bf16.mxu0 %v11153_v60 }
 0x38f   :  { %1968 = vmatpush1.bf16.msra.mxu1 %v11228_v24 }
 0x390   :  { %1969 = vmatprep.subr.bf16.mxu1 %v11232_v19 }
 0x391   :  { %1929 = vmatpush1.bf16.msra.mxu0 %v11155_v61 }
 0x392   :  { %1930 = vmatprep.subr.bf16.mxu0 %v11159_v62 }
 0x393   :  { %1970 = vmatpush1.bf16.msra.mxu1 %v11234_v17 }
 0x394   :  { %1971 = vmatprep.subr.bf16.mxu1 %v11238_v23 }
 0x395   :  { %1931 = vmatpush1.bf16.msra.mxu0 %v11161_v63 }
 0x396   :  { %1932 = vmatprep.subr.bf16.mxu0 %v11164_v1 }
 0x397   :  { %1972 = vmatpush1.bf16.msra.mxu1 %v11240_v11 }
 0x398   :  { %1973 = vmatprep.subr.bf16.mxu1 %v11243_v21 }
 0x399   :  { %1933 = vmatpush1.bf16.msra.mxu0 %v11167_v2 }
 0x39a   :  { %1934 = vmatprep.subr.bf16.mxu0 %v11170_v3 }
 0x39b   :  { %1974 = vmatpush1.bf16.msra.mxu1 %v11246_v27 }
 0x39c   :  { %1975 = vmatprep.subr.bf16.mxu1 %v11249_v18 }
 0x39d   :  { %1935 = vmatpush1.bf16.msra.mxu0 %v11173_v4 }
 0x39e   :  { %1936 = vmatprep.subr.bf16.mxu0 %v11176_v5 }
 0x39f   :  { %1976 = vmatpush1.bf16.msra.mxu1 %v11252_v28 }
 0x3a0   :  { %1977 = vmatprep.subr.bf16.mxu1 %v11255_v22 }
 0x3a1   :  { %1937 = vmatpush1.bf16.msra.mxu0 %v11179_v12 }
 0x3a2   :  { %2234 = vmatprep.subr.bf16.mxu0 %v11135_v54 }
 0x3a3   :  { %1978 = vmatpush1.bf16.msra.mxu1 %v11258_v30 }
 0x3a4   :  { %2275 = vmatprep.subr.bf16.mxu1 %v11214_v14 }
 0x457   :  { %v1644_v6 = vpop.f32.mrb[12].mxu0  ;;  %v1685_v25 = vpop.f32.mrb[44].mxu1 }
 0x458   :  { %v1692_v13 = vadd.f32 %v1644_v6, %v11027_v32  ;;  %v1694_v10 = vadd.f32 %v1685_v25, %v11061_v26  ;;  %v1646_v8 = vpop.f32.mrb[13].mxu0  ;;  %v1687_v0 = vpop.f32.mrb[45].mxu1 }
 0x459   :  { %v1693_v29 = vadd.f32 %v1646_v8, %v11029_v34  ;;  %v1695_v9 = vadd.f32 %v1687_v0, %v11063_v31  ;;  %v1648_v33 = vpop.f32.mrb[14].mxu0  ;;  %v1689_v7 = vpop.f32.mrb[46].mxu1 }
 0x45a   :  { %v9052_v48 = vmul.f32 -1.442695, %v1692_v13  ;;  %v1649_v37 = vpop.f32.mrb[15].mxu0  ;;  %v1690_v51 = vpop.f32.mrb[47].mxu1 }
 0x45b   :  { %v9053_v15 = vmul.f32 -1.442695, %v1693_v29  ;;  %v9054_v20 = vmul.f32 -1.442695, %v1695_v9 }
 0x45c   :  { %10387 = vpow2.f32 %v9052_v48 }
 0x45d   :  { %10389 = vpow2.f32 %v9053_v15 }
 0x45e   :  { %10391 = vpow2.f32 %v9054_v20 }
 0x45f   :  { %10393 = vtanh.f32 %v1694_v10 }
 0x466   :  { %v10388_v46 = vpop.eup %10387 }
 0x467   :  { %v10390_v16 = vpop.eup %10389  ;;  %v1702_v32 = vadd.f32 1.0, %v10388_v46 }
 0x468   :  { %v1703_v26 = vadd.f32 1.0, %v10390_v16  ;;  %v10392_v34 = vpop.eup %10391 }
 0x469   :  { %10395 = vrcp.f32 %v1702_v32  ;;  %v10394_v6 = vpop.eup %10393  ;;  %v1712_v13 = vadd.f32 1.0, %v10392_v34 }
 0x46a   :  { %10397 = vrcp.f32 %v1703_v26 }
 0x46b   :  { %10399 = vrcp.f32 %v1712_v13 }
 0x473   :  { %v10396_v31 = vpop.eup %10395 }
 0x474   :  { %v10398_v25 = vpop.eup %10397  ;;  %v1716_v7 = vmul.f32 %v10396_v31, %v10394_v6 }
 0x475   :  { %v1715_v51 = vmul.f32 %v10398_v25, %v11189_v52  ;;  %v10400_v48 = vpop.eup %10399 }
 0x477   :  { %v11268_v37 = vadd.f32 %v1716_v7, %v1715_v51 }
 0x479   :  { %10401 = vtanh.f32 %v11268_v37 }
 0x483   :  { %v10402_v46 = vpop.eup %10401 }
 0x484   :  { %v11271_v20 = vmul.f32 %v10402_v46, %v10400_v48 }
 0x486   :  { %v1729_v16 = vpack.c.bf16 %v11271_v20, %v11271_v20 }
 0x488   :  { %1955 = vmatmul.mubr.bf16.vlgmr.msra.gmra.mrb[16].mxu0 %v1729_v16  ;;  %1996 = vmatmul.mubr.bf16.vlgmr.msra.gmra.mrb[48].mxu1 %v1729_v16 }
 0x489   :  { %2235 = vmatpush1.bf16.msra.mxu0 %v11137_v55  ;;  %2276 = vmatpush1.bf16.msra.mxu1 %v11216_v41 }
 0x48a   :  { %2236 = vmatprep.subr.bf16.mxu0 %v11141_v56  ;;  %2277 = vmatprep.subr.bf16.mxu1 %v11220_v45 }
 0x48b   :  { %2266 = vmatprep.mubr.bf16.mxu0 %v12722_v50  ;;  %2307 = vmatprep.mubr.bf16.mxu1 %v12722_v50 }
 0x48d   :  { %2237 = vmatpush1.bf16.msra.mxu0 %v11143_v57  ;;  %2278 = vmatpush1.bf16.msra.mxu1 %v11222_v53 }
 0x48e   :  { %2238 = vmatprep.subr.bf16.mxu0 %v11147_v58  ;;  %2279 = vmatprep.subr.bf16.mxu1 %v11226_v49 }
 0x491   :  { %2239 = vmatpush1.bf16.msra.mxu0 %v11149_v59  ;;  %2280 = vmatpush1.bf16.msra.mxu1 %v11228_v24 }
 0x492   :  { %2240 = vmatprep.subr.bf16.mxu0 %v11153_v60  ;;  %2281 = vmatprep.subr.bf16.mxu1 %v11232_v19 }
 0x495   :  { %2241 = vmatpush1.bf16.msra.mxu0 %v11155_v61  ;;  %2282 = vmatpush1.bf16.msra.mxu1 %v11234_v17 }
 0x496   :  { %2242 = vmatprep.subr.bf16.mxu0 %v11159_v62  ;;  %2283 = vmatprep.subr.bf16.mxu1 %v11238_v23 }
 0x499   :  { %2243 = vmatpush1.bf16.msra.mxu0 %v11161_v63  ;;  %2284 = vmatpush1.bf16.msra.mxu1 %v11240_v11 }
 0x49a   :  { %2244 = vmatprep.subr.bf16.mxu0 %v11164_v1  ;;  %2285 = vmatprep.subr.bf16.mxu1 %v11243_v21 }
 0x49d   :  { %2245 = vmatpush1.bf16.msra.mxu0 %v11167_v2  ;;  %2286 = vmatpush1.bf16.msra.mxu1 %v11246_v27 }
 0x49e   :  { %2246 = vmatprep.subr.bf16.mxu0 %v11170_v3  ;;  %2287 = vmatprep.subr.bf16.mxu1 %v11249_v18 }
 0x4a1   :  { %2247 = vmatpush1.bf16.msra.mxu0 %v11173_v4  ;;  %2288 = vmatpush1.bf16.msra.mxu1 %v11252_v28 }
 0x4a2   :  { %2248 = vmatprep.subr.bf16.mxu0 %v11176_v5  ;;  %2289 = vmatprep.subr.bf16.mxu1 %v11255_v22 }
 0x4a5   :  { %2249 = vmatpush1.bf16.msra.mxu0 %v11179_v12  ;;  %2290 = vmatpush1.bf16.msra.mxu1 %v11258_v30 }
 0x4a6   :  { %2546 = vmatprep.subr.bf16.mxu0 %v11135_v54  ;;  %2587 = vmatprep.subr.bf16.mxu1 %v11214_v14 }
 0x55b   :  { %v1956_v15 = vpop.f32.mrb[16].mxu0  ;;  %v1997_v52 = vpop.f32.mrb[48].mxu1 }
 0x55c   :  { %v2004_v10 = vadd.f32 %v1956_v15, %v11031_v36  ;;  %v2006_v8 = vadd.f32 %v1997_v52, %v11065_v35  ;;  %v1958_v0 = vpop.f32.mrb[17].mxu0  ;;  %v1999_v29 = vpop.f32.mrb[49].mxu1 }
 0x55d   :  { %v2005_v9 = vadd.f32 %v1958_v0, %v11033_v38  ;;  %v2007_v33 = vadd.f32 %v1999_v29, %v11067_v39  ;;  %v1960_v32 = vpop.f32.mrb[18].mxu0  ;;  %v2001_v26 = vpop.f32.mrb[50].mxu1 }
 0x55e   :  { %v9087_v34 = vmul.f32 -1.442695, %v2004_v10  ;;  %v1961_v6 = vpop.f32.mrb[19].mxu0  ;;  %v2002_v31 = vpop.f32.mrb[51].mxu1 }
 0x55f   :  { %v9088_v54 = vmul.f32 -1.442695, %v2005_v9  ;;  %v9089_v25 = vmul.f32 -1.442695, %v2007_v33 }
 0x560   :  { %10403 = vpow2.f32 %v9087_v34 }
 0x561   :  { %10405 = vpow2.f32 %v9088_v54 }
 0x562   :  { %10407 = vpow2.f32 %v9089_v25 }
 0x563   :  { %10409 = vtanh.f32 %v2006_v8 }
 0x56a   :  { %v10404_v7 = vpop.eup %10403 }
 0x56b   :  { %v10406_v13 = vpop.eup %10405  ;;  %v2014_v36 = vadd.f32 1.0, %v10404_v7 }
 0x56c   :  { %v2015_v35 = vadd.f32 1.0, %v10406_v13  ;;  %v10408_v38 = vpop.eup %10407  ;;  %v10042_v13 = vld [vmem:[#allocation6 + $0xe4] ss:$16 sps:$4 sm:$0xff]  }
 0x56d   :  { %10411 = vrcp.f32 %v2014_v36  ;;  %v10410_v51 = vpop.eup %10409  ;;  %v2024_v16 = vadd.f32 1.0, %v10408_v38  ;;  %v10040_v36 = vld [vmem:[#allocation6 + $0xe0] ss:$16 sps:$4 sm:$0xff]  }
 0x56e   :  { %10413 = vrcp.f32 %v2015_v35  ;;  %v10045_v35 = vld [vmem:[#allocation4 + $0x104] ss:$16 sps:$4 sm:$0xff]  }
 0x56f   :  { %10415 = vrcp.f32 %v2024_v16 }
 0x577   :  { %v10412_v39 = vpop.eup %10411 }
 0x578   :  { %v10414_v48 = vpop.eup %10413  ;;  %v2028_v46 = vmul.f32 %v10412_v39, %v10410_v51 }
 0x579   :  { %v2027_v15 = vmul.f32 %v10414_v48, %v11268_v37  ;;  %v10416_v10 = vpop.eup %10415  ;;  %v12725_v48 = vld [vmem:[#allocation17_spill] sm:$0xff] }
 0x57b   :  { %v11314_v52 = vadd.f32 %v2028_v46, %v2027_v15 }
 0x57d   :  { %10417 = vtanh.f32 %v11314_v52 }
 0x587   :  { %v10418_v0 = vpop.eup %10417 }
 0x588   :  { %v11317_v29 = vmul.f32 %v10418_v0, %v10416_v10  ;;  %v12727_v0 = vld [vmem:[#allocation18_spill] sm:$0xff] }
 0x58a   :  { %v2041_v8 = vpack.c.bf16 %v11317_v29, %v11317_v29 }
 0x58c   :  { %2267 = vmatmul.mubr.bf16.vlgmr.msra.gmra.mrb[20].mxu0 %v2041_v8  ;;  %2308 = vmatmul.mubr.bf16.vlgmr.msra.gmra.mrb[52].mxu1 %v2041_v8 }
 0x58d   :  { %2547 = vmatpush1.bf16.msra.mxu0 %v11137_v55  ;;  %2588 = vmatpush1.bf16.msra.mxu1 %v11216_v41 }
 0x58e   :  { %2548 = vmatprep.subr.bf16.mxu0 %v11141_v56  ;;  %2589 = vmatprep.subr.bf16.mxu1 %v11220_v45 }
 0x58f   :  { %2578 = vmatprep.mubr.bf16.mxu0 %v12722_v50  ;;  %2619 = vmatprep.mubr.bf16.mxu1 %v12722_v50 }
 0x591   :  { %2549 = vmatpush1.bf16.msra.mxu0 %v11143_v57  ;;  %2590 = vmatpush1.bf16.msra.mxu1 %v11222_v53 }
 0x592   :  { %2550 = vmatprep.subr.bf16.mxu0 %v11147_v58  ;;  %2591 = vmatprep.subr.bf16.mxu1 %v11226_v49 }
 0x595   :  { %2551 = vmatpush1.bf16.msra.mxu0 %v11149_v59  ;;  %2592 = vmatpush1.bf16.msra.mxu1 %v11228_v24 }
 0x596   :  { %2552 = vmatprep.subr.bf16.mxu0 %v11153_v60  ;;  %2593 = vmatprep.subr.bf16.mxu1 %v11232_v19 }
 0x599   :  { %2553 = vmatpush1.bf16.msra.mxu0 %v11155_v61  ;;  %2594 = vmatpush1.bf16.msra.mxu1 %v11234_v17 }
 0x59a   :  { %2554 = vmatprep.subr.bf16.mxu0 %v11159_v62  ;;  %2595 = vmatprep.subr.bf16.mxu1 %v11238_v23 }
 0x59d   :  { %2555 = vmatpush1.bf16.msra.mxu0 %v11161_v63  ;;  %2596 = vmatpush1.bf16.msra.mxu1 %v11240_v11 }
 0x59e   :  { %2556 = vmatprep.subr.bf16.mxu0 %v11164_v1  ;;  %2597 = vmatprep.subr.bf16.mxu1 %v11243_v21 }
 0x5a1   :  { %2557 = vmatpush1.bf16.msra.mxu0 %v11167_v2  ;;  %2598 = vmatpush1.bf16.msra.mxu1 %v11246_v27 }
 0x5a2   :  { %2558 = vmatprep.subr.bf16.mxu0 %v11170_v3  ;;  %2599 = vmatprep.subr.bf16.mxu1 %v11249_v18 }
 0x5a5   :  { %2559 = vmatpush1.bf16.msra.mxu0 %v11173_v4  ;;  %2600 = vmatpush1.bf16.msra.mxu1 %v11252_v28 }
 0x5a6   :  { %2560 = vmatprep.subr.bf16.mxu0 %v11176_v5  ;;  %2601 = vmatprep.subr.bf16.mxu1 %v11255_v22 }
 0x5a9   :  { %2561 = vmatpush1.bf16.msra.mxu0 %v11179_v12  ;;  %2602 = vmatpush1.bf16.msra.mxu1 %v11258_v30 }
 0x5aa   :  { %2899 = vmatprep.subr.bf16.mxu1 %v11214_v14 }
 0x65f   :  { %v2268_v55 = vpop.f32.mrb[20].mxu0  ;;  %v2309_v56 = vpop.f32.mrb[52].mxu1 }
 0x660   :  { %v2316_v57 = vadd.f32 %v2268_v55, %v11035_v40  ;;  %v2318_v58 = vadd.f32 %v2309_v56, %v11069_v43  ;;  %v2270_v59 = vpop.f32.mrb[21].mxu0  ;;  %v2311_v60 = vpop.f32.mrb[53].mxu1 }
 0x661   :  { %v2317_v61 = vadd.f32 %v2270_v59, %v11037_v42  ;;  %v2319_v62 = vadd.f32 %v2311_v60, %v11071_v47  ;;  %v2272_v63 = vpop.f32.mrb[22].mxu0  ;;  %v2313_v1 = vpop.f32.mrb[54].mxu1 }
 0x662   :  { %v9122_v2 = vmul.f32 -1.442695, %v2316_v57  ;;  %v2273_v3 = vpop.f32.mrb[23].mxu0  ;;  %v2314_v4 = vpop.f32.mrb[55].mxu1 }
 0x663   :  { %v9123_v5 = vmul.f32 -1.442695, %v2317_v61  ;;  %v9124_v12 = vmul.f32 -1.442695, %v2319_v62 }
 0x664   :  { %10419 = vpow2.f32 %v9122_v2 }
 0x665   :  { %10421 = vpow2.f32 %v9123_v5 }
 0x666   :  { %10423 = vpow2.f32 %v9124_v12 }
 0x667   :  { %10425 = vtanh.f32 %v2318_v58 }
 0x66e   :  { %v10420_v14 = vpop.eup %10419 }
 0x66f   :  { %v10422_v37 = vpop.eup %10421  ;;  %v2326_v40 = vadd.f32 1.0, %v10420_v14 }
 0x670   :  { %v2327_v43 = vadd.f32 1.0, %v10422_v37  ;;  %v10424_v42 = vpop.eup %10423 }
 0x671   :  { %10427 = vrcp.f32 %v2326_v40  ;;  %v10426_v9 = vpop.eup %10425  ;;  %v2336_v26 = vadd.f32 1.0, %v10424_v42 }
 0x672   :  { %10429 = vrcp.f32 %v2327_v43 }
 0x673   :  { %10431 = vrcp.f32 %v2336_v26  ;;  %v10051_v26 = vld [vmem:[#allocation4 + $0x124] ss:$16 sps:$4 sm:$0xff]  }
 0x67b   :  { %v10428_v47 = vpop.eup %10427 }
 0x67c   :  { %v10430_v33 = vpop.eup %10429  ;;  %v2340_v32 = vmul.f32 %v10428_v47, %v10426_v9  ;;  %v10043_v47 = vld [vmem:[#allocation4 + $0x100] ss:$16 sps:$4 sm:$0xff]  }
 0x67d   :  { %v2339_v34 = vmul.f32 %v10430_v33, %v11314_v52  ;;  %v10432_v31 = vpop.eup %10431  ;;  %v12726_v52 = vld [vmem:[#allocation12_spill] sm:$0xff]  ;;  %v10046_v33 = vld [vmem:[#allocation4 + $0x108] ss:$16 sps:$4 sm:$0xff]  }
 0x67f   :  { %v11359_v6 = vadd.f32 %v2340_v32, %v2339_v34  ;;  %v10054_v34 = vld [vmem:[#allocation4 + $0x12c] ss:$16 sps:$4 sm:$0xff]  }
 0x681   :  { %10433 = vtanh.f32 %v11359_v6 }
 0x68b   :  { %v10434_v54 = vpop.eup %10433 }
 0x68c   :  { %v11362_v25 = vmul.f32 %v10434_v54, %v10432_v31  ;;  %v10052_v31 = vld [vmem:[#allocation4 + $0x128] ss:$16 sps:$4 sm:$0xff]   ;;  %v10057_v54 = vld [vmem:[#allocation4 + $0x144] ss:$16 sps:$4 sm:$0xff]  }
 0x68e   :  { %v2353_v7 = vpack.c.bf16 %v11362_v25, %v11362_v25 }
 0x690   :  { %2579 = vmatmul.mubr.bf16.vlgmr.msra.gmra.mrb[24].mxu0 %v2353_v7  ;;  %2620 = vmatmul.mubr.bf16.vlgmr.msra.gmra.mrb[56].mxu1 %v2353_v7  ;;  %v10060_v7 = vld [vmem:[#allocation4 + $0x14c] ss:$16 sps:$4 sm:$0xff]  }
 0x691   :  { %2900 = vmatpush1.bf16.msra.mxu1 %v11216_v41  ;;  %2890 = vmatprep.mubr.bf16.mxu0 %v12722_v50  ;;  %v10021_v41 = vld [vmem:[#allocation6 + $0x4] ss:$16 sps:$4 sm:$0xff]  }
 0x692   :  { %2901 = vmatprep.subr.bf16.mxu1 %v11220_v45  ;;  %2931 = vmatprep.mubr.bf16.mxu1 %v12722_v50  ;;  %v10019_v45 = vld [vmem:[#allocation6] ss:$16 sps:$4 sm:$0xff]  }
 0x693   :  { %2858 = vmatprep.subr.bf16.mxu0 %v10021_v41  ;;  %v10055_v41 = vld [vmem:[#allocation4 + $0x140] ss:$16 sps:$4 sm:$0xff]  }
 0x694   :  { %2859 = vmatpush1.bf16.msra.mxu0 %v10019_v45  ;;  %v10058_v45 = vld [vmem:[#allocation4 + $0x148] ss:$16 sps:$4 sm:$0xff]  }
 0x695   :  { %2902 = vmatpush1.bf16.msra.mxu1 %v11222_v53  ;;  %v10024_v53 = vld [vmem:[#allocation6 + $0x24] ss:$16 sps:$4 sm:$0xff]  }
 0x696   :  { %2903 = vmatprep.subr.bf16.mxu1 %v11226_v49  ;;  %v10022_v49 = vld [vmem:[#allocation6 + $0x20] ss:$16 sps:$4 sm:$0xff]   ;;  %2860 = vmatprep.subr.bf16.mxu0 %v10024_v53  ;;  %v10063_v53 = vld [vmem:[#allocation4 + $0x164] ss:$16 sps:$4 sm:$0xff]  }
 0x698   :  { %2861 = vmatpush1.bf16.msra.mxu0 %v10022_v49  ;;  %v10066_v49 = vld [vmem:[#allocation4 + $0x16c] ss:$16 sps:$4 sm:$0xff]  }
 0x699   :  { %2904 = vmatpush1.bf16.msra.mxu1 %v11228_v24  ;;  %v10027_v24 = vld [vmem:[#allocation6 + $0x44] ss:$16 sps:$4 sm:$0xff]  }
 0x69a   :  { %2905 = vmatprep.subr.bf16.mxu1 %v11232_v19  ;;  %v10025_v19 = vld [vmem:[#allocation6 + $0x40] ss:$16 sps:$4 sm:$0xff]   ;;  %2862 = vmatprep.subr.bf16.mxu0 %v10027_v24 }
 0x69b   :  { %v10061_v24 = vld [vmem:[#allocation4 + $0x160] ss:$16 sps:$4 sm:$0xff]  }
 0x69c   :  { %2863 = vmatpush1.bf16.msra.mxu0 %v10025_v19  ;;  %v10064_v19 = vld [vmem:[#allocation4 + $0x168] ss:$16 sps:$4 sm:$0xff]  }
 0x69d   :  { %2906 = vmatpush1.bf16.msra.mxu1 %v11234_v17  ;;  %v10030_v17 = vld [vmem:[#allocation6 + $0x64] ss:$16 sps:$4 sm:$0xff]  }
 0x69e   :  { %2907 = vmatprep.subr.bf16.mxu1 %v11238_v23  ;;  %v10028_v23 = vld [vmem:[#allocation6 + $0x60] ss:$16 sps:$4 sm:$0xff]   ;;  %2864 = vmatprep.subr.bf16.mxu0 %v10030_v17  ;;  %v10069_v17 = vld [vmem:[#allocation4 + $0x184] ss:$16 sps:$4 sm:$0xff]  }
 0x6a0   :  { %2865 = vmatpush1.bf16.msra.mxu0 %v10028_v23  ;;  %v10072_v23 = vld [vmem:[#allocation4 + $0x18c] ss:$16 sps:$4 sm:$0xff]  }
 0x6a1   :  { %2908 = vmatpush1.bf16.msra.mxu1 %v11240_v11  ;;  %v10033_v11 = vld [vmem:[#allocation6 + $0x84] ss:$16 sps:$4 sm:$0xff]  }
 0x6a2   :  { %2909 = vmatprep.subr.bf16.mxu1 %v11243_v21  ;;  %v10031_v21 = vld [vmem:[#allocation6 + $0x80] ss:$16 sps:$4 sm:$0xff]   ;;  %2866 = vmatprep.subr.bf16.mxu0 %v10033_v11 }
 0x6a3   :  { %v10067_v11 = vld [vmem:[#allocation4 + $0x180] ss:$16 sps:$4 sm:$0xff]  }
 0x6a4   :  { %2867 = vmatpush1.bf16.msra.mxu0 %v10031_v21  ;;  %v10070_v21 = vld [vmem:[#allocation4 + $0x188] ss:$16 sps:$4 sm:$0xff]  }
 0x6a5   :  { %2910 = vmatpush1.bf16.msra.mxu1 %v11246_v27  ;;  %v10034_v27 = vld [vmem:[#allocation6 + $0xa0] ss:$16 sps:$4 sm:$0xff]  }
 0x6a6   :  { %2911 = vmatprep.subr.bf16.mxu1 %v11249_v18  ;;  %v10036_v18 = vld [vmem:[#allocation6 + $0xa4] ss:$16 sps:$4 sm:$0xff]  }
 0x6a7   :  { %2868 = vmatprep.subr.bf16.mxu0 %v10036_v18  ;;  %v10078_v18 = vld [vmem:[#allocation4 + $0x1ac] ss:$16 sps:$4 sm:$0xff]  }
 0x6a8   :  { %2869 = vmatpush1.bf16.msra.mxu0 %v10034_v27  ;;  %v10075_v27 = vld [vmem:[#allocation4 + $0x1a4] ss:$16 sps:$4 sm:$0xff]  }
 0x6a9   :  { %2912 = vmatpush1.bf16.msra.mxu1 %v11252_v28  ;;  %v10039_v28 = vld [vmem:[#allocation6 + $0xc4] ss:$16 sps:$4 sm:$0xff]  }
 0x6aa   :  { %2913 = vmatprep.subr.bf16.mxu1 %v11255_v22  ;;  %v10048_v22 = vld [vmem:[#allocation4 + $0x10c] ss:$16 sps:$4 sm:$0xff]   ;;  %2870 = vmatprep.subr.bf16.mxu0 %v10039_v28  ;;  %v10073_v28 = vld [vmem:[#allocation4 + $0x1a0] ss:$16 sps:$4 sm:$0xff]  }
 0x6ad   :  { %2914 = vmatpush1.bf16.msra.mxu1 %v11258_v30  ;;  %v10037_v30 = vld [vmem:[#allocation6 + $0xc0] ss:$16 sps:$4 sm:$0xff]  }
 0x6ae   :  { %3271 = vmatprep.subr.bf16.mxu1 %v10048_v22  ;;  %2871 = vmatpush1.bf16.msra.mxu0 %v10037_v30  ;;  %v10076_v22 = vld [vmem:[#allocation4 + $0x1a8] ss:$16 sps:$4 sm:$0xff]   ;;  %v10081_v30 = vld [vmem:[#allocation4 + $0x1c4] ss:$16 sps:$4 sm:$0xff]  }
 0x6af   :  { %2872 = vmatprep.subr.bf16.mxu0 %v10042_v13  ;;  %v10084_v13 = vld [vmem:[#allocation4 + $0x1cc] ss:$16 sps:$4 sm:$0xff]  }
 0x6b2   :  { %2873 = vmatpush1.bf16.msra.mxu0 %v10040_v36  ;;  %v10079_v36 = vld [vmem:[#allocation4 + $0x1c0] ss:$16 sps:$4 sm:$0xff]  }
 0x6b3   :  { %3198 = vmatprep.subr.bf16.mxu0 %v10045_v35  ;;  %v10082_v35 = vld [vmem:[#allocation4 + $0x1c8] ss:$16 sps:$4 sm:$0xff]  }
 0x763   :  { %v2580_v38 = vpop.f32.mrb[24].mxu0  ;;  %v2621_v51 = vpop.f32.mrb[56].mxu1 }
 0x764   :  { %v2628_v39 = vadd.f32 %v2580_v38, %v11039_v44  ;;  %v2630_v46 = vadd.f32 %v2621_v51, %v12725_v48  ;;  %v2582_v16 = vpop.f32.mrb[25].mxu0  ;;  %v2623_v15 = vpop.f32.mrb[57].mxu1  ;;  %v10087_v38 = vld [vmem:[#allocation4 + $0x1e4] ss:$16 sps:$4 sm:$0xff]   ;;  %v10090_v51 = vld [vmem:[#allocation4 + $0x1ec] ss:$16 sps:$4 sm:$0xff]  }
 0x765   :  { %v2629_v10 = vadd.f32 %v2582_v16, %v12726_v52  ;;  %v2631_v8 = vadd.f32 %v2623_v15, %v12727_v0  ;;  %v2584_v55 = vpop.f32.mrb[26].mxu0  ;;  %v2625_v56 = vpop.f32.mrb[58].mxu1  ;;  %v10088_v48 = vld [vmem:[#allocation4 + $0x1e8] ss:$16 sps:$4 sm:$0xff]   ;;  %v12729_v16 = vld [vmem:[#allocation22_spill] sm:$0xff]  ;;  %v2980_v0 = vpack.c.bf16 %v11362_v25, %v11317_v29 }
 0x766   :  { %v9157_v57 = vmul.f32 -1.442695, %v2628_v39  ;;  %v2585_v58 = vpop.f32.mrb[27].mxu0  ;;  %v2626_v59 = vpop.f32.mrb[59].mxu1  ;;  %v10085_v39 = vld [vmem:[#allocation4 + $0x1e0] ss:$16 sps:$4 sm:$0xff]  }
 0x767   :  { %v9158_v60 = vmul.f32 -1.442695, %v2629_v10  ;;  %v9159_v61 = vmul.f32 -1.442695, %v2631_v8  ;;  %v12730_v52 = vld [vmem:[#allocation23_spill] sm:$0xff] }
 0x768   :  { %10435 = vpow2.f32 %v9157_v57  ;;  %v2979_v10 = vpack.c.bf16 %v11271_v20, %v12730_v52  ;;  %v11409_v8 = vld [vmem:[#allocation6 + $0x104] ss:$16 sps:$4 sm:$0xff]   ;;  %v11411_v55 = vld [vmem:[#allocation6 + $0x10c] ss:$16 sps:$4 sm:$0xff]   ;;  %v11413_v20 = vld [vmem:[#allocation6 + $0x100] ss:$16 sps:$4 sm:$0xff]  }
 0x769   :  { %10437 = vpow2.f32 %v9158_v60  ;;  %v11415_v56 = vld [vmem:[#allocation6 + $0x108] ss:$16 sps:$4 sm:$0xff]   ;;  %v11421_v29 = vld [vmem:[#allocation6 + $0x124] ss:$16 sps:$4 sm:$0xff]   ;;  %v11423_v25 = vld [vmem:[#allocation6 + $0x12c] ss:$16 sps:$4 sm:$0xff]  }
 0x76a   :  { %10439 = vpow2.f32 %v9159_v61  ;;  %v11425_v57 = vld [vmem:[#allocation6 + $0x120] ss:$16 sps:$4 sm:$0xff]   ;;  %v11427_v58 = vld [vmem:[#allocation6 + $0x128] ss:$16 sps:$4 sm:$0xff]   ;;  %v11433_v59 = vld [vmem:[#allocation6 + $0x144] ss:$16 sps:$4 sm:$0xff]  }
 0x76b   :  { %10441 = vtanh.f32 %v2630_v46  ;;  %v12728_v46 = vld [vmem:[#allocation21_spill] sm:$0xff]  ;;  %v11437_v61 = vld [vmem:[#allocation6 + $0x140] ss:$16 sps:$4 sm:$0xff]  }
 0x76c   :  { %v2978_v15 = vpack.c.bf16 %v12729_v16, %v12728_v46  ;;  %v11435_v60 = vld [vmem:[#allocation6 + $0x14c] ss:$16 sps:$4 sm:$0xff]  }
 0x772   :  { %v10436_v62 = vpop.eup %10435 }
 0x773   :  { %v10438_v63 = vpop.eup %10437  ;;  %v2638_v44 = vadd.f32 1.0, %v10436_v62  ;;  %v11439_v62 = vld [vmem:[#allocation6 + $0x148] ss:$16 sps:$4 sm:$0xff]  }
 0x774   :  { %v2639_v1 = vadd.f32 1.0, %v10438_v63  ;;  %v10440_v2 = vpop.eup %10439  ;;  %v11445_v63 = vld [vmem:[#allocation6 + $0x160] ss:$16 sps:$4 sm:$0xff]  }
 0x775   :  { %10443 = vrcp.f32 %v2638_v44  ;;  %v10442_v3 = vpop.eup %10441  ;;  %v2648_v14 = vadd.f32 1.0, %v10440_v2  ;;  %v11447_v44 = vld [vmem:[#allocation6 + $0x164] ss:$16 sps:$4 sm:$0xff]   ;;  %v11451_v2 = vld [vmem:[#allocation6 + $0x16c] ss:$16 sps:$4 sm:$0xff]  }
 0x776   :  { %10445 = vrcp.f32 %v2639_v1  ;;  %v11449_v1 = vld [vmem:[#allocation6 + $0x168] ss:$16 sps:$4 sm:$0xff]  }
 0x777   :  { %10447 = vrcp.f32 %v2648_v14  ;;  %v11469_v14 = vld [vmem:[#allocation6 + $0x1a0] ss:$16 sps:$4 sm:$0xff]  }
 0x77f   :  { %v10444_v4 = vpop.eup %10443 }
 0x780   :  { %v10446_v5 = vpop.eup %10445  ;;  %v2652_v12 = vmul.f32 %v10444_v4, %v10442_v3  ;;  %v11457_v3 = vld [vmem:[#allocation6 + $0x184] ss:$16 sps:$4 sm:$0xff]   ;;  %v11459_v4 = vld [vmem:[#allocation6 + $0x18c] ss:$16 sps:$4 sm:$0xff]  }
 0x781   :  { %v2651_v37 = vmul.f32 %v10446_v5, %v11359_v6  ;;  %v10448_v43 = vpop.eup %10447  ;;  %v10049_v6 = vld [vmem:[#allocation4 + $0x120] ss:$16 sps:$4 sm:$0xff]  }
 0x782   :  { %v11461_v5 = vld [vmem:[#allocation6 + $0x180] ss:$16 sps:$4 sm:$0xff]  }
 0x783   :  { %v11388_v40 = vadd.f32 %v2652_v12, %v2651_v37  ;;  %v11463_v12 = vld [vmem:[#allocation6 + $0x188] ss:$16 sps:$4 sm:$0xff]   ;;  %v11471_v37 = vld [vmem:[#allocation6 + $0x1a4] ss:$16 sps:$4 sm:$0xff]  }
 0x785   :  { %10449 = vtanh.f32 %v11388_v40 }
 0x78f   :  { %v10450_v42 = vpop.eup %10449 }
 0x790   :  { %v11391_v9 = vmul.f32 %v10450_v42, %v10448_v43  ;;  %v11473_v43 = vld [vmem:[#allocation6 + $0x1a8] ss:$16 sps:$4 sm:$0xff]   ;;  %v11475_v42 = vld [vmem:[#allocation6 + $0x1ac] ss:$16 sps:$4 sm:$0xff]  }
 0x792   :  { %v2665_v32 = vpack.c.bf16 %v11391_v9, %v11391_v9 }
 0x794   :  { %2891 = vmatmul.mubr.bf16.vlgmr.msra.gmra.mrb[28].mxu0 %v2665_v32  ;;  %2932 = vmatmul.mubr.bf16.vlgmr.msra.gmra.mrb[60].mxu1 %v2665_v32  ;;  %v11485_v32 = vld [vmem:[#allocation6 + $0x1c0] ss:$16 sps:$4 sm:$0xff]  }
 0x795   :  { %3199 = vmatpush1.bf16.msra.mxu0 %v10043_v47  ;;  %3272 = vmatpush1.bf16.msra.mxu1 %v10046_v33  ;;  %v11481_v47 = vld [vmem:[#allocation6 + $0x1c4] ss:$16 sps:$4 sm:$0xff]   ;;  %v11483_v33 = vld [vmem:[#allocation6 + $0x1cc] ss:$16 sps:$4 sm:$0xff]  }
 0x796   :  { %3200 = vmatprep.subr.bf16.mxu0 %v10051_v26  ;;  %3273 = vmatprep.subr.bf16.mxu1 %v10054_v34  ;;  %v11487_v26 = vld [vmem:[#allocation6 + $0x1c8] ss:$16 sps:$4 sm:$0xff]   ;;  %v11493_v34 = vld [vmem:[#allocation6 + $0x1e0] ss:$16 sps:$4 sm:$0xff]  }
 0x797   :  { %3230 = vmatprep.mubr.bf16.mxu0 %v12722_v50  ;;  %3303 = vmatprep.mubr.bf16.mxu1 %v12722_v50 }
 0x799   :  { %3201 = vmatpush1.bf16.msra.mxu0 %v10049_v6  ;;  %3274 = vmatpush1.bf16.msra.mxu1 %v10052_v31  ;;  %v11495_v6 = vld [vmem:[#allocation6 + $0x1e4] ss:$16 sps:$4 sm:$0xff]   ;;  %v11497_v31 = vld [vmem:[#allocation6 + $0x1e8] ss:$16 sps:$4 sm:$0xff]  }
 0x79a   :  { %3202 = vmatprep.subr.bf16.mxu0 %v10057_v54  ;;  %3275 = vmatprep.subr.bf16.mxu1 %v10060_v7  ;;  %v11499_v54 = vld [vmem:[#allocation6 + $0x1ec] ss:$16 sps:$4 sm:$0xff]  }
 0x79d   :  { %3203 = vmatpush1.bf16.msra.mxu0 %v10055_v41  ;;  %3276 = vmatpush1.bf16.msra.mxu1 %v10058_v45  ;;  %v12731_v45 = vld [vmem:[#allocation13_spill] sm:$0xff] }
 0x79e   :  { %3204 = vmatprep.subr.bf16.mxu0 %v10063_v53  ;;  %3277 = vmatprep.subr.bf16.mxu1 %v10066_v49  ;;  %v12732_v49 = vld [vmem:[#allocation19_spill] sm:$0xff] }
 0x7a1   :  { %3205 = vmatpush1.bf16.msra.mxu0 %v10061_v24  ;;  %3278 = vmatpush1.bf16.msra.mxu1 %v10064_v19 }
 0x7a2   :  { %3206 = vmatprep.subr.bf16.mxu0 %v10069_v17  ;;  %3279 = vmatprep.subr.bf16.mxu1 %v10072_v23  ;;  %v12733_v23 = vld [vmem:[#allocation14_spill] sm:$0xff] }
 0x7a5   :  { %3207 = vmatpush1.bf16.msra.mxu0 %v10067_v11  ;;  %3280 = vmatpush1.bf16.msra.mxu1 %v10070_v21  ;;  %v12734_v21 = vld [vmem:[#allocation20_spill] sm:$0xff] }
 0x7a6   :  { %3208 = vmatprep.subr.bf16.mxu0 %v10075_v27  ;;  %3281 = vmatprep.subr.bf16.mxu1 %v10078_v18 }
 0x7a9   :  { %3209 = vmatpush1.bf16.msra.mxu0 %v10073_v28  ;;  %3282 = vmatpush1.bf16.msra.mxu1 %v10076_v22 }
 0x7aa   :  { %3210 = vmatprep.subr.bf16.mxu0 %v10081_v30  ;;  %3283 = vmatprep.subr.bf16.mxu1 %v10084_v13 }
 0x7ad   :  { %3211 = vmatpush1.bf16.msra.mxu0 %v10079_v36  ;;  %3284 = vmatpush1.bf16.msra.mxu1 %v10082_v35 }
 0x7ae   :  { %3212 = vmatprep.subr.bf16.mxu0 %v10087_v38  ;;  %3285 = vmatprep.subr.bf16.mxu1 %v10090_v51 }
 0x7b1   :  { %3213 = vmatpush1.bf16.msra.mxu0 %v10085_v39  ;;  %3286 = vmatpush1.bf16.msra.mxu1 %v10088_v48 }
 0x7b2   :  { %3573 = vmatprep.subr.bf16.mxu0 %v11409_v8  ;;  %3614 = vmatprep.subr.bf16.mxu1 %v11411_v55 }
 0x7b4   :  { %3231 = vmatmul.mubr.bf16.vlgmr.msra.gmra.mrb[32].mxu0 %v2978_v15  ;;  %3304 = vmatmul.mubr.bf16.vlgmr.msra.gmra.mrb[64].mxu1 %v2978_v15 }
 0x7b5   :  { %3240 = vmatprep.mubr.bf16.mxu0 %v12722_v50  ;;  %3313 = vmatprep.mubr.bf16.mxu1 %v12722_v50 }
 0x7b6   :  { %3574 = vmatpush1.bf16.msra.mxu0 %v11413_v20  ;;  %3615 = vmatpush1.bf16.msra.mxu1 %v11415_v56 }
 0x7b7   :  { %3575 = vmatprep.subr.bf16.mxu0 %v11421_v29  ;;  %3616 = vmatprep.subr.bf16.mxu1 %v11423_v25 }
 0x7ba   :  { %3576 = vmatpush1.bf16.msra.mxu0 %v11425_v57  ;;  %3617 = vmatpush1.bf16.msra.mxu1 %v11427_v58 }
 0x7bb   :  { %3577 = vmatprep.subr.bf16.mxu0 %v11433_v59  ;;  %3618 = vmatprep.subr.bf16.mxu1 %v11435_v60 }
 0x7bc   :  { %3241 = vmatmul.mubr.bf16.gmra.mrb[36].mxu0 %v2979_v10  ;;  %3314 = vmatmul.mubr.bf16.gmra.mrb[68].mxu1 %v2979_v10 }
 0x7bd   :  { %3250 = vmatprep.mubr.bf16.mxu0 %v12722_v50  ;;  %3323 = vmatprep.mubr.bf16.mxu1 %v12722_v50 }
 0x7be   :  { %3578 = vmatpush1.bf16.msra.mxu0 %v11437_v61  ;;  %3619 = vmatpush1.bf16.msra.mxu1 %v11439_v62 }
 0x7bf   :  { %3579 = vmatprep.subr.bf16.mxu0 %v11447_v44  ;;  %3620 = vmatprep.subr.bf16.mxu1 %v11451_v2 }
 0x7c2   :  { %3580 = vmatpush1.bf16.msra.mxu0 %v11445_v63  ;;  %3621 = vmatpush1.bf16.msra.mxu1 %v11449_v1 }
 0x7c3   :  { %3581 = vmatprep.subr.bf16.mxu0 %v11457_v3  ;;  %3622 = vmatprep.subr.bf16.mxu1 %v11459_v4 }
 0x7c4   :  { %3251 = vmatmul.mubr.bf16.gmra.mrb[40].mxu0 %v2980_v0  ;;  %3324 = vmatmul.mubr.bf16.gmra.mrb[72].mxu1 %v2980_v0 }
 0x7c5   :  { %3260 = vmatprep.mubr.bf16.mxu0 %v12722_v50  ;;  %3333 = vmatprep.mubr.bf16.mxu1 %v12722_v50 }
 0x7c6   :  { %3582 = vmatpush1.bf16.msra.mxu0 %v11461_v5  ;;  %3623 = vmatpush1.bf16.msra.mxu1 %v11463_v12 }
 0x7c7   :  { %3583 = vmatprep.subr.bf16.mxu0 %v11471_v37  ;;  %3624 = vmatprep.subr.bf16.mxu1 %v11475_v42 }
 0x7ca   :  { %3584 = vmatpush1.bf16.msra.mxu0 %v11469_v14  ;;  %3625 = vmatpush1.bf16.msra.mxu1 %v11473_v43 }
 0x7cb   :  { %3585 = vmatprep.subr.bf16.mxu0 %v11481_v47  ;;  %3626 = vmatprep.subr.bf16.mxu1 %v11483_v33 }
 0x7ce   :  { %3586 = vmatpush1.bf16.msra.mxu0 %v11485_v32  ;;  %3627 = vmatpush1.bf16.msra.mxu1 %v11487_v26 }
 0x7cf   :  { %3587 = vmatprep.subr.bf16.mxu0 %v11495_v6  ;;  %3628 = vmatprep.subr.bf16.mxu1 %v11499_v54 }
 0x7d2   :  { %3588 = vmatpush1.bf16.msra.mxu0 %v11493_v34  ;;  %3629 = vmatpush1.bf16.msra.mxu1 %v11497_v31 }
 0x7d3   :  { %3881 = vmatprep.subr.bf16.mxu0 %v11409_v8  ;;  %3922 = vmatprep.subr.bf16.mxu1 %v11411_v55 }
 0x867   :  { %v2892_v7 = vpop.f32.mrb[28].mxu0  ;;  %v2933_v41 = vpop.f32.mrb[60].mxu1 }
 0x868   :  { %v2940_v53 = vadd.f32 %v2892_v7, %v12731_v45  ;;  %v2942_v24 = vadd.f32 %v2933_v41, %v12732_v49  ;;  %v2894_v19 = vpop.f32.mrb[29].mxu0  ;;  %v2935_v17 = vpop.f32.mrb[61].mxu1 }
 0x869   :  { %v2941_v11 = vadd.f32 %v2894_v19, %v12733_v23  ;;  %v2943_v27 = vadd.f32 %v2935_v17, %v12734_v21  ;;  %v2896_v18 = vpop.f32.mrb[30].mxu0  ;;  %v2937_v28 = vpop.f32.mrb[62].mxu1 }
 0x86a   :  { %v9192_v22 = vmul.f32 -1.442695, %v2940_v53  ;;  %v2897_v30 = vpop.f32.mrb[31].mxu0  ;;  %v2938_v13 = vpop.f32.mrb[63].mxu1 }
 0x86b   :  { %v9193_v36 = vmul.f32 -1.442695, %v2941_v11  ;;  %v9194_v35 = vmul.f32 -1.442695, %v2943_v27 }
 0x86c   :  { %10451 = vpow2.f32 %v9192_v22 }
 0x86d   :  { %10453 = vpow2.f32 %v9193_v36 }
 0x86e   :  { %10455 = vpow2.f32 %v9194_v35 }
 0x86f   :  { %10457 = vtanh.f32 %v2942_v24 }
 0x876   :  { %v10452_v38 = vpop.eup %10451 }
 0x877   :  { %v10454_v51 = vpop.eup %10453  ;;  %v2950_v39 = vadd.f32 1.0, %v10452_v38 }
 0x878   :  { %v2951_v48 = vadd.f32 1.0, %v10454_v51  ;;  %v10456_v46 = vpop.eup %10455 }
 0x879   :  { %10459 = vrcp.f32 %v2950_v39  ;;  %v10458_v16 = vpop.eup %10457  ;;  %v2960_v0 = vadd.f32 1.0, %v10456_v46 }
 0x87a   :  { %10461 = vrcp.f32 %v2951_v48 }
 0x87b   :  { %10463 = vrcp.f32 %v2960_v0  ;;  %v9195_v0 = vld [vmem:[%s12693_s3 + $0x4] sm:$0xf] }
 0x883   :  { %v10460_v15 = vpop.eup %10459 }
 0x884   :  { %v10462_v52 = vpop.eup %10461  ;;  %v2964_v10 = vmul.f32 %v10460_v15, %v10458_v16 }
 0x885   :  { %v2963_v7 = vmul.f32 %v10462_v52, %v11388_v40  ;;  %v10464_v30 = vpop.eup %10463 }
 0x887   :  { %v11512_v41 = vpop.f32.mrb[32].mxu0  ;;  %v11514_v45 = vpop.f32.mrb[64].mxu1  ;;  %v2965_v53 = vadd.f32 %v2964_v10, %v2963_v7 }
 0x888   :  { %v11516_v49 = vpop.f32.mrb[33].mxu0  ;;  %v11518_v24 = vpop.f32.mrb[65].mxu1 }
 0x889   :  { %v11520_v19 = vpop.f32.mrb[34].mxu0  ;;  %v11522_v17 = vpop.f32.mrb[66].mxu1  ;;  %10465 = vtanh.f32 %v2965_v53 }
 0x88a   :  { %v11524_v23 = vpop.f32.mrb[35].mxu0  ;;  %v11526_v11 = vpop.f32.mrb[67].mxu1 }
 0x88f   :  { %v11528_v40 = vpop.f32.mrb[36].mxu0  ;;  %v11530_v21 = vpop.f32.mrb[68].mxu1 }
 0x890   :  { %12735 = vst [vmem:[#allocation17_spill] sm:$0xff] %v11530_v21  ;;  %v11532_v27 = vpop.f32.mrb[37].mxu0  ;;  %v11534_v18 = vpop.f32.mrb[69].mxu1 }
 0x891   :  { %12736 = vst [vmem:[#allocation12_spill] sm:$0xff] %v11532_v27  ;;  %12737 = vst [vmem:[#allocation18_spill] sm:$0xff] %v11534_v18  ;;  %v11536_v28 = vpop.f32.mrb[38].mxu0  ;;  %v11538_v22 = vpop.f32.mrb[70].mxu1 }
 0x892   :  { %12738 = vst [vmem:[#allocation21_spill] sm:$0xff] %v11536_v28  ;;  %12739 = vst [vmem:[#allocation22_spill] sm:$0xff] %v11538_v22  ;;  %v11540_v13 = vpop.f32.mrb[39].mxu0  ;;  %v11542_v36 = vpop.f32.mrb[71].mxu1 }
 0x893   :  { %12740 = vst [vmem:[#allocation23_spill] sm:$0xff] %v11540_v13  ;;  %12741 = vst [vmem:[#allocation13_spill] sm:$0xff] %v11542_v36  ;;  %v10466_v35 = vpop.eup %10465 }
 0x894   :  { %v2967_v38 = vmul.f32 %v10466_v35, %v10464_v30 }
 0x896   :  { %v2981_v51 = vpack.c.bf16 %v2967_v38, %v11391_v9 }
 0x897   :  { %v11545_v39 = vpop.f32.mrb[40].mxu0  ;;  %v11547_v48 = vpop.f32.mrb[72].mxu1 }
 0x898   :  { %12742 = vst [vmem:[#allocation19_spill] sm:$0xff] %v11545_v39  ;;  %12743 = vst [vmem:[#allocation14_spill] sm:$0xff] %v11547_v48  ;;  %v11549_v46 = vpop.f32.mrb[41].mxu0  ;;  %v11551_v16 = vpop.f32.mrb[73].mxu1  ;;  %3261 = vmatmul.mubr.bf16.gmra.mrb[44].mxu0 %v2981_v51  ;;  %3334 = vmatmul.mubr.bf16.gmra.mrb[76].mxu1 %v2981_v51 }
 0x899   :  { %12744 = vst [vmem:[#allocation20_spill] sm:$0xff] %v11549_v46  ;;  %12745 = vst [vmem:[#allocation24_spill] sm:$0xff] %v11551_v16  ;;  %v11553_v15 = vpop.f32.mrb[42].mxu0  ;;  %v11555_v52 = vpop.f32.mrb[74].mxu1  ;;  %3605 = vmatprep.mubr.bf16.mxu0 %v12722_v50  ;;  %3646 = vmatprep.mubr.bf16.mxu1 %v12722_v50 }
 0x89a   :  { %12746 = vst [vmem:[#allocation25_spill] sm:$0xff] %v11553_v15  ;;  %12747 = vst [vmem:[#allocation26_spill] sm:$0xff] %v11555_v52  ;;  %v11559_v10 = vpop.f32.mrb[43].mxu0  ;;  %v11561_v9 = vpop.f32.mrb[75].mxu1  ;;  %v12757_v52 = vld [vmem:[#allocation15_spill] sm:$0xff] }
 0x89b   :  { %12748 = vst [vmem:[#allocation27_spill] sm:$0xff] %v11559_v10  ;;  %12749 = vst [vmem:[#allocation28_spill] sm:$0xff] %v11561_v9  ;;  %v12756_v9 = vld [vmem:[#allocation10_spill] sm:$0xff]  ;;  %v11618_v15 = vrot.slane %v9195_v0, %v12757_v52 }
 0x89c   :  { %v11615_v10 = vrot.slane %v9195_v0, %v12756_v9 }
 0x89d   :  { %v3306_v9 = vadd.f32 %v11514_v45, %v11618_v15 }
 0x8a0   :  { %3606 = vmatmul.mubr.bf16.vlgmr.msra.gmra.mrb[48].mxu0 %v12722_v50  ;;  %3647 = vmatmul.mubr.bf16.vlgmr.msra.gmra.mrb[80].mxu1 %v12722_v50 }
 0x8a1   :  { %3882 = vmatpush1.bf16.msra.mxu0 %v11413_v20  ;;  %3923 = vmatpush1.bf16.msra.mxu1 %v11415_v56 }
 0x8a2   :  { %3883 = vmatprep.subr.bf16.mxu0 %v11421_v29  ;;  %3924 = vmatprep.subr.bf16.mxu1 %v11423_v25 }
 0x8a3   :  { %3913 = vmatprep.mubr.bf16.mxu0 %v12722_v50  ;;  %3954 = vmatprep.mubr.bf16.mxu1 %v12722_v50 }
 0x8a5   :  { %3884 = vmatpush1.bf16.msra.mxu0 %v11425_v57  ;;  %3925 = vmatpush1.bf16.msra.mxu1 %v11427_v58 }
 0x8a6   :  { %3885 = vmatprep.subr.bf16.mxu0 %v11433_v59  ;;  %3926 = vmatprep.subr.bf16.mxu1 %v11435_v60 }
 0x8a9   :  { %3886 = vmatpush1.bf16.msra.mxu0 %v11437_v61  ;;  %3927 = vmatpush1.bf16.msra.mxu1 %v11439_v62 }
 0x8aa   :  { %3887 = vmatprep.subr.bf16.mxu0 %v11447_v44  ;;  %3928 = vmatprep.subr.bf16.mxu1 %v11451_v2 }
 0x8ad   :  { %3888 = vmatpush1.bf16.msra.mxu0 %v11445_v63  ;;  %3929 = vmatpush1.bf16.msra.mxu1 %v11449_v1 }
 0x8ae   :  { %3889 = vmatprep.subr.bf16.mxu0 %v11457_v3  ;;  %3930 = vmatprep.subr.bf16.mxu1 %v11459_v4 }
 0x8b1   :  { %3890 = vmatpush1.bf16.msra.mxu0 %v11461_v5  ;;  %3931 = vmatpush1.bf16.msra.mxu1 %v11463_v12 }
 0x8b2   :  { %3891 = vmatprep.subr.bf16.mxu0 %v11471_v37  ;;  %3932 = vmatprep.subr.bf16.mxu1 %v11475_v42 }
 0x8b5   :  { %3892 = vmatpush1.bf16.msra.mxu0 %v11469_v14  ;;  %3933 = vmatpush1.bf16.msra.mxu1 %v11473_v43 }
 0x8b6   :  { %3893 = vmatprep.subr.bf16.mxu0 %v11481_v47  ;;  %3934 = vmatprep.subr.bf16.mxu1 %v11483_v33 }
 0x8b9   :  { %3894 = vmatpush1.bf16.msra.mxu0 %v11485_v32  ;;  %3935 = vmatpush1.bf16.msra.mxu1 %v11487_v26 }
 0x8ba   :  { %3895 = vmatprep.subr.bf16.mxu0 %v11495_v6  ;;  %3936 = vmatprep.subr.bf16.mxu1 %v11499_v54 }
 0x8bd   :  { %3896 = vmatpush1.bf16.msra.mxu0 %v11493_v34  ;;  %3937 = vmatpush1.bf16.msra.mxu1 %v11497_v31 }
 0x8be   :  { %4189 = vmatprep.subr.bf16.mxu0 %v11409_v8  ;;  %4230 = vmatprep.subr.bf16.mxu1 %v11411_v55 }
 0x96b   :  { %v11602_v7 = vpop.f32.mrb[44].mxu0  ;;  %v11604_v53 = vpop.f32.mrb[76].mxu1 }
 0x96c   :  { %12750 = vst [vmem:[#allocation29_spill] sm:$0xff] %v11602_v7  ;;  %12751 = vst [vmem:[#allocation30_spill] sm:$0xff] %v11604_v53  ;;  %v11606_v30 = vpop.f32.mrb[45].mxu0  ;;  %v11608_v35 = vpop.f32.mrb[77].mxu1  ;;  %v12760_v7 = vld [vmem:[#allocation11_spill] sm:$0xff] }
 0x96d   :  { %12752 = vst [vmem:[#allocation31_spill] sm:$0xff] %v11606_v30  ;;  %12753 = vst [vmem:[#allocation32_spill] sm:$0xff] %v11608_v35  ;;  %v11610_v38 = vpop.f32.mrb[46].mxu0  ;;  %v11612_v51 = vpop.f32.mrb[78].mxu1  ;;  %v11625_v53 = vrot.slane %v9195_v0, %v12760_v7  ;;  %v12761_v30 = vld [vmem:[#allocation16_spill] sm:$0xff] }
 0x96e   :  { %12754 = vst [vmem:[#allocation33_spill] sm:$0xff] %v11610_v38  ;;  %12755 = vst [vmem:[#allocation34_spill] sm:$0xff] %v11612_v51  ;;  %v11620_v16 = vpop.f32.mrb[47].mxu0  ;;  %v11622_v46 = vpop.f32.mrb[79].mxu1  ;;  %v11628_v48 = vrot.slane %v9195_v0, %v12761_v30  ;;  %v3233_v38 = vadd.f32 %v11512_v41, %v11615_v10 }
 0x96f   :  { %12758 = vst [vmem:[#allocation35_spill] sm:$0xff] %v11620_v16  ;;  %12759 = vst [vmem:[#allocation36_spill] sm:$0xff] %v11622_v46  ;;  %v3235_v52 = vadd.f32 %v11516_v49, %v11625_v53 }
 0x970   :  { %v3308_v16 = vadd.f32 %v11518_v24, %v11628_v48 }
 0x973   :  { %v3607_v51 = vpop.f32.mrb[48].mxu0  ;;  %v3648_v46 = vpop.f32.mrb[80].mxu1 }
 0x974   :  { %v3655_v35 = vadd.f32 %v3607_v51, %v3233_v38  ;;  %v3657_v7 = vadd.f32 %v3648_v46, %v3306_v9  ;;  %v3609_v39 = vpop.f32.mrb[49].mxu0  ;;  %v3650_v36 = vpop.f32.mrb[81].mxu1  ;;  %v3312_v51 = vadd.f32 %v11526_v11, %v11628_v48 }
 0x975   :  { %v3656_v0 = vadd.f32 %v3609_v39, %v3235_v52  ;;  %v3658_v30 = vadd.f32 %v3650_v36, %v3308_v16  ;;  %v3611_v13 = vpop.f32.mrb[50].mxu0  ;;  %v3652_v22 = vpop.f32.mrb[82].mxu1 }
 0x976   :  { %v9260_v41 = vmul.f32 -1.442695, %v3655_v35  ;;  %v3612_v28 = vpop.f32.mrb[51].mxu0  ;;  %v3653_v18 = vpop.f32.mrb[83].mxu1  ;;  %v3239_v35 = vadd.f32 %v11524_v23, %v11625_v53 }
 0x977   :  { %v9261_v45 = vmul.f32 -1.442695, %v3656_v0  ;;  %v9262_v49 = vmul.f32 -1.442695, %v3658_v30  ;;  %v3310_v30 = vadd.f32 %v11522_v17, %v11618_v15 }
 0x978   :  { %10467 = vpow2.f32 %v9260_v41 }
 0x979   :  { %10469 = vpow2.f32 %v9261_v45 }
 0x97a   :  { %10471 = vpow2.f32 %v9262_v49 }
 0x97b   :  { %10473 = vtanh.f32 %v3657_v7  ;;  %v3237_v7 = vadd.f32 %v11520_v19, %v11615_v10 }
 0x982   :  { %v10468_v27 = vpop.eup %10467 }
 0x983   :  { %v10470_v21 = vpop.eup %10469  ;;  %v3665_v24 = vadd.f32 1.0, %v10468_v27 }
 0x984   :  { %v3666_v38 = vadd.f32 1.0, %v10470_v21  ;;  %v10472_v46 = vpop.eup %10471 }
 0x985   :  { %10475 = vrcp.f32 %v3665_v24  ;;  %v10474_v39 = vpop.eup %10473  ;;  %v3675_v16 = vadd.f32 1.0, %v10472_v46 }
 0x986   :  { %10477 = vrcp.f32 %v3666_v38 }
 0x987   :  { %10479 = vrcp.f32 %v3675_v16 }
 0x98f   :  { %v10476_v36 = vpop.eup %10475 }
 0x990   :  { %v10478_v13 = vpop.eup %10477  ;;  %v3679_v22 = vmul.f32 %v10476_v36, %v10474_v39 }
 0x991   :  { %v3678_v28 = vmul.f32 0.0, %v10478_v13  ;;  %v10480_v52 = vpop.eup %10479 }
 0x993   :  { %v11638_v18 = vadd.f32 %v3679_v22, %v3678_v28 }
 0x995   :  { %10481 = vtanh.f32 %v11638_v18 }
 0x99f   :  { %v10482_v9 = vpop.eup %10481 }
 0x9a0   :  { %v11641_v27 = vmul.f32 %v10482_v9, %v10480_v52 }
 0x9a2   :  { %v3688_v21 = vpack.c.bf16 %v11641_v27, %v11641_v27 }
 0x9a4   :  { %3914 = vmatmul.mubr.bf16.vlgmr.msra.gmra.mrb[52].mxu0 %v3688_v21  ;;  %3955 = vmatmul.mubr.bf16.vlgmr.msra.gmra.mrb[84].mxu1 %v3688_v21 }
 0x9a5   :  { %4190 = vmatpush1.bf16.msra.mxu0 %v11413_v20  ;;  %4231 = vmatpush1.bf16.msra.mxu1 %v11415_v56 }
 0x9a6   :  { %4191 = vmatprep.subr.bf16.mxu0 %v11421_v29  ;;  %4232 = vmatprep.subr.bf16.mxu1 %v11423_v25 }
 0x9a7   :  { %4221 = vmatprep.mubr.bf16.mxu0 %v12722_v50  ;;  %4262 = vmatprep.mubr.bf16.mxu1 %v12722_v50 }
 0x9a9   :  { %4192 = vmatpush1.bf16.msra.mxu0 %v11425_v57  ;;  %4233 = vmatpush1.bf16.msra.mxu1 %v11427_v58 }
 0x9aa   :  { %4193 = vmatprep.subr.bf16.mxu0 %v11433_v59  ;;  %4234 = vmatprep.subr.bf16.mxu1 %v11435_v60 }
 0x9ad   :  { %4194 = vmatpush1.bf16.msra.mxu0 %v11437_v61  ;;  %4235 = vmatpush1.bf16.msra.mxu1 %v11439_v62 }
 0x9ae   :  { %4195 = vmatprep.subr.bf16.mxu0 %v11447_v44  ;;  %4236 = vmatprep.subr.bf16.mxu1 %v11451_v2 }
 0x9b1   :  { %4196 = vmatpush1.bf16.msra.mxu0 %v11445_v63  ;;  %4237 = vmatpush1.bf16.msra.mxu1 %v11449_v1 }
 0x9b2   :  { %4197 = vmatprep.subr.bf16.mxu0 %v11457_v3  ;;  %4238 = vmatprep.subr.bf16.mxu1 %v11459_v4 }
 0x9b5   :  { %4198 = vmatpush1.bf16.msra.mxu0 %v11461_v5  ;;  %4239 = vmatpush1.bf16.msra.mxu1 %v11463_v12 }
 0x9b6   :  { %4199 = vmatprep.subr.bf16.mxu0 %v11471_v37  ;;  %4240 = vmatprep.subr.bf16.mxu1 %v11475_v42 }
 0x9b9   :  { %4200 = vmatpush1.bf16.msra.mxu0 %v11469_v14  ;;  %4241 = vmatpush1.bf16.msra.mxu1 %v11473_v43 }
 0x9ba   :  { %4201 = vmatprep.subr.bf16.mxu0 %v11481_v47  ;;  %4242 = vmatprep.subr.bf16.mxu1 %v11483_v33 }
 0x9bd   :  { %4202 = vmatpush1.bf16.msra.mxu0 %v11485_v32  ;;  %4243 = vmatpush1.bf16.msra.mxu1 %v11487_v26 }
 0x9be   :  { %4203 = vmatprep.subr.bf16.mxu0 %v11495_v6  ;;  %4244 = vmatprep.subr.bf16.mxu1 %v11499_v54 }
 0x9c1   :  { %4204 = vmatpush1.bf16.msra.mxu0 %v11493_v34  ;;  %4245 = vmatpush1.bf16.msra.mxu1 %v11497_v31 }
 0x9c2   :  { %4497 = vmatprep.subr.bf16.mxu0 %v11409_v8  ;;  %4538 = vmatprep.subr.bf16.mxu1 %v11411_v55 }
 0xa77   :  { %v3915_v0 = vpop.f32.mrb[52].mxu0  ;;  %v3956_v41 = vpop.f32.mrb[84].mxu1 }
 0xa78   :  { %v3963_v45 = vadd.f32 %v3915_v0, %v3237_v7  ;;  %v3965_v49 = vadd.f32 %v3956_v41, %v3310_v30  ;;  %v3917_v24 = vpop.f32.mrb[53].mxu0  ;;  %v3958_v8 = vpop.f32.mrb[85].mxu1 }
 0xa79   :  { %v3964_v38 = vadd.f32 %v3917_v24, %v3239_v35  ;;  %v3966_v55 = vadd.f32 %v3958_v8, %v3312_v51  ;;  %v3919_v46 = vpop.f32.mrb[54].mxu0  ;;  %v3960_v39 = vpop.f32.mrb[86].mxu1 }
 0xa7a   :  { %v9295_v19 = vmul.f32 -1.442695, %v3963_v45  ;;  %v3920_v36 = vpop.f32.mrb[55].mxu0  ;;  %v3961_v13 = vpop.f32.mrb[87].mxu1 }
 0xa7b   :  { %v9296_v17 = vmul.f32 -1.442695, %v3964_v38  ;;  %v9297_v23 = vmul.f32 -1.442695, %v3966_v55  ;;  %v11745_v36 = vld [vmem:[#allocation6 + $0x104] ss:$16 sps:$4 sm:$0xff]  }
 0xa7c   :  { %10483 = vpow2.f32 %v9295_v19  ;;  %v11747_v13 = vld [vmem:[#allocation6 + $0x10c] ss:$16 sps:$4 sm:$0xff]  }
 0xa7d   :  { %10485 = vpow2.f32 %v9296_v17  ;;  %v11749_v17 = vld [vmem:[#allocation6 + $0x100] ss:$16 sps:$4 sm:$0xff]  }
 0xa7e   :  { %10487 = vpow2.f32 %v9297_v23  ;;  %v11751_v23 = vld [vmem:[#allocation6 + $0x108] ss:$16 sps:$4 sm:$0xff]  }
 0xa7f   :  { %10489 = vtanh.f32 %v3965_v49 }
 0xa86   :  { %v10484_v22 = vpop.eup %10483 }
 0xa87   :  { %v10486_v16 = vpop.eup %10485  ;;  %v3973_v11 = vadd.f32 1.0, %v10484_v22  ;;  %v11757_v22 = vld [vmem:[#allocation6 + $0x124] ss:$16 sps:$4 sm:$0xff]  }
 0xa88   :  { %v3974_v28 = vadd.f32 1.0, %v10486_v16  ;;  %v10488_v52 = vpop.eup %10487  ;;  %v11759_v16 = vld [vmem:[#allocation6 + $0x12c] ss:$16 sps:$4 sm:$0xff]  }
 0xa89   :  { %10491 = vrcp.f32 %v3973_v11  ;;  %v10490_v9 = vpop.eup %10489  ;;  %v3983_v35 = vadd.f32 1.0, %v10488_v52  ;;  %v11761_v11 = vld [vmem:[#allocation6 + $0x120] ss:$16 sps:$4 sm:$0xff]   ;;  %v11769_v52 = vld [vmem:[#allocation6 + $0x144] ss:$16 sps:$4 sm:$0xff]  }
 0xa8a   :  { %10493 = vrcp.f32 %v3974_v28  ;;  %v11763_v28 = vld [vmem:[#allocation6 + $0x128] ss:$16 sps:$4 sm:$0xff]  }
 0xa8b   :  { %10495 = vrcp.f32 %v3983_v35  ;;  %v11783_v35 = vld [vmem:[#allocation6 + $0x16c] ss:$16 sps:$4 sm:$0xff]  }
 0xa93   :  { %v10492_v21 = vpop.eup %10491 }
 0xa94   :  { %v10494_v7 = vpop.eup %10493  ;;  %v3987_v30 = vmul.f32 %v10492_v21, %v10490_v9  ;;  %v11771_v9 = vld [vmem:[#allocation6 + $0x14c] ss:$16 sps:$4 sm:$0xff]   ;;  %v11773_v21 = vld [vmem:[#allocation6 + $0x140] ss:$16 sps:$4 sm:$0xff]  }
 0xa95   :  { %v3986_v51 = vmul.f32 %v10494_v7, %v11638_v18  ;;  %v10496_v41 = vpop.eup %10495  ;;  %v11775_v7 = vld [vmem:[#allocation6 + $0x148] ss:$16 sps:$4 sm:$0xff]  }
 0xa97   :  { %v11688_v0 = vadd.f32 %v3987_v30, %v3986_v51  ;;  %v11781_v30 = vld [vmem:[#allocation6 + $0x164] ss:$16 sps:$4 sm:$0xff]   ;;  %v11785_v51 = vld [vmem:[#allocation6 + $0x160] ss:$16 sps:$4 sm:$0xff]  }
 0xa99   :  { %10497 = vtanh.f32 %v11688_v0 }
 0xaa3   :  { %v10498_v45 = vpop.eup %10497 }
 0xaa4   :  { %v11691_v24 = vmul.f32 %v10498_v45, %v10496_v41  ;;  %v11793_v41 = vld [vmem:[#allocation6 + $0x184] ss:$16 sps:$4 sm:$0xff]   ;;  %v11795_v45 = vld [vmem:[#allocation6 + $0x18c] ss:$16 sps:$4 sm:$0xff]  }
 0xaa6   :  { %v3996_v49 = vpack.c.bf16 %v11691_v24, %v11691_v24 }
 0xaa8   :  { %4222 = vmatmul.mubr.bf16.vlgmr.msra.gmra.mrb[56].mxu0 %v3996_v49  ;;  %4263 = vmatmul.mubr.bf16.vlgmr.msra.gmra.mrb[88].mxu1 %v3996_v49  ;;  %v11797_v49 = vld [vmem:[#allocation6 + $0x180] ss:$16 sps:$4 sm:$0xff]  }
 0xaa9   :  { %4498 = vmatpush1.bf16.msra.mxu0 %v11413_v20  ;;  %4539 = vmatpush1.bf16.msra.mxu1 %v11415_v56  ;;  %v3243_v20 = vadd.f32 %v11528_v40, %v11615_v10  ;;  %v12762_v56 = vld [vmem:[#allocation17_spill] sm:$0xff] }
 0xaaa   :  { %4499 = vmatprep.subr.bf16.mxu0 %v11421_v29  ;;  %4540 = vmatprep.subr.bf16.mxu1 %v11423_v25  ;;  %v3316_v29 = vadd.f32 %v12762_v56, %v11618_v15  ;;  %v12763_v25 = vld [vmem:[#allocation12_spill] sm:$0xff] }
 0xaab   :  { %4529 = vmatprep.mubr.bf16.mxu0 %v12722_v50  ;;  %4570 = vmatprep.mubr.bf16.mxu1 %v12722_v50  ;;  %v11803_v56 = vld [vmem:[#allocation6 + $0x1a4] ss:$16 sps:$4 sm:$0xff]  }
 0xaad   :  { %4500 = vmatpush1.bf16.msra.mxu0 %v11425_v57  ;;  %4541 = vmatpush1.bf16.msra.mxu1 %v11427_v58  ;;  %v3245_v57 = vadd.f32 %v12763_v25, %v11625_v53  ;;  %v12764_v58 = vld [vmem:[#allocation18_spill] sm:$0xff]  ;;  %v11809_v25 = vld [vmem:[#allocation6 + $0x1a8] ss:$16 sps:$4 sm:$0xff]  }
 0xaae   :  { %4501 = vmatprep.subr.bf16.mxu0 %v11433_v59  ;;  %4542 = vmatprep.subr.bf16.mxu1 %v11435_v60  ;;  %v3318_v59 = vadd.f32 %v12764_v58, %v11628_v48  ;;  %v11814_v58 = vld [vmem:[#allocation6 + $0x1c4] ss:$16 sps:$4 sm:$0xff]  }
 0xab1   :  { %4502 = vmatpush1.bf16.msra.mxu0 %v11437_v61  ;;  %4543 = vmatpush1.bf16.msra.mxu1 %v11439_v62 }
 0xab2   :  { %4503 = vmatprep.subr.bf16.mxu0 %v11447_v44  ;;  %4544 = vmatprep.subr.bf16.mxu1 %v11451_v2 }
 0xab5   :  { %4504 = vmatpush1.bf16.msra.mxu0 %v11445_v63  ;;  %4545 = vmatpush1.bf16.msra.mxu1 %v11449_v1 }
 0xab6   :  { %4505 = vmatprep.subr.bf16.mxu0 %v11457_v3  ;;  %4546 = vmatprep.subr.bf16.mxu1 %v11459_v4 }
 0xab9   :  { %4506 = vmatpush1.bf16.msra.mxu0 %v11461_v5  ;;  %4547 = vmatpush1.bf16.msra.mxu1 %v11463_v12 }
 0xaba   :  { %4507 = vmatprep.subr.bf16.mxu0 %v11471_v37  ;;  %4548 = vmatprep.subr.bf16.mxu1 %v11475_v42 }
 0xabd   :  { %4508 = vmatpush1.bf16.msra.mxu0 %v11469_v14  ;;  %4549 = vmatpush1.bf16.msra.mxu1 %v11473_v43 }
 0xabe   :  { %4509 = vmatprep.subr.bf16.mxu0 %v11481_v47  ;;  %4550 = vmatprep.subr.bf16.mxu1 %v11483_v33 }
 0xac1   :  { %4510 = vmatpush1.bf16.msra.mxu0 %v11485_v32  ;;  %4551 = vmatpush1.bf16.msra.mxu1 %v11487_v26 }
 0xac2   :  { %4511 = vmatprep.subr.bf16.mxu0 %v11495_v6  ;;  %4552 = vmatprep.subr.bf16.mxu1 %v11499_v54 }
 0xac5   :  { %4512 = vmatpush1.bf16.msra.mxu0 %v11493_v34  ;;  %4553 = vmatpush1.bf16.msra.mxu1 %v11497_v31 }
 0xac6   :  { %4805 = vmatprep.subr.bf16.mxu0 %v11745_v36  ;;  %4846 = vmatprep.subr.bf16.mxu1 %v11747_v13 }
 0xb7b   :  { %v4223_v60 = vpop.f32.mrb[56].mxu0  ;;  %v4264_v61 = vpop.f32.mrb[88].mxu1 }
 0xb7c   :  { %v4271_v62 = vadd.f32 %v4223_v60, %v3243_v20  ;;  %v4273_v63 = vadd.f32 %v4264_v61, %v3316_v29  ;;  %v4225_v44 = vpop.f32.mrb[57].mxu0  ;;  %v4266_v1 = vpop.f32.mrb[89].mxu1  ;;  %v11799_v20 = vld [vmem:[#allocation6 + $0x188] ss:$16 sps:$4 sm:$0xff]   ;;  %v11807_v29 = vld [vmem:[#allocation6 + $0x1a0] ss:$16 sps:$4 sm:$0xff]  }
 0xb7d   :  { %v4272_v2 = vadd.f32 %v4225_v44, %v3245_v57  ;;  %v4274_v3 = vadd.f32 %v4266_v1, %v3318_v59  ;;  %v4227_v4 = vpop.f32.mrb[58].mxu0  ;;  %v4268_v5 = vpop.f32.mrb[90].mxu1  ;;  %v11811_v57 = vld [vmem:[#allocation6 + $0x1ac] ss:$16 sps:$4 sm:$0xff]   ;;  %v11821_v60 = vld [vmem:[#allocation6 + $0x1c0] ss:$16 sps:$4 sm:$0xff]  }
 0xb7e   :  { %v9330_v12 = vmul.f32 -1.442695, %v4271_v62  ;;  %v4228_v14 = vpop.f32.mrb[59].mxu0  ;;  %v4269_v37 = vpop.f32.mrb[91].mxu1  ;;  %v11816_v59 = vld [vmem:[#allocation6 + $0x1cc] ss:$16 sps:$4 sm:$0xff]  }
 0xb7f   :  { %v9331_v43 = vmul.f32 -1.442695, %v4272_v2  ;;  %v9332_v42 = vmul.f32 -1.442695, %v4274_v3  ;;  %v11823_v61 = vld [vmem:[#allocation6 + $0x1c8] ss:$16 sps:$4 sm:$0xff]  }
 0xb80   :  { %10499 = vpow2.f32 %v9330_v12  ;;  %v11827_v62 = vld [vmem:[#allocation6 + $0x1e4] ss:$16 sps:$4 sm:$0xff]   ;;  %v11833_v44 = vld [vmem:[#allocation6 + $0x1e0] ss:$16 sps:$4 sm:$0xff]   ;;  %v11835_v1 = vld [vmem:[#allocation6 + $0x1e8] ss:$16 sps:$4 sm:$0xff]  }
 0xb81   :  { %10501 = vpow2.f32 %v9331_v43  ;;  %v12765_v2 = vld [vmem:[#allocation21_spill] sm:$0xff]  ;;  %v12766_v4 = vld [vmem:[#allocation22_spill] sm:$0xff]  ;;  %v12767_v12 = vld [vmem:[#allocation23_spill] sm:$0xff] }
 0xb82   :  { %10503 = vpow2.f32 %v9332_v42  ;;  %v3247_v3 = vadd.f32 %v12765_v2, %v11615_v10  ;;  %v3320_v5 = vadd.f32 %v12766_v4, %v11618_v15  ;;  %v3249_v14 = vadd.f32 %v12767_v12, %v11625_v53  ;;  %v12768_v37 = vld [vmem:[#allocation13_spill] sm:$0xff] }
 0xb83   :  { %10505 = vtanh.f32 %v4273_v63  ;;  %v11829_v63 = vld [vmem:[#allocation6 + $0x1ec] ss:$16 sps:$4 sm:$0xff]   ;;  %v3322_v43 = vadd.f32 %v12768_v37, %v11628_v48 }
 0xb8a   :  { %v10500_v47 = vpop.eup %10499 }
 0xb8b   :  { %v10502_v33 = vpop.eup %10501  ;;  %v4281_v32 = vadd.f32 1.0, %v10500_v47 }
 0xb8c   :  { %v4282_v26 = vadd.f32 1.0, %v10502_v33  ;;  %v10504_v34 = vpop.eup %10503 }
 0xb8d   :  { %10507 = vrcp.f32 %v4281_v32  ;;  %v10506_v6 = vpop.eup %10505  ;;  %v4291_v18 = vadd.f32 1.0, %v10504_v34 }
 0xb8e   :  { %10509 = vrcp.f32 %v4282_v26 }
 0xb8f   :  { %10511 = vrcp.f32 %v4291_v18 }
 0xb97   :  { %v10508_v31 = vpop.eup %10507 }
 0xb98   :  { %v10510_v54 = vpop.eup %10509  ;;  %v4295_v40 = vmul.f32 %v10508_v31, %v10506_v6 }
 0xb99   :  { %v4294_v8 = vmul.f32 %v10510_v54, %v11688_v0  ;;  %v10512_v55 = vpop.eup %10511  ;;  %v11787_v0 = vld [vmem:[#allocation6 + $0x168] ss:$16 sps:$4 sm:$0xff]  }
 0xb9b   :  { %v11736_v38 = vadd.f32 %v4295_v40, %v4294_v8 }
 0xb9d   :  { %10513 = vtanh.f32 %v11736_v38 }
 0xba7   :  { %v10514_v46 = vpop.eup %10513 }
 0xba8   :  { %v11739_v39 = vmul.f32 %v10514_v46, %v10512_v55 }
 0xbaa   :  { %v4304_v19 = vpack.c.bf16 %v11739_v39, %v11739_v39 }
 0xbac   :  { %4530 = vmatmul.mubr.bf16.vlgmr.msra.gmra.mrb[60].mxu0 %v4304_v19  ;;  %4571 = vmatmul.mubr.bf16.vlgmr.msra.gmra.mrb[92].mxu1 %v4304_v19 }
 0xbad   :  { %4837 = vmatprep.mubr.bf16.mxu0 %v12722_v50  ;;  %4878 = vmatprep.mubr.bf16.mxu1 %v12722_v50 }
 0xbae   :  { %4806 = vmatpush1.bf16.msra.mxu0 %v11749_v17  ;;  %4847 = vmatpush1.bf16.msra.mxu1 %v11751_v23 }
 0xbaf   :  { %4807 = vmatprep.subr.bf16.mxu0 %v11757_v22  ;;  %4848 = vmatprep.subr.bf16.mxu1 %v11759_v16 }
 0xbb2   :  { %4808 = vmatpush1.bf16.msra.mxu0 %v11761_v11  ;;  %4849 = vmatpush1.bf16.msra.mxu1 %v11763_v28 }
 0xbb3   :  { %4809 = vmatprep.subr.bf16.mxu0 %v11769_v52  ;;  %4850 = vmatprep.subr.bf16.mxu1 %v11771_v9 }
 0xbb6   :  { %4810 = vmatpush1.bf16.msra.mxu0 %v11773_v21  ;;  %4851 = vmatpush1.bf16.msra.mxu1 %v11775_v7 }
 0xbb7   :  { %4811 = vmatprep.subr.bf16.mxu0 %v11781_v30  ;;  %4852 = vmatprep.subr.bf16.mxu1 %v11783_v35 }
 0xbba   :  { %4812 = vmatpush1.bf16.msra.mxu0 %v11785_v51  ;;  %4853 = vmatpush1.bf16.msra.mxu1 %v11787_v0 }
 0xbbb   :  { %4813 = vmatprep.subr.bf16.mxu0 %v11793_v41  ;;  %4854 = vmatprep.subr.bf16.mxu1 %v11795_v45 }
 0xbbe   :  { %4814 = vmatpush1.bf16.msra.mxu0 %v11797_v49  ;;  %4855 = vmatpush1.bf16.msra.mxu1 %v11799_v20 }
 0xbbf   :  { %4815 = vmatprep.subr.bf16.mxu0 %v11803_v56  ;;  %4856 = vmatprep.subr.bf16.mxu1 %v11811_v57 }
 0xbc2   :  { %4816 = vmatpush1.bf16.msra.mxu0 %v11807_v29  ;;  %4857 = vmatpush1.bf16.msra.mxu1 %v11809_v25 }
 0xbc3   :  { %4817 = vmatprep.subr.bf16.mxu0 %v11814_v58  ;;  %4858 = vmatprep.subr.bf16.mxu1 %v11816_v59 }
 0xbc6   :  { %4818 = vmatpush1.bf16.msra.mxu0 %v11821_v60  ;;  %4859 = vmatpush1.bf16.msra.mxu1 %v11823_v61 }
 0xbc7   :  { %4819 = vmatprep.subr.bf16.mxu0 %v11827_v62  ;;  %4860 = vmatprep.subr.bf16.mxu1 %v11829_v63 }
 0xbca   :  { %4820 = vmatpush1.bf16.msra.mxu0 %v11833_v44  ;;  %4861 = vmatpush1.bf16.msra.mxu1 %v11835_v1 }
 0xbcb   :  { %5113 = vmatprep.subr.bf16.mxu0 %v11745_v36  ;;  %5154 = vmatprep.subr.bf16.mxu1 %v11747_v13 }
 0xc7f   :  { %v4531_v42 = vpop.f32.mrb[60].mxu0  ;;  %v4572_v47 = vpop.f32.mrb[92].mxu1 }
 0xc80   :  { %v4579_v33 = vadd.f32 %v4531_v42, %v3247_v3  ;;  %v4581_v32 = vadd.f32 %v4572_v47, %v3320_v5  ;;  %v4533_v26 = vpop.f32.mrb[61].mxu0  ;;  %v4574_v34 = vpop.f32.mrb[93].mxu1 }
 0xc81   :  { %v4580_v6 = vadd.f32 %v4533_v26, %v3249_v14  ;;  %v4582_v31 = vadd.f32 %v4574_v34, %v3322_v43  ;;  %v4535_v54 = vpop.f32.mrb[62].mxu0  ;;  %v4576_v40 = vpop.f32.mrb[94].mxu1 }
 0xc82   :  { %v9365_v18 = vmul.f32 -1.442695, %v4579_v33  ;;  %v4536_v8 = vpop.f32.mrb[63].mxu0  ;;  %v4577_v55 = vpop.f32.mrb[95].mxu1  ;;  %v12770_v40 = vld [vmem:[#allocation14_spill] sm:$0xff] }
 0xc83   :  { %v9366_v46 = vmul.f32 -1.442695, %v4580_v6  ;;  %v9367_v19 = vmul.f32 -1.442695, %v4582_v31  ;;  %v12771_v8 = vld [vmem:[#allocation20_spill] sm:$0xff] }
 0xc84   :  { %10515 = vpow2.f32 %v9365_v18  ;;  %v3326_v18 = vadd.f32 %v12770_v40, %v11618_v15  ;;  %v3255_v55 = vadd.f32 %v12771_v8, %v11625_v53 }
 0xc85   :  { %10517 = vpow2.f32 %v9366_v46  ;;  %v12772_v46 = vld [vmem:[#allocation24_spill] sm:$0xff] }
 0xc86   :  { %10519 = vpow2.f32 %v9367_v19  ;;  %v3328_v19 = vadd.f32 %v12772_v46, %v11628_v48 }
 0xc87   :  { %10521 = vtanh.f32 %v4581_v32 }
 0xc8e   :  { %v10516_v2 = vpop.eup %10515 }
 0xc8f   :  { %v10518_v4 = vpop.eup %10517  ;;  %v4589_v12 = vadd.f32 1.0, %v10516_v2 }
 0xc90   :  { %v4590_v3 = vadd.f32 1.0, %v10518_v4  ;;  %v10520_v5 = vpop.eup %10519 }
 0xc91   :  { %10523 = vrcp.f32 %v4589_v12  ;;  %v10522_v14 = vpop.eup %10521  ;;  %v4599_v47 = vadd.f32 1.0, %v10520_v5 }
 0xc92   :  { %10525 = vrcp.f32 %v4590_v3 }
 0xc93   :  { %10527 = vrcp.f32 %v4599_v47 }
 0xc9b   :  { %v10524_v37 = vpop.eup %10523 }
 0xc9c   :  { %v10526_v43 = vpop.eup %10525  ;;  %v4603_v42 = vmul.f32 %v10524_v37, %v10522_v14 }
 0xc9d   :  { %v4602_v33 = vmul.f32 %v10526_v43, %v11736_v38  ;;  %v10528_v34 = vpop.eup %10527  ;;  %v12769_v38 = vld [vmem:[#allocation19_spill] sm:$0xff] }
 0xc9e   :  { %v3253_v54 = vadd.f32 %v12769_v38, %v11615_v10 }
 0xc9f   :  { %v11852_v26 = vadd.f32 %v4603_v42, %v4602_v33 }
 0xca1   :  { %10529 = vtanh.f32 %v11852_v26 }
 0xcab   :  { %v10530_v6 = vpop.eup %10529 }
 0xcac   :  { %v11855_v31 = vmul.f32 %v10530_v6, %v10528_v34 }
 0xcae   :  { %v4612_v32 = vpack.c.bf16 %v11855_v31, %v11855_v31 }
 0xcb0   :  { %4838 = vmatmul.mubr.bf16.vlgmr.msra.gmra.mrb[64].mxu0 %v4612_v32  ;;  %4879 = vmatmul.mubr.bf16.vlgmr.msra.gmra.mrb[96].mxu1 %v4612_v32 }
 0xcb1   :  { %5114 = vmatpush1.bf16.msra.mxu0 %v11749_v17  ;;  %5155 = vmatpush1.bf16.msra.mxu1 %v11751_v23 }
 0xcb2   :  { %5115 = vmatprep.subr.bf16.mxu0 %v11757_v22  ;;  %5156 = vmatprep.subr.bf16.mxu1 %v11759_v16 }
 0xcb3   :  { %5145 = vmatprep.mubr.bf16.mxu0 %v12722_v50  ;;  %5186 = vmatprep.mubr.bf16.mxu1 %v12722_v50 }
 0xcb5   :  { %5116 = vmatpush1.bf16.msra.mxu0 %v11761_v11  ;;  %5157 = vmatpush1.bf16.msra.mxu1 %v11763_v28 }
 0xcb6   :  { %5117 = vmatprep.subr.bf16.mxu0 %v11769_v52  ;;  %5158 = vmatprep.subr.bf16.mxu1 %v11771_v9 }
 0xcb9   :  { %5118 = vmatpush1.bf16.msra.mxu0 %v11773_v21  ;;  %5159 = vmatpush1.bf16.msra.mxu1 %v11775_v7 }
 0xcba   :  { %5119 = vmatprep.subr.bf16.mxu0 %v11781_v30  ;;  %5160 = vmatprep.subr.bf16.mxu1 %v11783_v35 }
 0xcbd   :  { %5120 = vmatpush1.bf16.msra.mxu0 %v11785_v51  ;;  %5161 = vmatpush1.bf16.msra.mxu1 %v11787_v0 }
 0xcbe   :  { %5121 = vmatprep.subr.bf16.mxu0 %v11793_v41  ;;  %5162 = vmatprep.subr.bf16.mxu1 %v11795_v45 }
 0xcc1   :  { %5122 = vmatpush1.bf16.msra.mxu0 %v11797_v49  ;;  %5163 = vmatpush1.bf16.msra.mxu1 %v11799_v20 }
 0xcc2   :  { %5123 = vmatprep.subr.bf16.mxu0 %v11803_v56  ;;  %5164 = vmatprep.subr.bf16.mxu1 %v11811_v57 }
 0xcc5   :  { %5124 = vmatpush1.bf16.msra.mxu0 %v11807_v29  ;;  %5165 = vmatpush1.bf16.msra.mxu1 %v11809_v25 }
 0xcc6   :  { %5125 = vmatprep.subr.bf16.mxu0 %v11814_v58  ;;  %5166 = vmatprep.subr.bf16.mxu1 %v11816_v59 }
 0xcc9   :  { %5126 = vmatpush1.bf16.msra.mxu0 %v11821_v60  ;;  %5167 = vmatpush1.bf16.msra.mxu1 %v11823_v61 }
 0xcca   :  { %5127 = vmatprep.subr.bf16.mxu0 %v11827_v62  ;;  %5168 = vmatprep.subr.bf16.mxu1 %v11829_v63 }
 0xccd   :  { %5128 = vmatpush1.bf16.msra.mxu0 %v11833_v44  ;;  %5169 = vmatpush1.bf16.msra.mxu1 %v11835_v1 }
 0xcce   :  { %5421 = vmatprep.subr.bf16.mxu0 %v11745_v36  ;;  %5462 = vmatprep.subr.bf16.mxu1 %v11747_v13 }
 0xd83   :  { %v4839_v2 = vpop.f32.mrb[64].mxu0  ;;  %v4880_v4 = vpop.f32.mrb[96].mxu1 }
 0xd84   :  { %v4887_v12 = vadd.f32 %v4839_v2, %v3253_v54  ;;  %v4889_v3 = vadd.f32 %v4880_v4, %v3326_v18  ;;  %v4841_v5 = vpop.f32.mrb[65].mxu0  ;;  %v4882_v14 = vpop.f32.mrb[97].mxu1 }
 0xd85   :  { %v4888_v37 = vadd.f32 %v4841_v5, %v3255_v55  ;;  %v4890_v43 = vadd.f32 %v4882_v14, %v3328_v19  ;;  %v4843_v42 = vpop.f32.mrb[66].mxu0  ;;  %v4884_v47 = vpop.f32.mrb[98].mxu1 }
 0xd86   :  { %v9400_v33 = vmul.f32 -1.442695, %v4887_v12  ;;  %v4844_v34 = vpop.f32.mrb[67].mxu0  ;;  %v4885_v6 = vpop.f32.mrb[99].mxu1 }
 0xd87   :  { %v9401_v32 = vmul.f32 -1.442695, %v4888_v37  ;;  %v9402_v38 = vmul.f32 -1.442695, %v4890_v43  ;;  %v12775_v6 = vld [vmem:[#allocation27_spill] sm:$0xff] }
 0xd88   :  { %10531 = vpow2.f32 %v9400_v33  ;;  %v12774_v33 = vld [vmem:[#allocation26_spill] sm:$0xff] }
 0xd89   :  { %10533 = vpow2.f32 %v9401_v32  ;;  %v3330_v34 = vadd.f32 %v12774_v33, %v11618_v15  ;;  %v3259_v32 = vadd.f32 %v12775_v6, %v11625_v53 }
 0xd8a   :  { %10535 = vpow2.f32 %v9402_v38  ;;  %v12776_v38 = vld [vmem:[#allocation28_spill] sm:$0xff] }
 0xd8b   :  { %10537 = vtanh.f32 %v4889_v3 }
 0xd92   :  { %v10532_v40 = vpop.eup %10531 }
 0xd93   :  { %v10534_v8 = vpop.eup %10533  ;;  %v4897_v46 = vadd.f32 1.0, %v10532_v40  ;;  %v3332_v40 = vadd.f32 %v12776_v38, %v11628_v48 }
 0xd94   :  { %v4898_v54 = vadd.f32 1.0, %v10534_v8  ;;  %v10536_v18 = vpop.eup %10535 }
 0xd95   :  { %10539 = vrcp.f32 %v4897_v46  ;;  %v10538_v55 = vpop.eup %10537  ;;  %v4907_v12 = vadd.f32 1.0, %v10536_v18 }
 0xd96   :  { %10541 = vrcp.f32 %v4898_v54 }
 0xd97   :  { %10543 = vrcp.f32 %v4907_v12 }
 0xd9f   :  { %v10540_v19 = vpop.eup %10539 }
 0xda0   :  { %v10542_v2 = vpop.eup %10541  ;;  %v4911_v4 = vmul.f32 %v10540_v19, %v10538_v55 }
 0xda1   :  { %v4910_v5 = vmul.f32 %v10542_v2, %v11852_v26  ;;  %v10544_v37 = vpop.eup %10543  ;;  %v12773_v26 = vld [vmem:[#allocation25_spill] sm:$0xff] }
 0xda2   :  { %v3257_v47 = vadd.f32 %v12773_v26, %v11615_v10 }
 0xda3   :  { %v11902_v14 = vadd.f32 %v4911_v4, %v4910_v5 }
 0xda5   :  { %10545 = vtanh.f32 %v11902_v14 }
 0xdaf   :  { %v10546_v43 = vpop.eup %10545 }
 0xdb0   :  { %v11905_v42 = vmul.f32 %v10546_v43, %v10544_v37 }
 0xdb2   :  { %v4920_v3 = vpack.c.bf16 %v11905_v42, %v11905_v42 }
 0xdb4   :  { %5146 = vmatmul.mubr.bf16.vlgmr.msra.gmra.mrb[68].mxu0 %v4920_v3  ;;  %5187 = vmatmul.mubr.bf16.vlgmr.msra.gmra.mrb[100].mxu1 %v4920_v3 }
 0xdb5   :  { %5422 = vmatpush1.bf16.msra.mxu0 %v11749_v17  ;;  %5463 = vmatpush1.bf16.msra.mxu1 %v11751_v23 }
 0xdb6   :  { %5423 = vmatprep.subr.bf16.mxu0 %v11757_v22  ;;  %5464 = vmatprep.subr.bf16.mxu1 %v11759_v16 }
 0xdb7   :  { %5453 = vmatprep.mubr.bf16.mxu0 %v12722_v50  ;;  %5494 = vmatprep.mubr.bf16.mxu1 %v12722_v50 }
 0xdb9   :  { %5424 = vmatpush1.bf16.msra.mxu0 %v11761_v11  ;;  %5465 = vmatpush1.bf16.msra.mxu1 %v11763_v28 }
 0xdba   :  { %5425 = vmatprep.subr.bf16.mxu0 %v11769_v52  ;;  %5466 = vmatprep.subr.bf16.mxu1 %v11771_v9 }
 0xdbd   :  { %5426 = vmatpush1.bf16.msra.mxu0 %v11773_v21  ;;  %5467 = vmatpush1.bf16.msra.mxu1 %v11775_v7 }
 0xdbe   :  { %5427 = vmatprep.subr.bf16.mxu0 %v11781_v30  ;;  %5468 = vmatprep.subr.bf16.mxu1 %v11783_v35 }
 0xdc1   :  { %5428 = vmatpush1.bf16.msra.mxu0 %v11785_v51  ;;  %5469 = vmatpush1.bf16.msra.mxu1 %v11787_v0 }
 0xdc2   :  { %5429 = vmatprep.subr.bf16.mxu0 %v11793_v41  ;;  %5470 = vmatprep.subr.bf16.mxu1 %v11795_v45 }
 0xdc5   :  { %5430 = vmatpush1.bf16.msra.mxu0 %v11797_v49  ;;  %5471 = vmatpush1.bf16.msra.mxu1 %v11799_v20 }
 0xdc6   :  { %5431 = vmatprep.subr.bf16.mxu0 %v11803_v56  ;;  %5472 = vmatprep.subr.bf16.mxu1 %v11811_v57 }
 0xdc9   :  { %5432 = vmatpush1.bf16.msra.mxu0 %v11807_v29  ;;  %5473 = vmatpush1.bf16.msra.mxu1 %v11809_v25 }
 0xdca   :  { %5433 = vmatprep.subr.bf16.mxu0 %v11814_v58  ;;  %5474 = vmatprep.subr.bf16.mxu1 %v11816_v59 }
 0xdcd   :  { %5434 = vmatpush1.bf16.msra.mxu0 %v11821_v60  ;;  %5475 = vmatpush1.bf16.msra.mxu1 %v11823_v61 }
 0xdce   :  { %5435 = vmatprep.subr.bf16.mxu0 %v11827_v62  ;;  %5476 = vmatprep.subr.bf16.mxu1 %v11829_v63 }
 0xdd1   :  { %5436 = vmatpush1.bf16.msra.mxu0 %v11833_v44  ;;  %5477 = vmatpush1.bf16.msra.mxu1 %v11835_v1 }
 0xdd2   :  { %5729 = vmatprep.subr.bf16.mxu0 %v11745_v36  ;;  %5770 = vmatprep.subr.bf16.mxu1 %v11747_v13 }
 0xe87   :  { %v5147_v8 = vpop.f32.mrb[68].mxu0  ;;  %v5188_v46 = vpop.f32.mrb[100].mxu1 }
 0xe88   :  { %v5195_v54 = vadd.f32 %v5147_v8, %v3257_v47  ;;  %v5197_v18 = vadd.f32 %v5188_v46, %v3330_v34  ;;  %v5149_v55 = vpop.f32.mrb[69].mxu0  ;;  %v5190_v36 = vpop.f32.mrb[101].mxu1 }
 0xe89   :  { %v5196_v19 = vadd.f32 %v5149_v55, %v3259_v32  ;;  %v5198_v13 = vadd.f32 %v5190_v36, %v3332_v40  ;;  %v5151_v2 = vpop.f32.mrb[70].mxu0  ;;  %v5192_v4 = vpop.f32.mrb[102].mxu1 }
 0xe8a   :  { %v9435_v12 = vmul.f32 -1.442695, %v5195_v54  ;;  %v5152_v5 = vpop.f32.mrb[71].mxu0  ;;  %v5193_v37 = vpop.f32.mrb[103].mxu1 }
 0xe8b   :  { %v9436_v43 = vmul.f32 -1.442695, %v5196_v19  ;;  %v9437_v3 = vmul.f32 -1.442695, %v5198_v13 }
 0xe8c   :  { %10547 = vpow2.f32 %v9435_v12 }
 0xe8d   :  { %10549 = vpow2.f32 %v9436_v43 }
 0xe8e   :  { %10551 = vpow2.f32 %v9437_v3 }
 0xe8f   :  { %10553 = vtanh.f32 %v5197_v18 }
 0xe96   :  { %v10548_v26 = vpop.eup %10547 }
 0xe97   :  { %v10550_v33 = vpop.eup %10549  ;;  %v5205_v6 = vadd.f32 1.0, %v10548_v26 }
 0xe98   :  { %v5206_v47 = vadd.f32 1.0, %v10550_v33  ;;  %v10552_v34 = vpop.eup %10551 }
 0xe99   :  { %10555 = vrcp.f32 %v5205_v6  ;;  %v10554_v32 = vpop.eup %10553  ;;  %v5215_v46 = vadd.f32 1.0, %v10552_v34  ;;  %v10187_v6 = vld [vmem:[#allocation4 + $0x200] ss:$16 sps:$4 sm:$0xff]  }
 0xe9a   :  { %10557 = vrcp.f32 %v5206_v47  ;;  %v10190_v47 = vld [vmem:[#allocation4 + $0x208] ss:$16 sps:$4 sm:$0xff]  }
 0xe9b   :  { %10559 = vrcp.f32 %v5215_v46  ;;  %v10201_v46 = vld [vmem:[#allocation4 + $0x244] ss:$16 sps:$4 sm:$0xff]  }
 0xea3   :  { %v10556_v38 = vpop.eup %10555 }
 0xea4   :  { %v10558_v40 = vpop.eup %10557  ;;  %v5219_v8 = vmul.f32 %v10556_v38, %v10554_v32  ;;  %v10195_v32 = vld [vmem:[#allocation4 + $0x224] ss:$16 sps:$4 sm:$0xff]   ;;  %v10198_v38 = vld [vmem:[#allocation4 + $0x22c] ss:$16 sps:$4 sm:$0xff]  }
 0xea5   :  { %v5218_v54 = vmul.f32 %v10558_v40, %v11902_v14  ;;  %v10560_v36 = vpop.eup %10559  ;;  %v10193_v40 = vld [vmem:[#allocation4 + $0x220] ss:$16 sps:$4 sm:$0xff]  }
 0xea7   :  { %v11952_v55 = vadd.f32 %v5219_v8, %v5218_v54  ;;  %v10196_v8 = vld [vmem:[#allocation4 + $0x228] ss:$16 sps:$4 sm:$0xff]   ;;  %v10204_v54 = vld [vmem:[#allocation4 + $0x24c] ss:$16 sps:$4 sm:$0xff]  }
 0xea9   :  { %10561 = vtanh.f32 %v11952_v55 }
 0xeb3   :  { %v10562_v19 = vpop.eup %10561 }
 0xeb4   :  { %v11955_v13 = vmul.f32 %v10562_v19, %v10560_v36  ;;  %v10202_v36 = vld [vmem:[#allocation4 + $0x248] ss:$16 sps:$4 sm:$0xff]   ;;  %v10207_v19 = vld [vmem:[#allocation4 + $0x264] ss:$16 sps:$4 sm:$0xff]  }
 0xeb6   :  { %v5228_v18 = vpack.c.bf16 %v11955_v13, %v11955_v13 }
 0xeb8   :  { %5454 = vmatmul.mubr.bf16.vlgmr.msra.gmra.mrb[72].mxu0 %v5228_v18  ;;  %5495 = vmatmul.mubr.bf16.vlgmr.msra.gmra.mrb[104].mxu1 %v5228_v18  ;;  %v10210_v18 = vld [vmem:[#allocation4 + $0x26c] ss:$16 sps:$4 sm:$0xff]  }
 0xeb9   :  { %5730 = vmatpush1.bf16.msra.mxu0 %v11749_v17  ;;  %5771 = vmatpush1.bf16.msra.mxu1 %v11751_v23  ;;  %v10189_v17 = vld [vmem:[#allocation4 + $0x204] ss:$16 sps:$4 sm:$0xff]   ;;  %v10192_v23 = vld [vmem:[#allocation4 + $0x20c] ss:$16 sps:$4 sm:$0xff]  }
 0xeba   :  { %5731 = vmatprep.subr.bf16.mxu0 %v11757_v22  ;;  %5772 = vmatprep.subr.bf16.mxu1 %v11759_v16  ;;  %v12777_v22 = vld [vmem:[#allocation29_spill] sm:$0xff] }
 0xebb   :  { %5761 = vmatprep.mubr.bf16.mxu0 %v12722_v50  ;;  %5802 = vmatprep.mubr.bf16.mxu1 %v12722_v50  ;;  %v3263_v16 = vadd.f32 %v12777_v22, %v11615_v10  ;;  %v10213_v22 = vld [vmem:[#allocation4 + $0x284] ss:$16 sps:$4 sm:$0xff]  }
 0xebd   :  { %5732 = vmatpush1.bf16.msra.mxu0 %v11761_v11  ;;  %5773 = vmatpush1.bf16.msra.mxu1 %v11763_v28  ;;  %v12778_v11 = vld [vmem:[#allocation30_spill] sm:$0xff] }
 0xebe   :  { %5733 = vmatprep.subr.bf16.mxu0 %v11769_v52  ;;  %5774 = vmatprep.subr.bf16.mxu1 %v11771_v9  ;;  %v3336_v28 = vadd.f32 %v12778_v11, %v11618_v15  ;;  %v12779_v52 = vld [vmem:[#allocation31_spill] sm:$0xff]  ;;  %v10211_v11 = vld [vmem:[#allocation4 + $0x280] ss:$16 sps:$4 sm:$0xff]  }
 0xebf   :  { %v3265_v9 = vadd.f32 %v12779_v52, %v11625_v53  ;;  %v10219_v52 = vld [vmem:[#allocation4 + $0x2a4] ss:$16 sps:$4 sm:$0xff]  }
 0xec1   :  { %5734 = vmatpush1.bf16.msra.mxu0 %v11773_v21  ;;  %5775 = vmatpush1.bf16.msra.mxu1 %v11775_v7  ;;  %v12780_v21 = vld [vmem:[#allocation32_spill] sm:$0xff] }
 0xec2   :  { %5735 = vmatprep.subr.bf16.mxu0 %v11781_v30  ;;  %5776 = vmatprep.subr.bf16.mxu1 %v11783_v35  ;;  %v3338_v7 = vadd.f32 %v12780_v21, %v11628_v48  ;;  %v10217_v21 = vld [vmem:[#allocation4 + $0x2a0] ss:$16 sps:$4 sm:$0xff]  }
 0xec5   :  { %5736 = vmatpush1.bf16.msra.mxu0 %v11785_v51  ;;  %5777 = vmatpush1.bf16.msra.mxu1 %v11787_v0 }
 0xec6   :  { %5737 = vmatprep.subr.bf16.mxu0 %v11793_v41  ;;  %5778 = vmatprep.subr.bf16.mxu1 %v11795_v45 }
 0xec9   :  { %5738 = vmatpush1.bf16.msra.mxu0 %v11797_v49  ;;  %5779 = vmatpush1.bf16.msra.mxu1 %v11799_v20 }
 0xeca   :  { %5739 = vmatprep.subr.bf16.mxu0 %v11803_v56  ;;  %5780 = vmatprep.subr.bf16.mxu1 %v11811_v57 }
 0xecd   :  { %5740 = vmatpush1.bf16.msra.mxu0 %v11807_v29  ;;  %5781 = vmatpush1.bf16.msra.mxu1 %v11809_v25 }
 0xece   :  { %5741 = vmatprep.subr.bf16.mxu0 %v11814_v58  ;;  %5782 = vmatprep.subr.bf16.mxu1 %v11816_v59 }
 0xed1   :  { %5742 = vmatpush1.bf16.msra.mxu0 %v11821_v60  ;;  %5783 = vmatpush1.bf16.msra.mxu1 %v11823_v61 }
 0xed2   :  { %5743 = vmatprep.subr.bf16.mxu0 %v11827_v62  ;;  %5784 = vmatprep.subr.bf16.mxu1 %v11829_v63 }
 0xed5   :  { %5744 = vmatpush1.bf16.msra.mxu0 %v11833_v44  ;;  %5785 = vmatpush1.bf16.msra.mxu1 %v11835_v1 }
 0xed6   :  { %6068 = vmatprep.subr.bf16.mxu0 %v10189_v17  ;;  %6141 = vmatprep.subr.bf16.mxu1 %v10192_v23  ;;  %v10205_v17 = vld [vmem:[#allocation4 + $0x260] ss:$16 sps:$4 sm:$0xff]   ;;  %v10208_v23 = vld [vmem:[#allocation4 + $0x268] ss:$16 sps:$4 sm:$0xff]  }
 0xf8b   :  { %v5455_v30 = vpop.f32.mrb[72].mxu0  ;;  %v5496_v35 = vpop.f32.mrb[104].mxu1 }
 0xf8c   :  { %v5503_v51 = vadd.f32 %v5455_v30, %v3263_v16  ;;  %v5505_v0 = vadd.f32 %v5496_v35, %v3336_v28  ;;  %v5457_v41 = vpop.f32.mrb[73].mxu0  ;;  %v5498_v45 = vpop.f32.mrb[105].mxu1  ;;  %v10216_v16 = vld [vmem:[#allocation4 + $0x28c] ss:$16 sps:$4 sm:$0xff]   ;;  %v10214_v28 = vld [vmem:[#allocation4 + $0x288] ss:$16 sps:$4 sm:$0xff]  }
 0xf8d   :  { %v5504_v49 = vadd.f32 %v5457_v41, %v3265_v9  ;;  %v5506_v20 = vadd.f32 %v5498_v45, %v3338_v7  ;;  %v5459_v56 = vpop.f32.mrb[74].mxu0  ;;  %v5500_v29 = vpop.f32.mrb[106].mxu1  ;;  %v10222_v9 = vld [vmem:[#allocation4 + $0x2ac] ss:$16 sps:$4 sm:$0xff]   ;;  %v10220_v7 = vld [vmem:[#allocation4 + $0x2a8] ss:$16 sps:$4 sm:$0xff]  }
 0xf8e   :  { %v9470_v25 = vmul.f32 -1.442695, %v5503_v51  ;;  %v5460_v57 = vpop.f32.mrb[75].mxu0  ;;  %v5501_v58 = vpop.f32.mrb[107].mxu1  ;;  %v10225_v30 = vld [vmem:[#allocation4 + $0x2c4] ss:$16 sps:$4 sm:$0xff]   ;;  %v5848_v56 = vpack.c.bf16 %v11691_v24, %v11641_v27  ;;  %v5849_v29 = vpack.c.bf16 %v11855_v31, %v11739_v39 }
 0xf8f   :  { %v9471_v59 = vmul.f32 -1.442695, %v5504_v49  ;;  %v9472_v60 = vmul.f32 -1.442695, %v5506_v20  ;;  %v10228_v35 = vld [vmem:[#allocation4 + $0x2cc] ss:$16 sps:$4 sm:$0xff]  }
 0xf90   :  { %10563 = vpow2.f32 %v9470_v25  ;;  %v10223_v51 = vld [vmem:[#allocation4 + $0x2c0] ss:$16 sps:$4 sm:$0xff]   ;;  %v10231_v41 = vld [vmem:[#allocation4 + $0x2e4] ss:$16 sps:$4 sm:$0xff]   ;;  %v10234_v45 = vld [vmem:[#allocation4 + $0x2ec] ss:$16 sps:$4 sm:$0xff]   ;;  %v5850_v25 = vpack.c.bf16 %v11955_v13, %v11905_v42 }
 0xf91   :  { %10565 = vpow2.f32 %v9471_v59  ;;  %v10229_v49 = vld [vmem:[#allocation4 + $0x2e0] ss:$16 sps:$4 sm:$0xff]   ;;  %v10232_v20 = vld [vmem:[#allocation4 + $0x2e8] ss:$16 sps:$4 sm:$0xff]   ;;  %v12021_v27 = vld [vmem:[#allocation6 + $0x204] ss:$16 sps:$4 sm:$0xff]  }
 0xf92   :  { %10567 = vpow2.f32 %v9472_v60  ;;  %v12023_v24 = vld [vmem:[#allocation6 + $0x20c] ss:$16 sps:$4 sm:$0xff]   ;;  %v12025_v39 = vld [vmem:[#allocation6 + $0x200] ss:$16 sps:$4 sm:$0xff]   ;;  %v12027_v31 = vld [vmem:[#allocation6 + $0x208] ss:$16 sps:$4 sm:$0xff]  }
 0xf93   :  { %10569 = vtanh.f32 %v5505_v0  ;;  %v10226_v0 = vld [vmem:[#allocation4 + $0x2c8] ss:$16 sps:$4 sm:$0xff]   ;;  %v12033_v42 = vld [vmem:[#allocation6 + $0x224] ss:$16 sps:$4 sm:$0xff]   ;;  %v12035_v13 = vld [vmem:[#allocation6 + $0x22c] ss:$16 sps:$4 sm:$0xff]  }
 0xf94   :  { %v12037_v57 = vld [vmem:[#allocation6 + $0x220] ss:$16 sps:$4 sm:$0xff]   ;;  %v12039_v58 = vld [vmem:[#allocation6 + $0x228] ss:$16 sps:$4 sm:$0xff]   ;;  %v12045_v59 = vld [vmem:[#allocation6 + $0x244] ss:$16 sps:$4 sm:$0xff]  }
 0xf95   :  { %v12047_v60 = vld [vmem:[#allocation6 + $0x24c] ss:$16 sps:$4 sm:$0xff]  }
 0xf9a   :  { %v10564_v61 = vpop.eup %10563 }
 0xf9b   :  { %v10566_v62 = vpop.eup %10565  ;;  %v5513_v63 = vadd.f32 1.0, %v10564_v61  ;;  %v12049_v61 = vld [vmem:[#allocation6 + $0x240] ss:$16 sps:$4 sm:$0xff]  }
 0xf9c   :  { %v5514_v44 = vadd.f32 1.0, %v10566_v62  ;;  %v10568_v1 = vpop.eup %10567  ;;  %v12051_v62 = vld [vmem:[#allocation6 + $0x248] ss:$16 sps:$4 sm:$0xff]  }
 0xf9d   :  { %10571 = vrcp.f32 %v5513_v63  ;;  %v10570_v14 = vpop.eup %10569  ;;  %v5523_v5 = vadd.f32 1.0, %v10568_v1  ;;  %v12057_v63 = vld [vmem:[#allocation6 + $0x260] ss:$16 sps:$4 sm:$0xff]   ;;  %v12061_v1 = vld [vmem:[#allocation6 + $0x268] ss:$16 sps:$4 sm:$0xff]  }
 0xf9e   :  { %10573 = vrcp.f32 %v5514_v44  ;;  %v12059_v44 = vld [vmem:[#allocation6 + $0x264] ss:$16 sps:$4 sm:$0xff]  }
 0xf9f   :  { %10575 = vrcp.f32 %v5523_v5  ;;  %v12075_v5 = vld [vmem:[#allocation6 + $0x288] ss:$16 sps:$4 sm:$0xff]  }
 0xfa7   :  { %v10572_v2 = vpop.eup %10571 }
 0xfa8   :  { %v10574_v4 = vpop.eup %10573  ;;  %v5527_v12 = vmul.f32 %v10572_v2, %v10570_v14  ;;  %v12063_v14 = vld [vmem:[#allocation6 + $0x26c] ss:$16 sps:$4 sm:$0xff]   ;;  %v12069_v2 = vld [vmem:[#allocation6 + $0x284] ss:$16 sps:$4 sm:$0xff]  }
 0xfa9   :  { %v5526_v37 = vmul.f32 %v10574_v4, %v11952_v55  ;;  %v10576_v3 = vpop.eup %10575  ;;  %v10199_v55 = vld [vmem:[#allocation4 + $0x240] ss:$16 sps:$4 sm:$0xff]   ;;  %v12071_v4 = vld [vmem:[#allocation6 + $0x28c] ss:$16 sps:$4 sm:$0xff]  }
 0xfab   :  { %v12000_v43 = vadd.f32 %v5527_v12, %v5526_v37  ;;  %v12073_v12 = vld [vmem:[#allocation6 + $0x280] ss:$16 sps:$4 sm:$0xff]  }
 0xfac   :  { %v12081_v37 = vld [vmem:[#allocation6 + $0x2a0] ss:$16 sps:$4 sm:$0xff]  }
 0xfad   :  { %10577 = vtanh.f32 %v12000_v43 }
 0xfb7   :  { %v10578_v26 = vpop.eup %10577 }
 0xfb8   :  { %v12003_v33 = vmul.f32 %v10578_v26, %v10576_v3  ;;  %v12083_v3 = vld [vmem:[#allocation6 + $0x2a4] ss:$16 sps:$4 sm:$0xff]   ;;  %v12085_v26 = vld [vmem:[#allocation6 + $0x2a8] ss:$16 sps:$4 sm:$0xff]  }
 0xfba   :  { %v5536_v34 = vpack.c.bf16 %v12003_v33, %v12003_v33 }
 0xfbc   :  { %5762 = vmatmul.mubr.bf16.vlgmr.msra.gmra.mrb[76].mxu0 %v5536_v34  ;;  %5803 = vmatmul.mubr.bf16.vlgmr.msra.gmra.mrb[108].mxu1 %v5536_v34  ;;  %v12095_v34 = vld [vmem:[#allocation6 + $0x2cc] ss:$16 sps:$4 sm:$0xff]  }
 0xfbd   :  { %6069 = vmatpush1.bf16.msra.mxu0 %v10187_v6  ;;  %6142 = vmatpush1.bf16.msra.mxu1 %v10190_v47  ;;  %v12087_v6 = vld [vmem:[#allocation6 + $0x2ac] ss:$16 sps:$4 sm:$0xff]   ;;  %v12093_v47 = vld [vmem:[#allocation6 + $0x2c4] ss:$16 sps:$4 sm:$0xff]  }
 0xfbe   :  { %6070 = vmatprep.subr.bf16.mxu0 %v10195_v32  ;;  %6143 = vmatprep.subr.bf16.mxu1 %v10198_v38  ;;  %v12097_v32 = vld [vmem:[#allocation6 + $0x2c0] ss:$16 sps:$4 sm:$0xff]   ;;  %v12099_v38 = vld [vmem:[#allocation6 + $0x2c8] ss:$16 sps:$4 sm:$0xff]  }
 0xfbf   :  { %6100 = vmatprep.mubr.bf16.mxu0 %v12722_v50  ;;  %6173 = vmatprep.mubr.bf16.mxu1 %v12722_v50 }
 0xfc1   :  { %6071 = vmatpush1.bf16.msra.mxu0 %v10193_v40  ;;  %6144 = vmatpush1.bf16.msra.mxu1 %v10196_v8  ;;  %v12105_v40 = vld [vmem:[#allocation6 + $0x2e0] ss:$16 sps:$4 sm:$0xff]   ;;  %v12107_v8 = vld [vmem:[#allocation6 + $0x2e4] ss:$16 sps:$4 sm:$0xff]  }
 0xfc2   :  { %6072 = vmatprep.subr.bf16.mxu0 %v10201_v46  ;;  %6145 = vmatprep.subr.bf16.mxu1 %v10204_v54  ;;  %v12109_v46 = vld [vmem:[#allocation6 + $0x2e8] ss:$16 sps:$4 sm:$0xff]   ;;  %v12111_v54 = vld [vmem:[#allocation6 + $0x2ec] ss:$16 sps:$4 sm:$0xff]  }
 0xfc5   :  { %6073 = vmatpush1.bf16.msra.mxu0 %v10199_v55  ;;  %6146 = vmatpush1.bf16.msra.mxu1 %v10202_v36  ;;  %v12781_v55 = vld [vmem:[#allocation33_spill] sm:$0xff] }
 0xfc6   :  { %6074 = vmatprep.subr.bf16.mxu0 %v10207_v19  ;;  %6147 = vmatprep.subr.bf16.mxu1 %v10210_v18  ;;  %v3267_v36 = vadd.f32 %v12781_v55, %v11615_v10  ;;  %v12782_v19 = vld [vmem:[#allocation34_spill] sm:$0xff] }
 0xfc7   :  { %v3340_v18 = vadd.f32 %v12782_v19, %v11618_v15 }
 0xfc9   :  { %6075 = vmatpush1.bf16.msra.mxu0 %v10205_v17  ;;  %6148 = vmatpush1.bf16.msra.mxu1 %v10208_v23  ;;  %v12783_v17 = vld [vmem:[#allocation35_spill] sm:$0xff] }
 0xfca   :  { %6076 = vmatprep.subr.bf16.mxu0 %v10213_v22  ;;  %6149 = vmatprep.subr.bf16.mxu1 %v10216_v16  ;;  %v3269_v23 = vadd.f32 %v12783_v17, %v11625_v53  ;;  %v12784_v22 = vld [vmem:[#allocation36_spill] sm:$0xff] }
 0xfcb   :  { %v3342_v16 = vadd.f32 %v12784_v22, %v11628_v48 }
 0xfcd   :  { %6077 = vmatpush1.bf16.msra.mxu0 %v10211_v11  ;;  %6150 = vmatpush1.bf16.msra.mxu1 %v10214_v28 }
 0xfce   :  { %6078 = vmatprep.subr.bf16.mxu0 %v10219_v52  ;;  %6151 = vmatprep.subr.bf16.mxu1 %v10222_v9 }
 0xfd1   :  { %6079 = vmatpush1.bf16.msra.mxu0 %v10217_v21  ;;  %6152 = vmatpush1.bf16.msra.mxu1 %v10220_v7 }
 0xfd2   :  { %6080 = vmatprep.subr.bf16.mxu0 %v10225_v30  ;;  %6153 = vmatprep.subr.bf16.mxu1 %v10228_v35 }
 0xfd5   :  { %6081 = vmatpush1.bf16.msra.mxu0 %v10223_v51  ;;  %6154 = vmatpush1.bf16.msra.mxu1 %v10226_v0 }
 0xfd6   :  { %6082 = vmatprep.subr.bf16.mxu0 %v10231_v41  ;;  %6155 = vmatprep.subr.bf16.mxu1 %v10234_v45 }
 0xfd9   :  { %6083 = vmatpush1.bf16.msra.mxu0 %v10229_v49  ;;  %6156 = vmatpush1.bf16.msra.mxu1 %v10232_v20 }
 0xfda   :  { %6443 = vmatprep.subr.bf16.mxu0 %v12021_v27  ;;  %6484 = vmatprep.subr.bf16.mxu1 %v12023_v24 }
 0xfdc   :  { %6101 = vmatmul.mubr.bf16.vlgmr.msra.gmra.mrb[80].mxu0 %v5848_v56  ;;  %6174 = vmatmul.mubr.bf16.vlgmr.msra.gmra.mrb[112].mxu1 %v5848_v56 }
 0xfdd   :  { %6110 = vmatprep.mubr.bf16.mxu0 %v12722_v50  ;;  %6183 = vmatprep.mubr.bf16.mxu1 %v12722_v50 }
 0xfde   :  { %6444 = vmatpush1.bf16.msra.mxu0 %v12025_v39  ;;  %6485 = vmatpush1.bf16.msra.mxu1 %v12027_v31 }
 0xfdf   :  { %6445 = vmatprep.subr.bf16.mxu0 %v12033_v42  ;;  %6486 = vmatprep.subr.bf16.mxu1 %v12035_v13 }
 0xfe2   :  { %6446 = vmatpush1.bf16.msra.mxu0 %v12037_v57  ;;  %6487 = vmatpush1.bf16.msra.mxu1 %v12039_v58 }
 0xfe3   :  { %6447 = vmatprep.subr.bf16.mxu0 %v12045_v59  ;;  %6488 = vmatprep.subr.bf16.mxu1 %v12047_v60 }
 0xfe4   :  { %6111 = vmatmul.mubr.bf16.gmra.mrb[84].mxu0 %v5849_v29  ;;  %6184 = vmatmul.mubr.bf16.gmra.mrb[116].mxu1 %v5849_v29 }
 0xfe5   :  { %6120 = vmatprep.mubr.bf16.mxu0 %v12722_v50  ;;  %6193 = vmatprep.mubr.bf16.mxu1 %v12722_v50 }
 0xfe6   :  { %6448 = vmatpush1.bf16.msra.mxu0 %v12049_v61  ;;  %6489 = vmatpush1.bf16.msra.mxu1 %v12051_v62 }
 0xfe7   :  { %6449 = vmatprep.subr.bf16.mxu0 %v12059_v44  ;;  %6490 = vmatprep.subr.bf16.mxu1 %v12063_v14 }
 0xfea   :  { %6450 = vmatpush1.bf16.msra.mxu0 %v12057_v63  ;;  %6491 = vmatpush1.bf16.msra.mxu1 %v12061_v1 }
 0xfeb   :  { %6451 = vmatprep.subr.bf16.mxu0 %v12069_v2  ;;  %6492 = vmatprep.subr.bf16.mxu1 %v12071_v4 }
 0xfec   :  { %6121 = vmatmul.mubr.bf16.gmra.mrb[88].mxu0 %v5850_v25  ;;  %6194 = vmatmul.mubr.bf16.gmra.mrb[120].mxu1 %v5850_v25 }
 0xfed   :  { %6130 = vmatprep.mubr.bf16.mxu0 %v12722_v50  ;;  %6203 = vmatprep.mubr.bf16.mxu1 %v12722_v50 }
 0xfee   :  { %6452 = vmatpush1.bf16.msra.mxu0 %v12073_v12  ;;  %6493 = vmatpush1.bf16.msra.mxu1 %v12075_v5 }
 0xfef   :  { %6453 = vmatprep.subr.bf16.mxu0 %v12083_v3  ;;  %6494 = vmatprep.subr.bf16.mxu1 %v12087_v6 }
 0xff2   :  { %6454 = vmatpush1.bf16.msra.mxu0 %v12081_v37  ;;  %6495 = vmatpush1.bf16.msra.mxu1 %v12085_v26 }
 0xff3   :  { %6455 = vmatprep.subr.bf16.mxu0 %v12093_v47  ;;  %6496 = vmatprep.subr.bf16.mxu1 %v12095_v34 }
 0xff6   :  { %6456 = vmatpush1.bf16.msra.mxu0 %v12097_v32  ;;  %6497 = vmatpush1.bf16.msra.mxu1 %v12099_v38 }
 0xff7   :  { %6457 = vmatprep.subr.bf16.mxu0 %v12107_v8  ;;  %6498 = vmatprep.subr.bf16.mxu1 %v12111_v54 }
 0xffa   :  { %6458 = vmatpush1.bf16.msra.mxu0 %v12105_v40  ;;  %6499 = vmatpush1.bf16.msra.mxu1 %v12109_v46 }
 0xffb   :  { %6751 = vmatprep.subr.bf16.mxu0 %v12021_v27  ;;  %6792 = vmatprep.subr.bf16.mxu1 %v12023_v24 }
0x108f   :  { %v5763_v11 = vpop.f32.mrb[76].mxu0  ;;  %v5804_v28 = vpop.f32.mrb[108].mxu1 }
0x1090   :  { %v5811_v52 = vadd.f32 %v5763_v11, %v3267_v36  ;;  %v5813_v9 = vadd.f32 %v5804_v28, %v3340_v18  ;;  %v5765_v21 = vpop.f32.mrb[77].mxu0  ;;  %v5806_v7 = vpop.f32.mrb[109].mxu1 }
0x1091   :  { %v5812_v30 = vadd.f32 %v5765_v21, %v3269_v23  ;;  %v5814_v35 = vadd.f32 %v5806_v7, %v3342_v16  ;;  %v5767_v51 = vpop.f32.mrb[78].mxu0  ;;  %v5808_v0 = vpop.f32.mrb[110].mxu1 }
0x1092   :  { %v9505_v10 = vmul.f32 -1.442695, %v5811_v52  ;;  %v5768_v41 = vpop.f32.mrb[79].mxu0  ;;  %v5809_v45 = vpop.f32.mrb[111].mxu1 }
0x1093   :  { %v9506_v15 = vmul.f32 -1.442695, %v5812_v30  ;;  %v9507_v53 = vmul.f32 -1.442695, %v5814_v35 }
0x1094   :  { %10579 = vpow2.f32 %v9505_v10 }
0x1095   :  { %10581 = vpow2.f32 %v9506_v15 }
0x1096   :  { %10583 = vpow2.f32 %v9507_v53 }
0x1097   :  { %10585 = vtanh.f32 %v5813_v9 }
0x109e   :  { %v10580_v49 = vpop.eup %10579 }
0x109f   :  { %v10582_v20 = vpop.eup %10581  ;;  %v5821_v48 = vadd.f32 1.0, %v10580_v49 }
0x10a0   :  { %v5822_v56 = vadd.f32 1.0, %v10582_v20  ;;  %v10584_v29 = vpop.eup %10583 }
0x10a1   :  { %10587 = vrcp.f32 %v5821_v48  ;;  %v10586_v25 = vpop.eup %10585  ;;  %v5831_v18 = vadd.f32 1.0, %v10584_v29 }
0x10a2   :  { %10589 = vrcp.f32 %v5822_v56 }
0x10a3   :  { %10591 = vrcp.f32 %v5831_v18  ;;  %v9508_v18 = vld [vmem:[%s12693_s3 + $0x8] sm:$0xf] }
0x10ab   :  { %v10588_v55 = vpop.eup %10587 }
0x10ac   :  { %v10590_v36 = vpop.eup %10589  ;;  %v5835_v19 = vmul.f32 %v10588_v55, %v10586_v25 }
0x10ad   :  { %v5834_v17 = vmul.f32 %v10590_v36, %v12000_v43  ;;  %v10592_v41 = vpop.eup %10591 }
0x10af   :  { %v12128_v23 = vpop.f32.mrb[80].mxu0  ;;  %v12130_v22 = vpop.f32.mrb[112].mxu1  ;;  %v5836_v16 = vadd.f32 %v5835_v19, %v5834_v17 }
0x10b0   :  { %v12132_v11 = vpop.f32.mrb[81].mxu0  ;;  %v12134_v28 = vpop.f32.mrb[113].mxu1 }
0x10b1   :  { %v12136_v52 = vpop.f32.mrb[82].mxu0  ;;  %v12138_v9 = vpop.f32.mrb[114].mxu1  ;;  %10593 = vtanh.f32 %v5836_v16 }
0x10b2   :  { %v12140_v21 = vpop.f32.mrb[83].mxu0  ;;  %v12142_v7 = vpop.f32.mrb[115].mxu1 }
0x10b7   :  { %v12144_v43 = vpop.f32.mrb[84].mxu0  ;;  %v12146_v30 = vpop.f32.mrb[116].mxu1 }
0x10b8   :  { %12785 = vst [vmem:[#allocation17_spill] sm:$0xff] %v12146_v30  ;;  %v12148_v35 = vpop.f32.mrb[85].mxu0  ;;  %v12150_v51 = vpop.f32.mrb[117].mxu1 }
0x10b9   :  { %12786 = vst [vmem:[#allocation12_spill] sm:$0xff] %v12148_v35  ;;  %12787 = vst [vmem:[#allocation18_spill] sm:$0xff] %v12150_v51  ;;  %v12152_v0 = vpop.f32.mrb[86].mxu0  ;;  %v12154_v10 = vpop.f32.mrb[118].mxu1 }
0x10ba   :  { %12788 = vst [vmem:[#allocation21_spill] sm:$0xff] %v12152_v0  ;;  %12789 = vst [vmem:[#allocation22_spill] sm:$0xff] %v12154_v10  ;;  %v12156_v45 = vpop.f32.mrb[87].mxu0  ;;  %v12158_v15 = vpop.f32.mrb[119].mxu1 }
0x10bb   :  { %12790 = vst [vmem:[#allocation23_spill] sm:$0xff] %v12156_v45  ;;  %12791 = vst [vmem:[#allocation13_spill] sm:$0xff] %v12158_v15  ;;  %v10594_v53 = vpop.eup %10593 }
0x10bc   :  { %v5838_v49 = vmul.f32 %v10594_v53, %v10592_v41 }
0x10be   :  { %v5851_v20 = vpack.c.bf16 %v5838_v49, %v12003_v33 }
0x10bf   :  { %v12161_v48 = vpop.f32.mrb[88].mxu0  ;;  %v12163_v56 = vpop.f32.mrb[120].mxu1 }
0x10c0   :  { %12792 = vst [vmem:[#allocation19_spill] sm:$0xff] %v12161_v48  ;;  %12793 = vst [vmem:[#allocation14_spill] sm:$0xff] %v12163_v56  ;;  %v12165_v29 = vpop.f32.mrb[89].mxu0  ;;  %v12167_v25 = vpop.f32.mrb[121].mxu1  ;;  %6131 = vmatmul.mubr.bf16.gmra.mrb[92].mxu0 %v5851_v20  ;;  %6204 = vmatmul.mubr.bf16.gmra.mrb[124].mxu1 %v5851_v20 }
0x10c1   :  { %12794 = vst [vmem:[#allocation20_spill] sm:$0xff] %v12165_v29  ;;  %12795 = vst [vmem:[#allocation24_spill] sm:$0xff] %v12167_v25  ;;  %v12169_v55 = vpop.f32.mrb[90].mxu0  ;;  %v12171_v36 = vpop.f32.mrb[122].mxu1  ;;  %6475 = vmatprep.mubr.bf16.mxu0 %v12722_v50  ;;  %6516 = vmatprep.mubr.bf16.mxu1 %v12722_v50 }
0x10c2   :  { %12796 = vst [vmem:[#allocation25_spill] sm:$0xff] %v12169_v55  ;;  %12797 = vst [vmem:[#allocation26_spill] sm:$0xff] %v12171_v36  ;;  %v12175_v19 = vpop.f32.mrb[91].mxu0  ;;  %v12177_v33 = vpop.f32.mrb[123].mxu1  ;;  %v12807_v36 = vld [vmem:[#allocation15_spill] sm:$0xff] }
0x10c3   :  { %12798 = vst [vmem:[#allocation27_spill] sm:$0xff] %v12175_v19  ;;  %12799 = vst [vmem:[#allocation28_spill] sm:$0xff] %v12177_v33  ;;  %v12806_v33 = vld [vmem:[#allocation10_spill] sm:$0xff]  ;;  %v12234_v55 = vrot.slane %v9508_v18, %v12807_v36 }
0x10c4   :  { %v12231_v19 = vrot.slane %v9508_v18, %v12806_v33 }
0x10c5   :  { %v6176_v33 = vadd.f32 %v12130_v22, %v12234_v55 }
0x10c8   :  { %6476 = vmatmul.mubr.bf16.vlgmr.msra.gmra.mrb[96].mxu0 %v12722_v50  ;;  %6517 = vmatmul.mubr.bf16.vlgmr.msra.gmra.mrb[128].mxu1 %v12722_v50 }
0x10c9   :  { %6752 = vmatpush1.bf16.msra.mxu0 %v12025_v39  ;;  %6793 = vmatpush1.bf16.msra.mxu1 %v12027_v31 }
0x10ca   :  { %6753 = vmatprep.subr.bf16.mxu0 %v12033_v42  ;;  %6794 = vmatprep.subr.bf16.mxu1 %v12035_v13 }
0x10cb   :  { %6783 = vmatprep.mubr.bf16.mxu0 %v12722_v50  ;;  %6824 = vmatprep.mubr.bf16.mxu1 %v12722_v50 }
0x10cd   :  { %6754 = vmatpush1.bf16.msra.mxu0 %v12037_v57  ;;  %6795 = vmatpush1.bf16.msra.mxu1 %v12039_v58 }
0x10ce   :  { %6755 = vmatprep.subr.bf16.mxu0 %v12045_v59  ;;  %6796 = vmatprep.subr.bf16.mxu1 %v12047_v60 }
0x10d1   :  { %6756 = vmatpush1.bf16.msra.mxu0 %v12049_v61  ;;  %6797 = vmatpush1.bf16.msra.mxu1 %v12051_v62 }
0x10d2   :  { %6757 = vmatprep.subr.bf16.mxu0 %v12059_v44  ;;  %6798 = vmatprep.subr.bf16.mxu1 %v12063_v14 }
0x10d5   :  { %6758 = vmatpush1.bf16.msra.mxu0 %v12057_v63  ;;  %6799 = vmatpush1.bf16.msra.mxu1 %v12061_v1 }
0x10d6   :  { %6759 = vmatprep.subr.bf16.mxu0 %v12069_v2  ;;  %6800 = vmatprep.subr.bf16.mxu1 %v12071_v4 }
0x10d9   :  { %6760 = vmatpush1.bf16.msra.mxu0 %v12073_v12  ;;  %6801 = vmatpush1.bf16.msra.mxu1 %v12075_v5 }
0x10da   :  { %6761 = vmatprep.subr.bf16.mxu0 %v12083_v3  ;;  %6802 = vmatprep.subr.bf16.mxu1 %v12087_v6 }
0x10dd   :  { %6762 = vmatpush1.bf16.msra.mxu0 %v12081_v37  ;;  %6803 = vmatpush1.bf16.msra.mxu1 %v12085_v26 }
0x10de   :  { %6763 = vmatprep.subr.bf16.mxu0 %v12093_v47  ;;  %6804 = vmatprep.subr.bf16.mxu1 %v12095_v34 }
0x10e1   :  { %6764 = vmatpush1.bf16.msra.mxu0 %v12097_v32  ;;  %6805 = vmatpush1.bf16.msra.mxu1 %v12099_v38 }
0x10e2   :  { %6765 = vmatprep.subr.bf16.mxu0 %v12107_v8  ;;  %6806 = vmatprep.subr.bf16.mxu1 %v12111_v54 }
0x10e5   :  { %6766 = vmatpush1.bf16.msra.mxu0 %v12105_v40  ;;  %6807 = vmatpush1.bf16.msra.mxu1 %v12109_v46 }
0x10e6   :  { %7059 = vmatprep.subr.bf16.mxu0 %v12021_v27  ;;  %7100 = vmatprep.subr.bf16.mxu1 %v12023_v24 }
0x1193   :  { %v12218_v17 = vpop.f32.mrb[92].mxu0  ;;  %v12220_v16 = vpop.f32.mrb[124].mxu1 }
0x1194   :  { %12800 = vst [vmem:[#allocation29_spill] sm:$0xff] %v12218_v17  ;;  %12801 = vst [vmem:[#allocation30_spill] sm:$0xff] %v12220_v16  ;;  %v12222_v41 = vpop.f32.mrb[93].mxu0  ;;  %v12224_v53 = vpop.f32.mrb[125].mxu1  ;;  %v12810_v17 = vld [vmem:[#allocation11_spill] sm:$0xff] }
0x1195   :  { %12802 = vst [vmem:[#allocation31_spill] sm:$0xff] %v12222_v41  ;;  %12803 = vst [vmem:[#allocation32_spill] sm:$0xff] %v12224_v53  ;;  %v12226_v49 = vpop.f32.mrb[94].mxu0  ;;  %v12228_v20 = vpop.f32.mrb[126].mxu1  ;;  %v12241_v16 = vrot.slane %v9508_v18, %v12810_v17  ;;  %v12811_v41 = vld [vmem:[#allocation16_spill] sm:$0xff] }
0x1196   :  { %12804 = vst [vmem:[#allocation33_spill] sm:$0xff] %v12226_v49  ;;  %12805 = vst [vmem:[#allocation34_spill] sm:$0xff] %v12228_v20  ;;  %v12236_v25 = vpop.f32.mrb[95].mxu0  ;;  %v12238_v29 = vpop.f32.mrb[127].mxu1  ;;  %v12244_v56 = vrot.slane %v9508_v18, %v12811_v41  ;;  %v6103_v49 = vadd.f32 %v12128_v23, %v12231_v19 }
0x1197   :  { %12808 = vst [vmem:[#allocation35_spill] sm:$0xff] %v12236_v25  ;;  %12809 = vst [vmem:[#allocation36_spill] sm:$0xff] %v12238_v29  ;;  %v6105_v36 = vadd.f32 %v12132_v11, %v12241_v16 }
0x1198   :  { %v6178_v25 = vadd.f32 %v12134_v28, %v12244_v56 }
0x119b   :  { %v6477_v20 = vpop.f32.mrb[96].mxu0  ;;  %v6518_v29 = vpop.f32.mrb[128].mxu1 }
0x119c   :  { %v6525_v53 = vadd.f32 %v6477_v20, %v6103_v49  ;;  %v6527_v17 = vadd.f32 %v6518_v29, %v6176_v33  ;;  %v6479_v48 = vpop.f32.mrb[97].mxu0  ;;  %v6520_v15 = vpop.f32.mrb[129].mxu1  ;;  %v6107_v33 = vadd.f32 %v12136_v52, %v12231_v19 }
0x119d   :  { %v6526_v18 = vadd.f32 %v6479_v48, %v6105_v36  ;;  %v6528_v41 = vadd.f32 %v6520_v15, %v6178_v25  ;;  %v6481_v45 = vpop.f32.mrb[98].mxu0  ;;  %v6522_v10 = vpop.f32.mrb[130].mxu1  ;;  %v6180_v36 = vadd.f32 %v12138_v9, %v12234_v55 }
0x119e   :  { %v9573_v23 = vmul.f32 -1.442695, %v6525_v53  ;;  %v6482_v0 = vpop.f32.mrb[99].mxu0  ;;  %v6523_v51 = vpop.f32.mrb[131].mxu1 }
0x119f   :  { %v9574_v22 = vmul.f32 -1.442695, %v6526_v18  ;;  %v9575_v11 = vmul.f32 -1.442695, %v6528_v41  ;;  %v6182_v18 = vadd.f32 %v12142_v7, %v12244_v56 }
0x11a0   :  { %10595 = vpow2.f32 %v9573_v23 }
0x11a1   :  { %10597 = vpow2.f32 %v9574_v22 }
0x11a2   :  { %10599 = vpow2.f32 %v9575_v11 }
0x11a3   :  { %10601 = vtanh.f32 %v6527_v17  ;;  %v6109_v17 = vadd.f32 %v12140_v21, %v12241_v16 }
0x11aa   :  { %v10596_v35 = vpop.eup %10595 }
0x11ab   :  { %v10598_v30 = vpop.eup %10597  ;;  %v6535_v28 = vadd.f32 1.0, %v10596_v35 }
0x11ac   :  { %v6536_v49 = vadd.f32 1.0, %v10598_v30  ;;  %v10600_v29 = vpop.eup %10599 }
0x11ad   :  { %10603 = vrcp.f32 %v6535_v28  ;;  %v10602_v48 = vpop.eup %10601  ;;  %v6545_v25 = vadd.f32 1.0, %v10600_v29 }
0x11ae   :  { %10605 = vrcp.f32 %v6536_v49 }
0x11af   :  { %10607 = vrcp.f32 %v6545_v25 }
0x11b7   :  { %v10604_v15 = vpop.eup %10603 }
0x11b8   :  { %v10606_v45 = vpop.eup %10605  ;;  %v6549_v10 = vmul.f32 %v10604_v15, %v10602_v48 }
0x11b9   :  { %v6548_v0 = vmul.f32 0.0, %v10606_v45  ;;  %v10608_v53 = vpop.eup %10607 }
0x11bb   :  { %v12254_v51 = vadd.f32 %v6549_v10, %v6548_v0 }
0x11bd   :  { %10609 = vtanh.f32 %v12254_v51 }
0x11c7   :  { %v10610_v20 = vpop.eup %10609 }
0x11c8   :  { %v12257_v35 = vmul.f32 %v10610_v20, %v10608_v53 }
0x11ca   :  { %v6558_v30 = vpack.c.bf16 %v12257_v35, %v12257_v35 }
0x11cc   :  { %6784 = vmatmul.mubr.bf16.vlgmr.msra.gmra.mrb[100].mxu0 %v6558_v30  ;;  %6825 = vmatmul.mubr.bf16.vlgmr.msra.gmra.mrb[132].mxu1 %v6558_v30 }
0x11cd   :  { %7060 = vmatpush1.bf16.msra.mxu0 %v12025_v39  ;;  %7101 = vmatpush1.bf16.msra.mxu1 %v12027_v31 }
0x11ce   :  { %7061 = vmatprep.subr.bf16.mxu0 %v12033_v42  ;;  %7102 = vmatprep.subr.bf16.mxu1 %v12035_v13 }
0x11cf   :  { %7091 = vmatprep.mubr.bf16.mxu0 %v12722_v50  ;;  %7132 = vmatprep.mubr.bf16.mxu1 %v12722_v50 }
0x11d1   :  { %7062 = vmatpush1.bf16.msra.mxu0 %v12037_v57  ;;  %7103 = vmatpush1.bf16.msra.mxu1 %v12039_v58 }
0x11d2   :  { %7063 = vmatprep.subr.bf16.mxu0 %v12045_v59  ;;  %7104 = vmatprep.subr.bf16.mxu1 %v12047_v60 }
0x11d5   :  { %7064 = vmatpush1.bf16.msra.mxu0 %v12049_v61  ;;  %7105 = vmatpush1.bf16.msra.mxu1 %v12051_v62 }
0x11d6   :  { %7065 = vmatprep.subr.bf16.mxu0 %v12059_v44  ;;  %7106 = vmatprep.subr.bf16.mxu1 %v12063_v14 }
0x11d9   :  { %7066 = vmatpush1.bf16.msra.mxu0 %v12057_v63  ;;  %7107 = vmatpush1.bf16.msra.mxu1 %v12061_v1 }
0x11da   :  { %7067 = vmatprep.subr.bf16.mxu0 %v12069_v2  ;;  %7108 = vmatprep.subr.bf16.mxu1 %v12071_v4 }
0x11dd   :  { %7068 = vmatpush1.bf16.msra.mxu0 %v12073_v12  ;;  %7109 = vmatpush1.bf16.msra.mxu1 %v12075_v5 }
0x11de   :  { %7069 = vmatprep.subr.bf16.mxu0 %v12083_v3  ;;  %7110 = vmatprep.subr.bf16.mxu1 %v12087_v6 }
0x11e1   :  { %7070 = vmatpush1.bf16.msra.mxu0 %v12081_v37  ;;  %7111 = vmatpush1.bf16.msra.mxu1 %v12085_v26 }
0x11e2   :  { %7071 = vmatprep.subr.bf16.mxu0 %v12093_v47  ;;  %7112 = vmatprep.subr.bf16.mxu1 %v12095_v34 }
0x11e5   :  { %7072 = vmatpush1.bf16.msra.mxu0 %v12097_v32  ;;  %7113 = vmatpush1.bf16.msra.mxu1 %v12099_v38 }
0x11e6   :  { %7073 = vmatprep.subr.bf16.mxu0 %v12107_v8  ;;  %7114 = vmatprep.subr.bf16.mxu1 %v12111_v54 }
0x11e9   :  { %7074 = vmatpush1.bf16.msra.mxu0 %v12105_v40  ;;  %7115 = vmatpush1.bf16.msra.mxu1 %v12109_v46 }
0x11ea   :  { %7367 = vmatprep.subr.bf16.mxu0 %v12021_v27  ;;  %7408 = vmatprep.subr.bf16.mxu1 %v12023_v24 }
0x129f   :  { %v6785_v41 = vpop.f32.mrb[100].mxu0  ;;  %v6826_v23 = vpop.f32.mrb[132].mxu1 }
0x12a0   :  { %v6833_v22 = vadd.f32 %v6785_v41, %v6107_v33  ;;  %v6835_v11 = vadd.f32 %v6826_v23, %v6180_v36  ;;  %v6787_v28 = vpop.f32.mrb[101].mxu0  ;;  %v6828_v27 = vpop.f32.mrb[133].mxu1 }
0x12a1   :  { %v6834_v49 = vadd.f32 %v6787_v28, %v6109_v17  ;;  %v6836_v24 = vadd.f32 %v6828_v27, %v6182_v18  ;;  %v6789_v29 = vpop.f32.mrb[102].mxu0  ;;  %v6830_v48 = vpop.f32.mrb[134].mxu1 }
0x12a2   :  { %v9608_v52 = vmul.f32 -1.442695, %v6833_v22  ;;  %v6790_v15 = vpop.f32.mrb[103].mxu0  ;;  %v6831_v45 = vpop.f32.mrb[135].mxu1 }
0x12a3   :  { %v9609_v9 = vmul.f32 -1.442695, %v6834_v49  ;;  %v9610_v21 = vmul.f32 -1.442695, %v6836_v24  ;;  %v12361_v15 = vld [vmem:[#allocation6 + $0x204] ss:$16 sps:$4 sm:$0xff]  }
0x12a4   :  { %10611 = vpow2.f32 %v9608_v52  ;;  %v12363_v45 = vld [vmem:[#allocation6 + $0x20c] ss:$16 sps:$4 sm:$0xff]  }
0x12a5   :  { %10613 = vpow2.f32 %v9609_v9  ;;  %v12365_v9 = vld [vmem:[#allocation6 + $0x200] ss:$16 sps:$4 sm:$0xff]  }
0x12a6   :  { %10615 = vpow2.f32 %v9610_v21  ;;  %v12367_v21 = vld [vmem:[#allocation6 + $0x208] ss:$16 sps:$4 sm:$0xff]  }
0x12a7   :  { %10617 = vtanh.f32 %v6835_v11 }
0x12ae   :  { %v10612_v10 = vpop.eup %10611 }
0x12af   :  { %v10614_v25 = vpop.eup %10613  ;;  %v6843_v7 = vadd.f32 1.0, %v10612_v10  ;;  %v12373_v10 = vld [vmem:[#allocation6 + $0x224] ss:$16 sps:$4 sm:$0xff]  }
0x12b0   :  { %v6844_v0 = vadd.f32 1.0, %v10614_v25  ;;  %v10616_v53 = vpop.eup %10615  ;;  %v12375_v25 = vld [vmem:[#allocation6 + $0x22c] ss:$16 sps:$4 sm:$0xff]  }
0x12b1   :  { %10619 = vrcp.f32 %v6843_v7  ;;  %v10618_v20 = vpop.eup %10617  ;;  %v6853_v17 = vadd.f32 1.0, %v10616_v53  ;;  %v12377_v7 = vld [vmem:[#allocation6 + $0x220] ss:$16 sps:$4 sm:$0xff]   ;;  %v12385_v53 = vld [vmem:[#allocation6 + $0x244] ss:$16 sps:$4 sm:$0xff]  }
0x12b2   :  { %10621 = vrcp.f32 %v6844_v0  ;;  %v12379_v0 = vld [vmem:[#allocation6 + $0x228] ss:$16 sps:$4 sm:$0xff]  }
0x12b3   :  { %10623 = vrcp.f32 %v6853_v17  ;;  %v12399_v17 = vld [vmem:[#allocation6 + $0x26c] ss:$16 sps:$4 sm:$0xff]  }
0x12bb   :  { %v10620_v30 = vpop.eup %10619 }
0x12bc   :  { %v10622_v33 = vpop.eup %10621  ;;  %v6857_v36 = vmul.f32 %v10620_v30, %v10618_v20  ;;  %v12387_v20 = vld [vmem:[#allocation6 + $0x24c] ss:$16 sps:$4 sm:$0xff]   ;;  %v12389_v30 = vld [vmem:[#allocation6 + $0x240] ss:$16 sps:$4 sm:$0xff]  }
0x12bd   :  { %v6856_v18 = vmul.f32 %v10622_v33, %v12254_v51  ;;  %v10624_v23 = vpop.eup %10623  ;;  %v12391_v33 = vld [vmem:[#allocation6 + $0x248] ss:$16 sps:$4 sm:$0xff]  }
0x12bf   :  { %v12304_v41 = vadd.f32 %v6857_v36, %v6856_v18  ;;  %v12397_v36 = vld [vmem:[#allocation6 + $0x264] ss:$16 sps:$4 sm:$0xff]   ;;  %v12401_v18 = vld [vmem:[#allocation6 + $0x260] ss:$16 sps:$4 sm:$0xff]  }
0x12c1   :  { %10625 = vtanh.f32 %v12304_v41 }
0x12cb   :  { %v10626_v22 = vpop.eup %10625 }
0x12cc   :  { %v12307_v28 = vmul.f32 %v10626_v22, %v10624_v23  ;;  %v12409_v23 = vld [vmem:[#allocation6 + $0x284] ss:$16 sps:$4 sm:$0xff]   ;;  %v12411_v22 = vld [vmem:[#allocation6 + $0x28c] ss:$16 sps:$4 sm:$0xff]  }
0x12ce   :  { %v6866_v11 = vpack.c.bf16 %v12307_v28, %v12307_v28 }
0x12d0   :  { %7092 = vmatmul.mubr.bf16.vlgmr.msra.gmra.mrb[104].mxu0 %v6866_v11  ;;  %7133 = vmatmul.mubr.bf16.vlgmr.msra.gmra.mrb[136].mxu1 %v6866_v11  ;;  %v12413_v11 = vld [vmem:[#allocation6 + $0x280] ss:$16 sps:$4 sm:$0xff]  }
0x12d1   :  { %7368 = vmatpush1.bf16.msra.mxu0 %v12025_v39  ;;  %7409 = vmatpush1.bf16.msra.mxu1 %v12027_v31  ;;  %v6113_v39 = vadd.f32 %v12144_v43, %v12231_v19  ;;  %v12812_v31 = vld [vmem:[#allocation17_spill] sm:$0xff] }
0x12d2   :  { %7369 = vmatprep.subr.bf16.mxu0 %v12033_v42  ;;  %7410 = vmatprep.subr.bf16.mxu1 %v12035_v13  ;;  %v6186_v42 = vadd.f32 %v12812_v31, %v12234_v55  ;;  %v12813_v13 = vld [vmem:[#allocation12_spill] sm:$0xff] }
0x12d3   :  { %7399 = vmatprep.mubr.bf16.mxu0 %v12722_v50  ;;  %7440 = vmatprep.mubr.bf16.mxu1 %v12722_v50  ;;  %v12419_v31 = vld [vmem:[#allocation6 + $0x2a4] ss:$16 sps:$4 sm:$0xff]  }
0x12d5   :  { %7370 = vmatpush1.bf16.msra.mxu0 %v12037_v57  ;;  %7411 = vmatpush1.bf16.msra.mxu1 %v12039_v58  ;;  %v6115_v57 = vadd.f32 %v12813_v13, %v12241_v16  ;;  %v12814_v58 = vld [vmem:[#allocation18_spill] sm:$0xff]  ;;  %v12425_v13 = vld [vmem:[#allocation6 + $0x2a8] ss:$16 sps:$4 sm:$0xff]  }
0x12d6   :  { %7371 = vmatprep.subr.bf16.mxu0 %v12045_v59  ;;  %7412 = vmatprep.subr.bf16.mxu1 %v12047_v60  ;;  %v6188_v59 = vadd.f32 %v12814_v58, %v12244_v56  ;;  %v12430_v58 = vld [vmem:[#allocation6 + $0x2c4] ss:$16 sps:$4 sm:$0xff]  }
0x12d9   :  { %7372 = vmatpush1.bf16.msra.mxu0 %v12049_v61  ;;  %7413 = vmatpush1.bf16.msra.mxu1 %v12051_v62 }
0x12da   :  { %7373 = vmatprep.subr.bf16.mxu0 %v12059_v44  ;;  %7414 = vmatprep.subr.bf16.mxu1 %v12063_v14 }
0x12dd   :  { %7374 = vmatpush1.bf16.msra.mxu0 %v12057_v63  ;;  %7415 = vmatpush1.bf16.msra.mxu1 %v12061_v1 }
0x12de   :  { %7375 = vmatprep.subr.bf16.mxu0 %v12069_v2  ;;  %7416 = vmatprep.subr.bf16.mxu1 %v12071_v4 }
0x12e1   :  { %7376 = vmatpush1.bf16.msra.mxu0 %v12073_v12  ;;  %7417 = vmatpush1.bf16.msra.mxu1 %v12075_v5 }
0x12e2   :  { %7377 = vmatprep.subr.bf16.mxu0 %v12083_v3  ;;  %7418 = vmatprep.subr.bf16.mxu1 %v12087_v6 }
0x12e5   :  { %7378 = vmatpush1.bf16.msra.mxu0 %v12081_v37  ;;  %7419 = vmatpush1.bf16.msra.mxu1 %v12085_v26 }
0x12e6   :  { %7379 = vmatprep.subr.bf16.mxu0 %v12093_v47  ;;  %7420 = vmatprep.subr.bf16.mxu1 %v12095_v34 }
0x12e9   :  { %7380 = vmatpush1.bf16.msra.mxu0 %v12097_v32  ;;  %7421 = vmatpush1.bf16.msra.mxu1 %v12099_v38 }
0x12ea   :  { %7381 = vmatprep.subr.bf16.mxu0 %v12107_v8  ;;  %7422 = vmatprep.subr.bf16.mxu1 %v12111_v54 }
0x12ed   :  { %7382 = vmatpush1.bf16.msra.mxu0 %v12105_v40  ;;  %7423 = vmatpush1.bf16.msra.mxu1 %v12109_v46 }
0x12ee   :  { %7675 = vmatprep.subr.bf16.mxu0 %v12361_v15  ;;  %7716 = vmatprep.subr.bf16.mxu1 %v12363_v45 }
0x13a3   :  { %v7093_v60 = vpop.f32.mrb[104].mxu0  ;;  %v7134_v61 = vpop.f32.mrb[136].mxu1 }
0x13a4   :  { %v7141_v62 = vadd.f32 %v7093_v60, %v6113_v39  ;;  %v7143_v63 = vadd.f32 %v7134_v61, %v6186_v42  ;;  %v7095_v44 = vpop.f32.mrb[105].mxu0  ;;  %v7136_v1 = vpop.f32.mrb[137].mxu1  ;;  %v12415_v39 = vld [vmem:[#allocation6 + $0x288] ss:$16 sps:$4 sm:$0xff]   ;;  %v12423_v42 = vld [vmem:[#allocation6 + $0x2a0] ss:$16 sps:$4 sm:$0xff]  }
0x13a5   :  { %v7142_v14 = vadd.f32 %v7095_v44, %v6115_v57  ;;  %v7144_v2 = vadd.f32 %v7136_v1, %v6188_v59  ;;  %v7097_v4 = vpop.f32.mrb[106].mxu0  ;;  %v7138_v12 = vpop.f32.mrb[138].mxu1  ;;  %v12427_v57 = vld [vmem:[#allocation6 + $0x2ac] ss:$16 sps:$4 sm:$0xff]   ;;  %v12437_v60 = vld [vmem:[#allocation6 + $0x2c0] ss:$16 sps:$4 sm:$0xff]  }
0x13a6   :  { %v9643_v5 = vmul.f32 -1.442695, %v7141_v62  ;;  %v7098_v37 = vpop.f32.mrb[107].mxu0  ;;  %v7139_v3 = vpop.f32.mrb[139].mxu1  ;;  %v12432_v59 = vld [vmem:[#allocation6 + $0x2cc] ss:$16 sps:$4 sm:$0xff]  }
0x13a7   :  { %v9644_v26 = vmul.f32 -1.442695, %v7142_v14  ;;  %v9645_v6 = vmul.f32 -1.442695, %v7144_v2  ;;  %v12439_v61 = vld [vmem:[#allocation6 + $0x2c8] ss:$16 sps:$4 sm:$0xff]  }
0x13a8   :  { %10627 = vpow2.f32 %v9643_v5  ;;  %v12443_v62 = vld [vmem:[#allocation6 + $0x2e4] ss:$16 sps:$4 sm:$0xff]   ;;  %v12449_v44 = vld [vmem:[#allocation6 + $0x2e0] ss:$16 sps:$4 sm:$0xff]   ;;  %v12451_v1 = vld [vmem:[#allocation6 + $0x2e8] ss:$16 sps:$4 sm:$0xff]  }
0x13a9   :  { %10629 = vpow2.f32 %v9644_v26  ;;  %v12815_v14 = vld [vmem:[#allocation21_spill] sm:$0xff]  ;;  %v12816_v4 = vld [vmem:[#allocation22_spill] sm:$0xff]  ;;  %v12817_v5 = vld [vmem:[#allocation23_spill] sm:$0xff] }
0x13aa   :  { %10631 = vpow2.f32 %v9645_v6  ;;  %v6117_v2 = vadd.f32 %v12815_v14, %v12231_v19  ;;  %v6190_v12 = vadd.f32 %v12816_v4, %v12234_v55  ;;  %v6119_v37 = vadd.f32 %v12817_v5, %v12241_v16  ;;  %v12818_v3 = vld [vmem:[#allocation13_spill] sm:$0xff] }
0x13ab   :  { %10633 = vtanh.f32 %v7143_v63  ;;  %v12445_v63 = vld [vmem:[#allocation6 + $0x2ec] ss:$16 sps:$4 sm:$0xff]   ;;  %v6192_v26 = vadd.f32 %v12818_v3, %v12244_v56 }
0x13b2   :  { %v10628_v47 = vpop.eup %10627 }
0x13b3   :  { %v10630_v34 = vpop.eup %10629  ;;  %v7151_v32 = vadd.f32 1.0, %v10628_v47 }
0x13b4   :  { %v7152_v38 = vadd.f32 1.0, %v10630_v34  ;;  %v10632_v40 = vpop.eup %10631 }
0x13b5   :  { %10635 = vrcp.f32 %v7151_v32  ;;  %v10634_v8 = vpop.eup %10633  ;;  %v7161_v51 = vadd.f32 1.0, %v10632_v40 }
0x13b6   :  { %10637 = vrcp.f32 %v7152_v38 }
0x13b7   :  { %10639 = vrcp.f32 %v7161_v51 }
0x13bf   :  { %v10636_v46 = vpop.eup %10635 }
0x13c0   :  { %v10638_v54 = vpop.eup %10637  ;;  %v7165_v43 = vmul.f32 %v10636_v46, %v10634_v8 }
0x13c1   :  { %v7164_v27 = vmul.f32 %v10638_v54, %v12304_v41  ;;  %v10640_v24 = vpop.eup %10639  ;;  %v12403_v41 = vld [vmem:[#allocation6 + $0x268] ss:$16 sps:$4 sm:$0xff]  }
0x13c3   :  { %v12352_v49 = vadd.f32 %v7165_v43, %v7164_v27 }
0x13c5   :  { %10641 = vtanh.f32 %v12352_v49 }
0x13cf   :  { %v10642_v29 = vpop.eup %10641 }
0x13d0   :  { %v12355_v48 = vmul.f32 %v10642_v29, %v10640_v24 }
0x13d2   :  { %v7174_v52 = vpack.c.bf16 %v12355_v48, %v12355_v48 }
0x13d4   :  { %7400 = vmatmul.mubr.bf16.vlgmr.msra.gmra.mrb[108].mxu0 %v7174_v52  ;;  %7441 = vmatmul.mubr.bf16.vlgmr.msra.gmra.mrb[140].mxu1 %v7174_v52 }
0x13d5   :  { %7707 = vmatprep.mubr.bf16.mxu0 %v12722_v50  ;;  %7748 = vmatprep.mubr.bf16.mxu1 %v12722_v50 }
0x13d6   :  { %7676 = vmatpush1.bf16.msra.mxu0 %v12365_v9  ;;  %7717 = vmatpush1.bf16.msra.mxu1 %v12367_v21 }
0x13d7   :  { %7677 = vmatprep.subr.bf16.mxu0 %v12373_v10  ;;  %7718 = vmatprep.subr.bf16.mxu1 %v12375_v25 }
0x13da   :  { %7678 = vmatpush1.bf16.msra.mxu0 %v12377_v7  ;;  %7719 = vmatpush1.bf16.msra.mxu1 %v12379_v0 }
0x13db   :  { %7679 = vmatprep.subr.bf16.mxu0 %v12385_v53  ;;  %7720 = vmatprep.subr.bf16.mxu1 %v12387_v20 }
0x13de   :  { %7680 = vmatpush1.bf16.msra.mxu0 %v12389_v30  ;;  %7721 = vmatpush1.bf16.msra.mxu1 %v12391_v33 }
0x13df   :  { %7681 = vmatprep.subr.bf16.mxu0 %v12397_v36  ;;  %7722 = vmatprep.subr.bf16.mxu1 %v12399_v17 }
0x13e2   :  { %7682 = vmatpush1.bf16.msra.mxu0 %v12401_v18  ;;  %7723 = vmatpush1.bf16.msra.mxu1 %v12403_v41 }
0x13e3   :  { %7683 = vmatprep.subr.bf16.mxu0 %v12409_v23  ;;  %7724 = vmatprep.subr.bf16.mxu1 %v12411_v22 }
0x13e6   :  { %7684 = vmatpush1.bf16.msra.mxu0 %v12413_v11  ;;  %7725 = vmatpush1.bf16.msra.mxu1 %v12415_v39 }
0x13e7   :  { %7685 = vmatprep.subr.bf16.mxu0 %v12419_v31  ;;  %7726 = vmatprep.subr.bf16.mxu1 %v12427_v57 }
0x13ea   :  { %7686 = vmatpush1.bf16.msra.mxu0 %v12423_v42  ;;  %7727 = vmatpush1.bf16.msra.mxu1 %v12425_v13 }
0x13eb   :  { %7687 = vmatprep.subr.bf16.mxu0 %v12430_v58  ;;  %7728 = vmatprep.subr.bf16.mxu1 %v12432_v59 }
0x13ee   :  { %7688 = vmatpush1.bf16.msra.mxu0 %v12437_v60  ;;  %7729 = vmatpush1.bf16.msra.mxu1 %v12439_v61 }
0x13ef   :  { %7689 = vmatprep.subr.bf16.mxu0 %v12443_v62  ;;  %7730 = vmatprep.subr.bf16.mxu1 %v12445_v63 }
0x13f2   :  { %7690 = vmatpush1.bf16.msra.mxu0 %v12449_v44  ;;  %7731 = vmatpush1.bf16.msra.mxu1 %v12451_v1 }
0x13f3   :  { %7983 = vmatprep.subr.bf16.mxu0 %v12361_v15  ;;  %8024 = vmatprep.subr.bf16.mxu1 %v12363_v45 }
0x14a7   :  { %v7401_v6 = vpop.f32.mrb[108].mxu0  ;;  %v7442_v47 = vpop.f32.mrb[140].mxu1 }
0x14a8   :  { %v7449_v34 = vadd.f32 %v7401_v6, %v6117_v2  ;;  %v7451_v32 = vadd.f32 %v7442_v47, %v6190_v12  ;;  %v7403_v38 = vpop.f32.mrb[109].mxu0  ;;  %v7444_v40 = vpop.f32.mrb[141].mxu1 }
0x14a9   :  { %v7450_v8 = vadd.f32 %v7403_v38, %v6119_v37  ;;  %v7452_v46 = vadd.f32 %v7444_v40, %v6192_v26  ;;  %v7405_v54 = vpop.f32.mrb[110].mxu0  ;;  %v7446_v43 = vpop.f32.mrb[142].mxu1 }
0x14aa   :  { %v9678_v51 = vmul.f32 -1.442695, %v7449_v34  ;;  %v7406_v27 = vpop.f32.mrb[111].mxu0  ;;  %v7447_v24 = vpop.f32.mrb[143].mxu1  ;;  %v12820_v43 = vld [vmem:[#allocation14_spill] sm:$0xff] }
0x14ab   :  { %v9679_v29 = vmul.f32 -1.442695, %v7450_v8  ;;  %v9680_v52 = vmul.f32 -1.442695, %v7452_v46  ;;  %v12821_v27 = vld [vmem:[#allocation20_spill] sm:$0xff] }
0x14ac   :  { %10643 = vpow2.f32 %v9678_v51  ;;  %v6196_v51 = vadd.f32 %v12820_v43, %v12234_v55  ;;  %v6125_v24 = vadd.f32 %v12821_v27, %v12241_v16 }
0x14ad   :  { %10645 = vpow2.f32 %v9679_v29  ;;  %v12822_v29 = vld [vmem:[#allocation24_spill] sm:$0xff] }
0x14ae   :  { %10647 = vpow2.f32 %v9680_v52  ;;  %v6198_v52 = vadd.f32 %v12822_v29, %v12244_v56 }
0x14af   :  { %10649 = vtanh.f32 %v7451_v32 }
0x14b6   :  { %v10644_v14 = vpop.eup %10643 }
0x14b7   :  { %v10646_v4 = vpop.eup %10645  ;;  %v7459_v5 = vadd.f32 1.0, %v10644_v14 }
0x14b8   :  { %v7460_v2 = vadd.f32 1.0, %v10646_v4  ;;  %v10648_v12 = vpop.eup %10647 }
0x14b9   :  { %10651 = vrcp.f32 %v7459_v5  ;;  %v10650_v37 = vpop.eup %10649  ;;  %v7469_v47 = vadd.f32 1.0, %v10648_v12 }
0x14ba   :  { %10653 = vrcp.f32 %v7460_v2 }
0x14bb   :  { %10655 = vrcp.f32 %v7469_v47 }
0x14c3   :  { %v10652_v3 = vpop.eup %10651 }
0x14c4   :  { %v10654_v26 = vpop.eup %10653  ;;  %v7473_v6 = vmul.f32 %v10652_v3, %v10650_v37 }
0x14c5   :  { %v7472_v34 = vmul.f32 %v10654_v26, %v12352_v49  ;;  %v10656_v40 = vpop.eup %10655  ;;  %v12819_v49 = vld [vmem:[#allocation19_spill] sm:$0xff] }
0x14c6   :  { %v6123_v54 = vadd.f32 %v12819_v49, %v12231_v19 }
0x14c7   :  { %v12468_v38 = vadd.f32 %v7473_v6, %v7472_v34 }
0x14c9   :  { %10657 = vtanh.f32 %v12468_v38 }
0x14d3   :  { %v10658_v8 = vpop.eup %10657 }
0x14d4   :  { %v12471_v46 = vmul.f32 %v10658_v8, %v10656_v40 }
0x14d6   :  { %v7482_v32 = vpack.c.bf16 %v12471_v46, %v12471_v46 }
0x14d8   :  { %7708 = vmatmul.mubr.bf16.vlgmr.msra.gmra.mrb[112].mxu0 %v7482_v32  ;;  %7749 = vmatmul.mubr.bf16.vlgmr.msra.gmra.mrb[144].mxu1 %v7482_v32 }
0x14d9   :  { %7984 = vmatpush1.bf16.msra.mxu0 %v12365_v9  ;;  %8025 = vmatpush1.bf16.msra.mxu1 %v12367_v21 }
0x14da   :  { %7985 = vmatprep.subr.bf16.mxu0 %v12373_v10  ;;  %8026 = vmatprep.subr.bf16.mxu1 %v12375_v25 }
0x14db   :  { %8015 = vmatprep.mubr.bf16.mxu0 %v12722_v50  ;;  %8056 = vmatprep.mubr.bf16.mxu1 %v12722_v50 }
0x14dd   :  { %7986 = vmatpush1.bf16.msra.mxu0 %v12377_v7  ;;  %8027 = vmatpush1.bf16.msra.mxu1 %v12379_v0 }
0x14de   :  { %7987 = vmatprep.subr.bf16.mxu0 %v12385_v53  ;;  %8028 = vmatprep.subr.bf16.mxu1 %v12387_v20 }
0x14e1   :  { %7988 = vmatpush1.bf16.msra.mxu0 %v12389_v30  ;;  %8029 = vmatpush1.bf16.msra.mxu1 %v12391_v33 }
0x14e2   :  { %7989 = vmatprep.subr.bf16.mxu0 %v12397_v36  ;;  %8030 = vmatprep.subr.bf16.mxu1 %v12399_v17 }
0x14e5   :  { %7990 = vmatpush1.bf16.msra.mxu0 %v12401_v18  ;;  %8031 = vmatpush1.bf16.msra.mxu1 %v12403_v41 }
0x14e6   :  { %7991 = vmatprep.subr.bf16.mxu0 %v12409_v23  ;;  %8032 = vmatprep.subr.bf16.mxu1 %v12411_v22 }
0x14e9   :  { %7992 = vmatpush1.bf16.msra.mxu0 %v12413_v11  ;;  %8033 = vmatpush1.bf16.msra.mxu1 %v12415_v39 }
0x14ea   :  { %7993 = vmatprep.subr.bf16.mxu0 %v12419_v31  ;;  %8034 = vmatprep.subr.bf16.mxu1 %v12427_v57 }
0x14ed   :  { %7994 = vmatpush1.bf16.msra.mxu0 %v12423_v42  ;;  %8035 = vmatpush1.bf16.msra.mxu1 %v12425_v13 }
0x14ee   :  { %7995 = vmatprep.subr.bf16.mxu0 %v12430_v58  ;;  %8036 = vmatprep.subr.bf16.mxu1 %v12432_v59 }
0x14f1   :  { %7996 = vmatpush1.bf16.msra.mxu0 %v12437_v60  ;;  %8037 = vmatpush1.bf16.msra.mxu1 %v12439_v61 }
0x14f2   :  { %7997 = vmatprep.subr.bf16.mxu0 %v12443_v62  ;;  %8038 = vmatprep.subr.bf16.mxu1 %v12445_v63 }
0x14f5   :  { %7998 = vmatpush1.bf16.msra.mxu0 %v12449_v44  ;;  %8039 = vmatpush1.bf16.msra.mxu1 %v12451_v1 }
0x14f6   :  { %8291 = vmatprep.subr.bf16.mxu0 %v12361_v15  ;;  %8332 = vmatprep.subr.bf16.mxu1 %v12363_v45 }
0x15ab   :  { %v7709_v14 = vpop.f32.mrb[112].mxu0  ;;  %v7750_v4 = vpop.f32.mrb[144].mxu1 }
0x15ac   :  { %v7757_v5 = vadd.f32 %v7709_v14, %v6123_v54  ;;  %v7759_v2 = vadd.f32 %v7750_v4, %v6196_v51  ;;  %v7711_v12 = vpop.f32.mrb[113].mxu0  ;;  %v7752_v37 = vpop.f32.mrb[145].mxu1 }
0x15ad   :  { %v7758_v3 = vadd.f32 %v7711_v12, %v6125_v24  ;;  %v7760_v26 = vadd.f32 %v7752_v37, %v6198_v52  ;;  %v7713_v6 = vpop.f32.mrb[114].mxu0  ;;  %v7754_v47 = vpop.f32.mrb[146].mxu1 }
0x15ae   :  { %v9713_v34 = vmul.f32 -1.442695, %v7757_v5  ;;  %v7714_v40 = vpop.f32.mrb[115].mxu0  ;;  %v7755_v8 = vpop.f32.mrb[147].mxu1 }
0x15af   :  { %v9714_v32 = vmul.f32 -1.442695, %v7758_v3  ;;  %v9715_v49 = vmul.f32 -1.442695, %v7760_v26  ;;  %v12825_v8 = vld [vmem:[#allocation27_spill] sm:$0xff] }
0x15b0   :  { %10659 = vpow2.f32 %v9713_v34  ;;  %v12824_v34 = vld [vmem:[#allocation26_spill] sm:$0xff] }
0x15b1   :  { %10661 = vpow2.f32 %v9714_v32  ;;  %v6200_v40 = vadd.f32 %v12824_v34, %v12234_v55  ;;  %v6129_v32 = vadd.f32 %v12825_v8, %v12241_v16 }
0x15b2   :  { %10663 = vpow2.f32 %v9715_v49  ;;  %v12826_v49 = vld [vmem:[#allocation28_spill] sm:$0xff] }
0x15b3   :  { %10665 = vtanh.f32 %v7759_v2 }
0x15ba   :  { %v10660_v43 = vpop.eup %10659 }
0x15bb   :  { %v10662_v27 = vpop.eup %10661  ;;  %v7767_v29 = vadd.f32 1.0, %v10660_v43  ;;  %v6202_v43 = vadd.f32 %v12826_v49, %v12244_v56 }
0x15bc   :  { %v7768_v54 = vadd.f32 1.0, %v10662_v27  ;;  %v10664_v51 = vpop.eup %10663 }
0x15bd   :  { %10667 = vrcp.f32 %v7767_v29  ;;  %v10666_v24 = vpop.eup %10665  ;;  %v7777_v5 = vadd.f32 1.0, %v10664_v51 }
0x15be   :  { %10669 = vrcp.f32 %v7768_v54 }
0x15bf   :  { %10671 = vrcp.f32 %v7777_v5 }
0x15c7   :  { %v10668_v52 = vpop.eup %10667 }
0x15c8   :  { %v10670_v14 = vpop.eup %10669  ;;  %v7781_v4 = vmul.f32 %v10668_v52, %v10666_v24 }
0x15c9   :  { %v7780_v12 = vmul.f32 %v10670_v14, %v12468_v38  ;;  %v10672_v3 = vpop.eup %10671  ;;  %v12823_v38 = vld [vmem:[#allocation25_spill] sm:$0xff] }
0x15ca   :  { %v6127_v47 = vadd.f32 %v12823_v38, %v12231_v19 }
0x15cb   :  { %v12518_v37 = vadd.f32 %v7781_v4, %v7780_v12 }
0x15cd   :  { %10673 = vtanh.f32 %v12518_v37 }
0x15d7   :  { %v10674_v26 = vpop.eup %10673 }
0x15d8   :  { %v12521_v6 = vmul.f32 %v10674_v26, %v10672_v3 }
0x15da   :  { %v7790_v2 = vpack.c.bf16 %v12521_v6, %v12521_v6 }
0x15dc   :  { %8016 = vmatmul.mubr.bf16.vlgmr.msra.gmra.mrb[116].mxu0 %v7790_v2  ;;  %8057 = vmatmul.mubr.bf16.vlgmr.msra.gmra.mrb[148].mxu1 %v7790_v2 }
0x15dd   :  { %8292 = vmatpush1.bf16.msra.mxu0 %v12365_v9  ;;  %8333 = vmatpush1.bf16.msra.mxu1 %v12367_v21 }
0x15de   :  { %8293 = vmatprep.subr.bf16.mxu0 %v12373_v10  ;;  %8334 = vmatprep.subr.bf16.mxu1 %v12375_v25 }
0x15df   :  { %8323 = vmatprep.mubr.bf16.mxu0 %v12722_v50  ;;  %8364 = vmatprep.mubr.bf16.mxu1 %v12722_v50 }
0x15e1   :  { %8294 = vmatpush1.bf16.msra.mxu0 %v12377_v7  ;;  %8335 = vmatpush1.bf16.msra.mxu1 %v12379_v0 }
0x15e2   :  { %8295 = vmatprep.subr.bf16.mxu0 %v12385_v53  ;;  %8336 = vmatprep.subr.bf16.mxu1 %v12387_v20 }
0x15e5   :  { %8296 = vmatpush1.bf16.msra.mxu0 %v12389_v30  ;;  %8337 = vmatpush1.bf16.msra.mxu1 %v12391_v33 }
0x15e6   :  { %8297 = vmatprep.subr.bf16.mxu0 %v12397_v36  ;;  %8338 = vmatprep.subr.bf16.mxu1 %v12399_v17 }
0x15e9   :  { %8298 = vmatpush1.bf16.msra.mxu0 %v12401_v18  ;;  %8339 = vmatpush1.bf16.msra.mxu1 %v12403_v41 }
0x15ea   :  { %8299 = vmatprep.subr.bf16.mxu0 %v12409_v23  ;;  %8340 = vmatprep.subr.bf16.mxu1 %v12411_v22 }
0x15ed   :  { %8300 = vmatpush1.bf16.msra.mxu0 %v12413_v11  ;;  %8341 = vmatpush1.bf16.msra.mxu1 %v12415_v39 }
0x15ee   :  { %8301 = vmatprep.subr.bf16.mxu0 %v12419_v31  ;;  %8342 = vmatprep.subr.bf16.mxu1 %v12427_v57 }
0x15f1   :  { %8302 = vmatpush1.bf16.msra.mxu0 %v12423_v42  ;;  %8343 = vmatpush1.bf16.msra.mxu1 %v12425_v13 }
0x15f2   :  { %8303 = vmatprep.subr.bf16.mxu0 %v12430_v58  ;;  %8344 = vmatprep.subr.bf16.mxu1 %v12432_v59 }
0x15f5   :  { %8304 = vmatpush1.bf16.msra.mxu0 %v12437_v60  ;;  %8345 = vmatpush1.bf16.msra.mxu1 %v12439_v61 }
0x15f6   :  { %8305 = vmatprep.subr.bf16.mxu0 %v12443_v62  ;;  %8346 = vmatprep.subr.bf16.mxu1 %v12445_v63 }
0x15f9   :  { %8306 = vmatpush1.bf16.msra.mxu0 %v12449_v44  ;;  %8347 = vmatpush1.bf16.msra.mxu1 %v12451_v1 }
0x15fa   :  { %8599 = vmatprep.subr.bf16.mxu0 %v12361_v15  ;;  %8640 = vmatprep.subr.bf16.mxu1 %v12363_v45 }
0x16af   :  { %v8017_v27 = vpop.f32.mrb[116].mxu0  ;;  %v8058_v29 = vpop.f32.mrb[148].mxu1 }
0x16b0   :  { %v8065_v54 = vadd.f32 %v8017_v27, %v6127_v47  ;;  %v8067_v51 = vadd.f32 %v8058_v29, %v6200_v40  ;;  %v8019_v24 = vpop.f32.mrb[117].mxu0  ;;  %v8060_v15 = vpop.f32.mrb[149].mxu1 }
0x16b1   :  { %v8066_v52 = vadd.f32 %v8019_v24, %v6129_v32  ;;  %v8068_v45 = vadd.f32 %v8060_v15, %v6202_v43  ;;  %v8021_v14 = vpop.f32.mrb[118].mxu0  ;;  %v8062_v4 = vpop.f32.mrb[150].mxu1 }
0x16b2   :  { %v9748_v5 = vmul.f32 -1.442695, %v8065_v54  ;;  %v8022_v12 = vpop.f32.mrb[119].mxu0  ;;  %v8063_v3 = vpop.f32.mrb[151].mxu1 }
0x16b3   :  { %v9749_v26 = vmul.f32 -1.442695, %v8066_v52  ;;  %v9750_v2 = vmul.f32 -1.442695, %v8068_v45 }
0x16b4   :  { %10675 = vpow2.f32 %v9748_v5 }
0x16b5   :  { %10677 = vpow2.f32 %v9749_v26 }
0x16b6   :  { %10679 = vpow2.f32 %v9750_v2 }
0x16b7   :  { %10681 = vtanh.f32 %v8067_v51 }
0x16be   :  { %v10676_v38 = vpop.eup %10675 }
0x16bf   :  { %v10678_v34 = vpop.eup %10677  ;;  %v8075_v8 = vadd.f32 1.0, %v10676_v38 }
0x16c0   :  { %v8076_v47 = vadd.f32 1.0, %v10678_v34  ;;  %v10680_v40 = vpop.eup %10679  ;;  %v10332_v34 = vld [vmem:[%s12694_s4 + $0x8] sm:$0xff]  }
0x16c1   :  { %10683 = vrcp.f32 %v8075_v8  ;;  %v10682_v32 = vpop.eup %10681  ;;  %v8085_v29 = vadd.f32 1.0, %v10680_v40  ;;  %v8718_v8 = vpack.c.bf16 %v12307_v28, %v12257_v35  ;;  %v10334_v40 = vld [vmem:[%s12694_s4 + $0x18] sm:$0xff]   ;;  %v10335_v35 = vld [vmem:[%s12694_s4 + $0x20] sm:$0xff]   ;;  %v10336_v28 = vld [vmem:[%s12694_s4 + $0x28] sm:$0xff]  }
0x16c2   :  { %10685 = vrcp.f32 %v8076_v47  ;;  %v10333_v47 = vld [vmem:[%s12694_s4 + $0x10] sm:$0xff]  }
0x16c3   :  { %10687 = vrcp.f32 %v8085_v29  ;;  %v12831_v29 = vld [vmem:[#allocation33_spill] sm:$0xff] }
0x16cb   :  { %v10684_v49 = vpop.eup %10683 }
0x16cc   :  { %v10686_v43 = vpop.eup %10685  ;;  %v8089_v27 = vmul.f32 %v10684_v49, %v10682_v32  ;;  %v10337_v32 = vld [vmem:[%s12694_s4 + $0x30] sm:$0xff]   ;;  %v10338_v49 = vld [vmem:[%s12694_s4 + $0x38] sm:$0xff]  }
0x16cd   :  { %v8088_v54 = vmul.f32 %v10686_v43, %v12518_v37  ;;  %v10688_v15 = vpop.eup %10687  ;;  %v8719_v43 = vpack.c.bf16 %v12471_v46, %v12355_v48 }
0x16cf   :  { %v12568_v24 = vadd.f32 %v8089_v27, %v8088_v54  ;;  %v6137_v54 = vadd.f32 %v12831_v29, %v12231_v19 }
0x16d1   :  { %10689 = vtanh.f32 %v12568_v24 }
0x16db   :  { %v10690_v52 = vpop.eup %10689 }
0x16dc   :  { %v12571_v45 = vmul.f32 %v10690_v52, %v10688_v15  ;;  %v12833_v52 = vld [vmem:[#allocation35_spill] sm:$0xff] }
0x16de   :  { %v8098_v51 = vpack.c.bf16 %v12571_v45, %v12571_v45  ;;  %v8720_v27 = vpack.c.bf16 %v12571_v45, %v12521_v6 }
0x16e0   :  { %8324 = vmatmul.mubr.bf16.vlgmr.msra.gmra.mrb[120].mxu0 %v8098_v51  ;;  %8365 = vmatmul.mubr.bf16.vlgmr.msra.gmra.mrb[152].mxu1 %v8098_v51  ;;  %v6139_v51 = vadd.f32 %v12833_v52, %v12241_v16 }
0x16e1   :  { %8600 = vmatpush1.bf16.msra.mxu0 %v12365_v9  ;;  %8641 = vmatpush1.bf16.msra.mxu1 %v12367_v21  ;;  %v12827_v9 = vld [vmem:[#allocation29_spill] sm:$0xff] }
0x16e2   :  { %8601 = vmatprep.subr.bf16.mxu0 %v12373_v10  ;;  %8642 = vmatprep.subr.bf16.mxu1 %v12375_v25  ;;  %v6133_v21 = vadd.f32 %v12827_v9, %v12231_v19  ;;  %v12828_v10 = vld [vmem:[#allocation30_spill] sm:$0xff] }
0x16e3   :  { %8631 = vmatprep.mubr.bf16.mxu0 %v12722_v50  ;;  %8672 = vmatprep.mubr.bf16.mxu1 %v12722_v50  ;;  %v10331_v50 = vld [vmem:[%s12694_s4] sm:$0xff]   ;;  %v6206_v25 = vadd.f32 %v12828_v10, %v12234_v55 }
0x16e5   :  { %8602 = vmatpush1.bf16.msra.mxu0 %v12377_v7  ;;  %8643 = vmatpush1.bf16.msra.mxu1 %v12379_v0  ;;  %v12829_v7 = vld [vmem:[#allocation31_spill] sm:$0xff] }
0x16e6   :  { %8603 = vmatprep.subr.bf16.mxu0 %v12385_v53  ;;  %8644 = vmatprep.subr.bf16.mxu1 %v12387_v20  ;;  %v6135_v0 = vadd.f32 %v12829_v7, %v12241_v16  ;;  %v12830_v53 = vld [vmem:[#allocation32_spill] sm:$0xff] }
0x16e7   :  { %v6208_v20 = vadd.f32 %v12830_v53, %v12244_v56 }
0x16e9   :  { %8604 = vmatpush1.bf16.msra.mxu0 %v12389_v30  ;;  %8645 = vmatpush1.bf16.msra.mxu1 %v12391_v33 }
0x16ea   :  { %8605 = vmatprep.subr.bf16.mxu0 %v12397_v36  ;;  %8646 = vmatprep.subr.bf16.mxu1 %v12399_v17 }
0x16ed   :  { %8606 = vmatpush1.bf16.msra.mxu0 %v12401_v18  ;;  %8647 = vmatpush1.bf16.msra.mxu1 %v12403_v41 }
0x16ee   :  { %8607 = vmatprep.subr.bf16.mxu0 %v12409_v23  ;;  %8648 = vmatprep.subr.bf16.mxu1 %v12411_v22 }
0x16f1   :  { %8608 = vmatpush1.bf16.msra.mxu0 %v12413_v11  ;;  %8649 = vmatpush1.bf16.msra.mxu1 %v12415_v39 }
0x16f2   :  { %8609 = vmatprep.subr.bf16.mxu0 %v12419_v31  ;;  %8650 = vmatprep.subr.bf16.mxu1 %v12427_v57 }
0x16f5   :  { %8610 = vmatpush1.bf16.msra.mxu0 %v12423_v42  ;;  %8651 = vmatpush1.bf16.msra.mxu1 %v12425_v13 }
0x16f6   :  { %8611 = vmatprep.subr.bf16.mxu0 %v12430_v58  ;;  %8652 = vmatprep.subr.bf16.mxu1 %v12432_v59 }
0x16f9   :  { %8612 = vmatpush1.bf16.msra.mxu0 %v12437_v60  ;;  %8653 = vmatpush1.bf16.msra.mxu1 %v12439_v61 }
0x16fa   :  { %8613 = vmatprep.subr.bf16.mxu0 %v12443_v62  ;;  %8654 = vmatprep.subr.bf16.mxu1 %v12445_v63 }
0x16fd   :  { %8614 = vmatpush1.bf16.msra.mxu0 %v12449_v44  ;;  %8655 = vmatpush1.bf16.msra.mxu1 %v12451_v1 }
0x16fe   :  { %9842 = vmatprep.subr.bf16.mxu0 %v10331_v50 }
0x17b3   :  { %v8325_v30 = vpop.f32.mrb[120].mxu0  ;;  %v8366_v33 = vpop.f32.mrb[152].mxu1 }
0x17b4   :  { %v8373_v36 = vadd.f32 %v8325_v30, %v6133_v21  ;;  %v8375_v17 = vadd.f32 %v8366_v33, %v6206_v25  ;;  %v8327_v18 = vpop.f32.mrb[121].mxu0  ;;  %v8368_v41 = vpop.f32.mrb[153].mxu1 }
0x17b5   :  { %v8374_v23 = vadd.f32 %v8327_v18, %v6135_v0  ;;  %v8376_v22 = vadd.f32 %v8368_v41, %v6208_v20  ;;  %v8329_v11 = vpop.f32.mrb[122].mxu0  ;;  %v8370_v39 = vpop.f32.mrb[154].mxu1 }
0x17b6   :  { %v9783_v31 = vmul.f32 -1.442695, %v8373_v36  ;;  %v8330_v42 = vpop.f32.mrb[123].mxu0  ;;  %v8371_v13 = vpop.f32.mrb[155].mxu1 }
0x17b7   :  { %v9784_v57 = vmul.f32 -1.442695, %v8374_v23  ;;  %v9785_v58 = vmul.f32 -1.442695, %v8376_v22  ;;  %v9821_v42 = vld [vmem:[%s12695_s5] ss:$0 sm:$0xff] }
0x17b8   :  { %10691 = vpow2.f32 %v9783_v31 }
0x17b9   :  { %10693 = vpow2.f32 %v9784_v57 }
0x17ba   :  { %10695 = vpow2.f32 %v9785_v58 }
0x17bb   :  { %10697 = vtanh.f32 %v8375_v17 }
0x17c2   :  { %v10692_v59 = vpop.eup %10691 }
0x17c3   :  { %v10694_v60 = vpop.eup %10693  ;;  %v8383_v61 = vadd.f32 1.0, %v10692_v59 }
0x17c4   :  { %v8384_v62 = vadd.f32 1.0, %v10694_v60  ;;  %v10696_v63 = vpop.eup %10695 }
0x17c5   :  { %10699 = vrcp.f32 %v8383_v61  ;;  %v10698_v44 = vpop.eup %10697  ;;  %v8393_v4 = vadd.f32 1.0, %v10696_v63 }
0x17c6   :  { %10701 = vrcp.f32 %v8384_v62 }
0x17c7   :  { %10703 = vrcp.f32 %v8393_v4 }
0x17cf   :  { %v10700_v1 = vpop.eup %10699 }
0x17d0   :  { %v10702_v37 = vpop.eup %10701  ;;  %v8397_v14 = vmul.f32 %v10700_v1, %v10698_v44 }
0x17d1   :  { %v8396_v5 = vmul.f32 %v10702_v37, %v12568_v24  ;;  %v10704_v3 = vpop.eup %10703  ;;  %v12832_v24 = vld [vmem:[#allocation34_spill] sm:$0xff] }
0x17d2   :  { %v6210_v15 = vadd.f32 %v12832_v24, %v12234_v55 }
0x17d3   :  { %v12619_v12 = vadd.f32 %v8397_v14, %v8396_v5 }
0x17d5   :  { %10705 = vtanh.f32 %v12619_v12 }
0x17df   :  { %v10706_v26 = vpop.eup %10705 }
0x17e0   :  { %v12622_v2 = vmul.f32 %v10706_v26, %v10704_v3 }
0x17e2   :  { %v8406_v38 = vpack.c.bf16 %v12622_v2, %v12622_v2 }
0x17e4   :  { %8632 = vmatmul.mubr.bf16.vlgmr.msra.gmra.mrb[124].mxu0 %v8406_v38  ;;  %8673 = vmatmul.mubr.bf16.vlgmr.msra.gmra.mrb[156].mxu1 %v8406_v38 }
0x17e5   :  { %9843 = vmatpush3.bf16.msra.mxu0 %v10331_v50  ;;  %9858 = vmatprep.mubr.bf16.mxu0 %v8718_v8  ;;  %v12834_v50 = vld [vmem:[#allocation36_spill] sm:$0xff] }
0x17e6   :  { %9844 = vmatprep.subr.bf16.mxu0 %v10332_v34  ;;  %v6212_v9 = vadd.f32 %v12834_v50, %v12244_v56 }
0x17e9   :  { %9845 = vmatpush3.bf16.msra.mxu0 %v10332_v34 }
0x17ea   :  { %9846 = vmatprep.subr.bf16.mxu0 %v10333_v47 }
0x17ed   :  { %9847 = vmatpush3.bf16.msra.mxu0 %v10333_v47 }
0x17ee   :  { %9848 = vmatprep.subr.bf16.mxu0 %v10334_v40 }
0x17f1   :  { %9849 = vmatpush3.bf16.msra.mxu0 %v10334_v40 }
0x17f2   :  { %9850 = vmatprep.subr.bf16.mxu0 %v10335_v35 }
0x17f5   :  { %9851 = vmatpush3.bf16.msra.mxu0 %v10335_v35 }
0x17f6   :  { %9852 = vmatprep.subr.bf16.mxu0 %v10336_v28 }
0x17f9   :  { %9853 = vmatpush3.bf16.msra.mxu0 %v10336_v28 }
0x17fa   :  { %9854 = vmatprep.subr.bf16.mxu0 %v10337_v32 }
0x17fd   :  { %9855 = vmatpush3.bf16.msra.mxu0 %v10337_v32 }
0x17fe   :  { %9856 = vmatprep.subr.bf16.mxu0 %v10338_v49 }
0x1801   :  { %9857 = vmatpush3.bf16.msra.mxu0 %v10338_v49 }
0x1804   :  { %9859 = vmatmul.mubr.bf16.vlgmr.msra.gmra.mrb[128].mxu0 %v8719_v43 }
0x1805   :  { %9862 = vmatprep.mubr.bf16.mxu0 %v8720_v27 }
0x18b7   :  { %v8633_v21 = vpop.f32.mrb[124].mxu0  ;;  %v8674_v10 = vpop.f32.mrb[156].mxu1 }
0x18b8   :  { %v8681_v48 = vadd.f32 %v8633_v21, %v6137_v54  ;;  %v8683_v46 = vadd.f32 %v8674_v10, %v6210_v15  ;;  %v8635_v25 = vpop.f32.mrb[125].mxu0  ;;  %v8676_v6 = vpop.f32.mrb[157].mxu1 }
0x18b9   :  { %v8682_v45 = vadd.f32 %v8635_v25, %v6139_v51  ;;  %v8684_v7 = vadd.f32 %v8676_v6, %v6212_v9  ;;  %v8637_v0 = vpop.f32.mrb[126].mxu0  ;;  %v8678_v53 = vpop.f32.mrb[158].mxu1 }
0x18ba   :  { %v9818_v19 = vmul.f32 -1.442695, %v8681_v48  ;;  %v8638_v20 = vpop.f32.mrb[127].mxu0  ;;  %v8679_v30 = vpop.f32.mrb[159].mxu1 }
0x18bb   :  { %v9819_v55 = vmul.f32 -1.442695, %v8682_v45  ;;  %v9820_v16 = vmul.f32 -1.442695, %v8684_v7 }
0x18bc   :  { %10707 = vpow2.f32 %v9818_v19 }
0x18bd   :  { %10709 = vpow2.f32 %v9819_v55 }
0x18be   :  { %10711 = vpow2.f32 %v9820_v16 }
0x18bf   :  { %10713 = vtanh.f32 %v8683_v46 }
0x18c6   :  { %v10708_v33 = vpop.eup %10707 }
0x18c7   :  { %v10710_v36 = vpop.eup %10709  ;;  %v8691_v56 = vadd.f32 1.0, %v10708_v33 }
0x18c8   :  { %v8692_v17 = vadd.f32 1.0, %v10710_v36  ;;  %v10712_v18 = vpop.eup %10711 }
0x18c9   :  { %10715 = vrcp.f32 %v8691_v56  ;;  %v10714_v41 = vpop.eup %10713  ;;  %v8701_v39 = vadd.f32 1.0, %v10712_v18 }
0x18ca   :  { %10717 = vrcp.f32 %v8692_v17 }
0x18cb   :  { %10719 = vrcp.f32 %v8701_v39 }
0x18d3   :  { %v10716_v23 = vpop.eup %10715 }
0x18d4   :  { %v10718_v22 = vpop.eup %10717  ;;  %v8705_v11 = vmul.f32 %v10716_v23, %v10714_v41 }
0x18d5   :  { %v8704_v31 = vmul.f32 %v10718_v22, %v12619_v12  ;;  %v10720_v1 = vpop.eup %10719 }
0x18d7   :  { %v9860_v13 = vpop.f32.mrb[128].mxu0  ;;  %v8706_v57 = vadd.f32 %v8705_v11, %v8704_v31 }
0x18d8   :  { %v8836_v58 = vadd.f32 %v9860_v13, %v9821_v42  ;;  %v8827_v59 = vpop.f32.mrb[129].mxu0 }
0x18d9   :  { %v8828_v60 = vadd.f32 %v9821_v42, %v8827_v59  ;;  %v9861_v61 = vpop.f32.mrb[130].mxu0  ;;  %10721 = vtanh.f32 %v8706_v57 }
0x18da   :  { %8860 = vst [vmem:[%s12696_s6 + $0x10] sm:$0xff] %v8836_v58  ;;  %v8839_v62 = vadd.f32 %v9861_v61, %v9821_v42  ;;  %v8830_v63 = vpop.f32.mrb[131].mxu0 }
0x18db   :  { %8858 = vst [vmem:[%s12696_s6] sm:$0xff] %v8828_v60  ;;  %v8831_v44 = vadd.f32 %v9821_v42, %v8830_v63 }
0x18dc   :  { %8861 = vst [vmem:[%s12696_s6 + $0x18] sm:$0xff] %v8839_v62 }
0x18dd   :  { %8859 = vst [vmem:[%s12696_s6 + $0x8] sm:$0xff] %v8831_v44 }
0x18e3   :  { %v10722_v37 = vpop.eup %10721 }
0x18e4   :  { %v8708_v14 = vmul.f32 %v10722_v37, %v10720_v1 }
0x18e6   :  { %v8721_v4 = vpack.c.bf16 %v8708_v14, %v12622_v2 }
0x18e8   :  { %9863 = vmatmul.mubr.bf16.gmra.mrb[132].mxu0 %v8721_v4 }
0x19bb   :  { %v9864_v5 = vpop.f32.mrb[132].mxu0 }
0x19bc   :  { %v8852_v12 = vadd.f32 %v9864_v5, %v9821_v42  ;;  %v8843_v3 = vpop.f32.mrb[133].mxu0 }
0x19bd   :  { %v8844_v26 = vadd.f32 %v9821_v42, %v8843_v3  ;;  %v9865_v38 = vpop.f32.mrb[134].mxu0 }
0x19be   :  { %8864 = vst [vmem:[%s12696_s6 + $0x30] sm:$0xff] %v8852_v12  ;;  %v8855_v34 = vadd.f32 %v9865_v38, %v9821_v42  ;;  %v8846_v8 = vpop.f32.mrb[135].mxu0 }
0x19bf   :  { %8862 = vst [vmem:[%s12696_s6 + $0x20] sm:$0xff] %v8844_v26  ;;  %v8847_v47 = vadd.f32 %v9821_v42, %v8846_v8 }
0x19c0   :  { %8865 = vst [vmem:[%s12696_s6 + $0x38] sm:$0xff] %v8855_v34 }
0x19c1   :  { %8863 = vst [vmem:[%s12696_s6 + $0x28] sm:$0xff] %v8847_v47 }
0x19c2   :  { %8870 = vsyncpa [#allocation5], 1 }
0x19c3   :  { %8871 = vsyncpa [#allocation7], 1 }

</bundles_post_ra>
